<compile_context>
chip_gen: v7x
topology: tpu7x:2x2x1
jax: 0.10.0
libtpu: 0.0.40
codegen_flags: <defaults>
</compile_context>

<pallas_src>
import functools

import numpy as np
import jax
import jax.numpy as jnp
from jax.experimental import pallas as pl
from jax.experimental.pallas import tpu as pltpu


def _round_up(x, m):
    return (x + m - 1) // m * m


def _pick_batch_tile(n):
    """Largest batch tile <= 8 that divides n while keeping >= 2 grid steps."""
    cap = max(1, min(8, n // 2))
    for tb in range(cap, 0, -1):
        if n % tb == 0:
            return tb
    return 1


# ---------------------------------------------------------------------------
# Kernel 1: fused fc1 -> relu -> fc2 -> relu   (bf16 MXU inputs, f32 accumulate)
# ---------------------------------------------------------------------------
def _fc_kernel(z_ref, w1_ref, b1_ref, w2_ref, b2_ref, o_ref):
    z = z_ref[...].astype(jnp.bfloat16)
    h = jnp.dot(z, w1_ref[...], preferred_element_type=jnp.float32)
    h = jnp.maximum(h + b1_ref[...], 0.0).astype(jnp.bfloat16)
    y = jnp.dot(h, w2_ref[...], preferred_element_type=jnp.float32)
    y = jnp.maximum(y + b2_ref[...], 0.0)
    o_ref[...] = y.astype(o_ref.dtype)


def _fc_forward(z, w1, b1, w2, b2):
    """(N, in_dim) f32 -> (N, 2048) bf16, columns already in NHWC (h, w, c) order."""
    n, k_in = z.shape
    k_hidden, n_out = w2.shape
    n_col_splits = 2 if n_out % 2 == 0 else 1       # >=2 grid steps for v7x megacore
    tn = n_out // n_col_splits

    if n <= 512:                                    # single full-M block, no padding
        tm, n_pad, z_p = n, n, z
    else:
        tm = 256
        n_pad = _round_up(n, tm)
        z_p = z if n_pad == n else jnp.zeros((n_pad, k_in), z.dtype).at[:n].set(z)

    # working set: double-buffered blocks + f32 hidden intermediate + headroom
    work = 2 * (tm * k_in * 4 + k_in * k_hidden * 2 + k_hidden * tn * 2
                + tm * tn * 2 + 4 * (k_hidden + tn)) + tm * k_hidden * 4 + (4 << 20)
    vmem_limit = int(min(max(work, 32 << 20), 48 << 20))

    out = pl.pallas_call(
        _fc_kernel,
        out_shape=jax.ShapeDtypeStruct((n_pad, n_out), jnp.bfloat16),
        grid_spec=pltpu.PrefetchScalarGridSpec(
            num_scalar_prefetch=0,
            grid=(n_pad // tm, n_col_splits),
            in_specs=[
                pl.BlockSpec((tm, k_in), lambda i, j: (i, 0)),        # z row tile
                pl.BlockSpec((k_in, k_hidden), lambda i, j: (0, 0)),  # W1 (resident)
                pl.BlockSpec((1, k_hidden), lambda i, j: (0, 0)),     # b1
                pl.BlockSpec((k_hidden, tn), lambda i, j: (0, j)),    # W2 column tile
                pl.BlockSpec((1, tn), lambda i, j: (0, j)),           # b2 column tile
            ],
            out_specs=pl.BlockSpec((tm, tn), lambda i, j: (i, j)),
        ),
        compiler_params=pltpu.CompilerParams(
            dimension_semantics=("parallel", "parallel"),
            vmem_limit_bytes=vmem_limit,
        ),
    )(z_p, w1, b1, w2, b2)
    return out if n_pad == n else out[:n]


# ---------------------------------------------------------------------------
# Kernel 2: ConvTranspose2d (stride 2, pad 1, KH=4) as a fused row-pair matmul.
#
# Activations are kept as 2-D row slabs: rows = (batch, h), cols = (w, c) flattened.
# Output row 2r   = x[r-1] @ M_top_even + x[r] @ M_mid_even            (kh = 3, 1)
# Output row 2r+1 = x[r]   @ M_mid_odd  + x[r+1] @ M_bot_odd           (kh = 2, 0)
# so the kernel emits (rows, 2*OW*Cout) = [row 2r | row 2r+1]; the W-direction
# conv-transpose (incl. its border handling) is baked into the M matrices at init.
# ---------------------------------------------------------------------------
def _deconv_kernel(x_ref, mt_ref, mm_ref, mb_ref, b_ref, o_ref, *, rows_per_image, act):
    x = x_ref[...]                                   # (tm, W*Cin) bf16
    tm, wc = x.shape
    zero_row = jnp.zeros((1, wc), x.dtype)
    x_up = jnp.concatenate([zero_row, x[:tm - 1, :]], axis=0)   # x_up[r] = x[r-1]
    x_dn = jnp.concatenate([x[1:, :], zero_row], axis=0)        # x_dn[r] = x[r+1]

    # zero the rows that crossed an image boundary inside this block
    r = jax.lax.broadcasted_iota(jnp.int32, (tm, 1), 0)
    r_in_img = jnp.bitwise_and(r, rows_per_image - 1)           # rows_per_image is 2^k
    x_up = jnp.where(r_in_img == 0, zero_row, x_up)
    x_dn = jnp.where(r_in_img == rows_per_image - 1, zero_row, x_dn)

    acc = jnp.dot(x, mm_ref[...], preferred_element_type=jnp.float32)
    acc = acc + jnp.dot(x_up, mt_ref[...], preferred_element_type=jnp.float32)
    acc = acc + jnp.dot(x_dn, mb_ref[...], preferred_element_type=jnp.float32)
    acc = acc + b_ref[...]
    if act == "relu":
        acc = jnp.maximum(acc, 0.0)
    elif act == "tanh":
        acc = jnp.tanh(acc)
    o_ref[...] = acc.astype(o_ref.dtype)


def _deconv_forward(x, mt, mm, mb, bias_row, *, rows_per_image, act, batch_tile, out_dtype):
    rows, wcin = x.shape
    ncol = mm.shape[1]                              # 2 * OW * Cout
    tm = batch_tile * rows_per_image
    kernel = functools.partial(_deconv_kernel, rows_per_image=rows_per_image, act=act)
    return pl.pallas_call(
        kernel,
        out_shape=jax.ShapeDtypeStruct((rows, ncol), out_dtype),
        grid_spec=pltpu.PrefetchScalarGridSpec(
            num_scalar_prefetch=0,
            grid=(rows // tm,),
            in_specs=[
                pl.BlockSpec((tm, wcin), lambda i: (i, 0)),     # activation row tile
                pl.BlockSpec(mt.shape, lambda i: (0, 0)),       # x[r-1] weights (resident)
                pl.BlockSpec(mm.shape, lambda i: (0, 0)),       # x[r]   weights
                pl.BlockSpec(mb.shape, lambda i: (0, 0)),       # x[r+1] weights
                pl.BlockSpec((1, ncol), lambda i: (0, 0)),      # bias row
            ],
            out_specs=pl.BlockSpec((tm, ncol), lambda i: (i, 0)),
        ),
        compiler_params=pltpu.CompilerParams(
            dimension_semantics=("parallel",),
        ),
    )(x, mt, mm, mb, bias_row)


# ---------------------------------------------------------------------------
# Parameters (PyTorch layout) + one-time prep + jitted forward
# ---------------------------------------------------------------------------
def init_generator_params(key, input_dim=100, output_dim=1):
    """PyTorch-layout parameters (normal*0.02, zero bias, like utils.initialize_weights)."""
    ks = jax.random.split(key, 5)
    std = 0.02
    f32 = jnp.float32
    return {
        # nn.Linear stores weight as (out, in)
        "fc1_w": jax.random.normal(ks[0], (1024, input_dim), f32) * std,
        "fc1_b": jnp.zeros((1024,), f32),
        "fc2_w": jax.random.normal(ks[1], (64 * 8 * 4, 1024), f32) * std,
        "fc2_b": jnp.zeros((64 * 8 * 4,), f32),
        # nn.ConvTranspose2d stores weight as (Cin, Cout, KH, KW)
        "dc1_w": jax.random.normal(ks[2], (64, 32, 4, 2), f32) * std,
        "dc1_b": jnp.zeros((32,), f32),
        "dc2_w": jax.random.normal(ks[3], (32, 16, 4, 3), f32) * std,
        "dc2_b": jnp.zeros((16,), f32),
        "dc3_w": jax.random.normal(ks[4], (16, output_dim, 4, 3), f32) * std,
        "dc3_b": jnp.zeros((output_dim,), f32),
    }


def build_generator(params):
    """One-time weight prep (transpose / permute / col2im-fold / bf16) + jitted forward."""
    prep = {}

    # --- fc1: (out,in) -> (in,out), bf16 ---
    prep["fc1_w"] = jnp.asarray(params["fc1_w"]).T.astype(jnp.bfloat16)      # (100, 1024)
    prep["fc1_b"] = jnp.asarray(params["fc1_b"], jnp.float32).reshape(1, -1)

    # --- fc2: transpose + permute columns NCHW(64,8,4) -> NHWC(8,4,64) ---
    perm = np.arange(64 * 8 * 4).reshape(64, 8, 4).transpose(1, 2, 0).reshape(-1)
    w2t = np.asarray(params["fc2_w"], np.float32).T[:, perm]                 # (1024, 2048)
    prep["fc2_w"] = jnp.asarray(w2t, jnp.bfloat16)
    prep["fc2_b"] = jnp.asarray(np.asarray(params["fc2_b"], np.float32)[perm]).reshape(1, -1)

    # --- deconv layers: fold col2im + stride/padding into row-pair matrices ---
    layer_meta = []
    h, w = 8, 4                                      # spatial dims after .view(-1,64,8,4)
    names = (("dc1", "relu"), ("dc2", "relu"), ("dc3", "tanh"))
    for idx, (name, act) in enumerate(names):
        wt = np.asarray(params[name + "_w"], np.float32)     # (Cin, Cout, KH, KW)
        bias = np.asarray(params[name + "_b"], np.float32)
        cin, cout, KH, KW = wt.shape
        assert KH == 4 and (h & (h - 1)) == 0, \
            "row-pair deconv scheme assumes KH=4, stride=2, padding=1, pow2 input rows"
        oh, ow = (h - 1) * 2 - 2 + KH, (w - 1) * 2 - 2 + KW

        def tap(kh):
            # W-direction conv-transpose for kernel row kh: (W*Cin, OW*Cout)
            m = np.zeros((w * cin, ow * cout), np.float32)
            for iw in range(w):
                for kw in range(KW):
                    o = iw * 2 - 1 + kw
                    if 0 <= o < ow:
                        m[iw * cin:(iw + 1) * cin, o * cout:(o + 1) * cout] += wt[:, :, kh, kw]
            return m

        zblk = np.zeros((w * cin, ow * cout), np.float32)
        prep[name + "_mt"] = jnp.asarray(np.concatenate([tap(3), zblk], 1), jnp.bfloat16)
        prep[name + "_mm"] = jnp.asarray(np.concatenate([tap(1), tap(2)], 1), jnp.bfloat16)
        prep[name + "_mb"] = jnp.asarray(np.concatenate([zblk, tap(0)], 1), jnp.bfloat16)
        prep[name + "_b"] = jnp.asarray(np.tile(bias, 2 * ow).reshape(1, -1), jnp.float32)
        layer_meta.append(dict(name=name, act=act, hin=h, hout=oh, wout=ow, cout=cout,
                               out_dtype=(jnp.float32 if idx == len(names) - 1
                                          else jnp.bfloat16)))
        h, w = oh, ow

    final_h, final_w, final_c = h, w, layer_meta[-1]["cout"]

    @jax.jit
    def forward(prep, z):
        n = z.shape[0]
        x = _fc_forward(z, prep["fc1_w"], prep["fc1_b"], prep["fc2_w"], prep["fc2_b"])
        x = x.reshape(n * 8, 4 * 64)                 # NHWC row slab: (N*H, W*Cin)
        tb = _pick_batch_tile(n)
        for lm in layer_meta:
            x = _deconv_forward(
                x, prep[lm["name"] + "_mt"], prep[lm["name"] + "_mm"],
                prep[lm["name"] + "_mb"], prep[lm["name"] + "_b"],
                rows_per_image=lm["hin"], act=lm["act"],
                batch_tile=tb, out_dtype=lm["out_dtype"])
            # (N*Hin, 2*OW*Cout) -> (N*2*Hin, OW*Cout): pure row-major reshape (free)
            x = x.reshape(n * lm["hout"], lm["wout"] * lm["cout"])
        # (N*64, 21*Cout) -> NCHW (N, Cout, 64, 21); Cout==1 so this is just a reshape
        return x.reshape(n, final_h, final_w, final_c).transpose(0, 3, 1, 2)

    return prep, forward


# ---------------------------------------------------------------------------
# Pure-jnp float32 reference (direct transcription of the PyTorch module)
# ---------------------------------------------------------------------------
def reference_forward(params, z):
    x = jnp.maximum(z @ params["fc1_w"].T + params["fc1_b"], 0.0)
    x = jnp.maximum(x @ params["fc2_w"].T + params["fc2_b"], 0.0)
    n = z.shape[0]
    x = x.reshape(n, 64, 8, 4).transpose(0, 2, 3, 1)          # NHWC
    for name, act in (("dc1", "relu"), ("dc2", "relu"), ("dc3", "tanh")):
        wt = params[name + "_w"].astype(jnp.float32)          # (Cin, Cout, KH, KW)
        b = params[name + "_b"]
        N, H, W, _ = x.shape
        _, cout, KH, KW = wt.shape
        OH, OW = (H - 1) * 2 - 2 + KH, (W - 1) * 2 - 2 + KW
        y = jnp.einsum("nhwi,iokl->nhwklo", x, wt)
        out = jnp.zeros((N, OH, OW, cout), jnp.float32)
        for kh in range(KH):
            oh_off = kh - 1
            h0 = max(0, (-oh_off + 1) // 2)
            h1 = min(H, (OH - 1 - oh_off) // 2 + 1)
            for kw in range(KW):
                ow_off = kw - 1
                w0 = max(0, (-ow_off + 1) // 2)
                w1 = min(W, (OW - 1 - ow_off) // 2 + 1)
                if h0 >= h1 or w0 >= w1:
                    continue
                out = out.at[:, h0 * 2 + oh_off:(h1 - 1) * 2 + oh_off + 1:2,
                             w0 * 2 + ow_off:(w1 - 1) * 2 + ow_off + 1:2, :].add(
                                 y[:, h0:h1, w0:w1, kh, kw, :])
        x = out + b
        x = jnp.maximum(x, 0.0) if act == "relu" else jnp.tanh(x)
    return x.transpose(0, 3, 1, 2)


if __name__ == "__main__":
    key = jax.random.PRNGKey(0)
    pkey, zkey = jax.random.split(key)
    params = init_generator_params(pkey, input_dim=100, output_dim=1)
    prep, forward = build_generator(params)

    z = jax.random.normal(zkey, (2, 100), jnp.float32)
    out = jax.block_until_ready(forward(prep, z))

    assert out.shape == (2, 1, 64, 21), out.shape
    assert bool(jnp.all(jnp.isfinite(out)))

    # loose check vs f32 reference (kernel path uses bf16 weights/activations)
    ref = jax.block_until_ready(jax.jit(reference_forward)(params, z))
    max_err = float(jnp.max(jnp.abs(out.astype(jnp.float32) - ref)))
    assert max_err < 2e-2, f"mismatch vs f32 reference: {max_err}"
    print("KERNEL_OK")
</pallas_src>

<mosaic_0001>
module attributes {stable_mosaic.version = 11 : i64} {
  func.func @_deconv_kernel(%arg0: i32, %arg1: memref<8x256xbf16, #tpu.memory_space<vmem>>, %arg2: memref<256x384xbf16, #tpu.memory_space<vmem>>, %arg3: memref<256x384xbf16, #tpu.memory_space<vmem>>, %arg4: memref<256x384xbf16, #tpu.memory_space<vmem>>, %arg5: memref<1x384xf32, #tpu.memory_space<vmem>>, %arg6: memref<8x384xbf16, #tpu.memory_space<vmem>>) attributes {dimension_semantics = [#tpu.dimension_semantics<parallel>], iteration_bounds = array<i64: 2>, scalar_prefetch = 0 : i64, scratch_operands = 0 : i64, tpu.core_type = #tpu.core_type<tc>, window_params = [{transform_indices = @transform_0, window_bounds = array<i64: 8, 256>}, {pipeline_mode = #tpu.pipeline_mode<synchronous>, transform_indices = @transform_1, window_bounds = array<i64: 256, 384>}, {pipeline_mode = #tpu.pipeline_mode<synchronous>, transform_indices = @transform_2, window_bounds = array<i64: 256, 384>}, {pipeline_mode = #tpu.pipeline_mode<synchronous>, transform_indices = @transform_3, window_bounds = array<i64: 256, 384>}, {pipeline_mode = #tpu.pipeline_mode<synchronous>, transform_indices = @transform_4, window_bounds = array<i64: 1, 384>}, {transform_indices = @transform_5, window_bounds = array<i64: 8, 384>}]} {
    %c0 = arith.constant 0 : index
    %c0_0 = arith.constant 0 : index
    %0 = vector.load %arg1[%c0, %c0_0] : memref<8x256xbf16, #tpu.memory_space<vmem>>, vector<8x256xbf16>
    %cst = arith.constant 0.000000e+00 : bf16
    %1 = vector.broadcast %cst : bf16 to vector<1x256xbf16>
    %2 = vector.extract_strided_slice %0 {offsets = [0, 0], sizes = [7, 256], strides = [1, 1]} : vector<8x256xbf16> to vector<7x256xbf16>
    %3 = tpu.concatenate %1, %2 in 0 : vector<1x256xbf16>, vector<7x256xbf16> -> vector<8x256xbf16>
    %4 = vector.extract_strided_slice %0 {offsets = [1, 0], sizes = [7, 256], strides = [1, 1]} : vector<8x256xbf16> to vector<7x256xbf16>
    %5 = tpu.concatenate %4, %1 in 0 : vector<7x256xbf16>, vector<1x256xbf16> -> vector<8x256xbf16>
    %6 = tpu.iota {dimensions = array<i32: 0>} : vector<8x1xi32>
    %c7_i32 = arith.constant 7 : i32
    %7 = vector.broadcast %c7_i32 : i32 to vector<8x1xi32>
    %8 = arith.andi %6, %7 : vector<8x1xi32>
    %c0_i32 = arith.constant 0 : i32
    %9 = vector.broadcast %c0_i32 : i32 to vector<8x1xi32>
    %10 = arith.cmpi eq, %8, %9 : vector<8x1xi32>
    %11 = vector.shape_cast %10 : vector<8x1xi1> to vector<8x1xi1>
    %12 = vector.broadcast %11 : vector<8x1xi1> to vector<8x256xi1>
    %13 = vector.shape_cast %1 : vector<1x256xbf16> to vector<1x256xbf16>
    %14 = vector.broadcast %13 : vector<1x256xbf16> to vector<8x256xbf16>
    %15 = arith.select %12, %14, %3 : vector<8x256xi1>, vector<8x256xbf16>
    %c7_i32_1 = arith.constant 7 : i32
    %16 = vector.broadcast %c7_i32_1 : i32 to vector<8x1xi32>
    %17 = arith.cmpi eq, %8, %16 : vector<8x1xi32>
    %18 = vector.shape_cast %17 : vector<8x1xi1> to vector<8x1xi1>
    %19 = vector.broadcast %18 : vector<8x1xi1> to vector<8x256xi1>
    %20 = vector.shape_cast %1 : vector<1x256xbf16> to vector<1x256xbf16>
    %21 = vector.broadcast %20 : vector<1x256xbf16> to vector<8x256xbf16>
    %22 = arith.select %19, %21, %5 : vector<8x256xi1>, vector<8x256xbf16>
    %c0_2 = arith.constant 0 : index
    %c0_3 = arith.constant 0 : index
    %23 = vector.load %arg3[%c0_2, %c0_3] : memref<256x384xbf16, #tpu.memory_space<vmem>>, vector<256x384xbf16>
    %cst_4 = arith.constant dense<0.000000e+00> : vector<8x384xf32>
    %24 = tpu.matmul %0, %23, %cst_4 {dimension_numbers = #tpu.dot_dimension_numbers<[1], [0], [0], [1], [0, 0, 1, 1], [], []>} : vector<8x256xbf16>, vector<256x384xbf16>, vector<8x384xf32> -> vector<8x384xf32>
    %c0_5 = arith.constant 0 : index
    %c0_6 = arith.constant 0 : index
    %25 = vector.load %arg2[%c0_5, %c0_6] : memref<256x384xbf16, #tpu.memory_space<vmem>>, vector<256x384xbf16>
    %cst_7 = arith.constant dense<0.000000e+00> : vector<8x384xf32>
    %26 = tpu.matmul %15, %25, %cst_7 {dimension_numbers = #tpu.dot_dimension_numbers<[1], [0], [0], [1], [0, 0, 1, 1], [], []>} : vector<8x256xbf16>, vector<256x384xbf16>, vector<8x384xf32> -> vector<8x384xf32>
    %27 = arith.addf %24, %26 : vector<8x384xf32>
    %c0_8 = arith.constant 0 : index
    %c0_9 = arith.constant 0 : index
    %28 = vector.load %arg4[%c0_8, %c0_9] : memref<256x384xbf16, #tpu.memory_space<vmem>>, vector<256x384xbf16>
    %cst_10 = arith.constant dense<0.000000e+00> : vector<8x384xf32>
    %29 = tpu.matmul %22, %28, %cst_10 {dimension_numbers = #tpu.dot_dimension_numbers<[1], [0], [0], [1], [0, 0, 1, 1], [], []>} : vector<8x256xbf16>, vector<256x384xbf16>, vector<8x384xf32> -> vector<8x384xf32>
    %30 = arith.addf %27, %29 : vector<8x384xf32>
    %c0_11 = arith.constant 0 : index
    %c0_12 = arith.constant 0 : index
    %31 = vector.load %arg5[%c0_11, %c0_12] : memref<1x384xf32, #tpu.memory_space<vmem>>, vector<1x384xf32>
    %32 = vector.broadcast %31 : vector<1x384xf32> to vector<8x384xf32>
    %33 = arith.addf %30, %32 : vector<8x384xf32>
    %cst_13 = arith.constant 0.000000e+00 : f32
    %34 = vector.broadcast %cst_13 : f32 to vector<8x384xf32>
    %35 = arith.maximumf %33, %34 : vector<8x384xf32>
    %36 = arith.truncf %35 : vector<8x384xf32> to vector<8x384xbf16>
    %c0_14 = arith.constant 0 : index
    %c0_15 = arith.constant 0 : index
    %37 = vector.load %arg6[%c0_14, %c0_15] : memref<8x384xbf16, #tpu.memory_space<vmem>>, vector<8x384xbf16>
    tpu.vector_store %arg6[%c0_14, %c0_15], %36 {strides = array<i32>} : memref<8x384xbf16, #tpu.memory_space<vmem>>, vector<8x384xbf16>,
    return
  }
  func.func @transform_0(%arg0: i32) -> (i32, i32) {
    %c0_i32 = arith.constant 0 : i32
    %c0_i32_0 = arith.constant 0 : i32
    return %arg0, %c0_i32 : i32, i32
  }
  func.func @transform_1(%arg0: i32) -> (i32, i32) {
    %c0_i32 = arith.constant 0 : i32
    %c0_i32_0 = arith.constant 0 : i32
    %c0_i32_1 = arith.constant 0 : i32
    return %c0_i32, %c0_i32_0 : i32, i32
  }
  func.func @transform_2(%arg0: i32) -> (i32, i32) {
    %c0_i32 = arith.constant 0 : i32
    %c0_i32_0 = arith.constant 0 : i32
    %c0_i32_1 = arith.constant 0 : i32
    return %c0_i32, %c0_i32_0 : i32, i32
  }
  func.func @transform_3(%arg0: i32) -> (i32, i32) {
    %c0_i32 = arith.constant 0 : i32
    %c0_i32_0 = arith.constant 0 : i32
    %c0_i32_1 = arith.constant 0 : i32
    return %c0_i32, %c0_i32_0 : i32, i32
  }
  func.func @transform_4(%arg0: i32) -> (i32, i32) {
    %c0_i32 = arith.constant 0 : i32
    %c0_i32_0 = arith.constant 0 : i32
    %c0_i32_1 = arith.constant 0 : i32
    return %c0_i32, %c0_i32_0 : i32, i32
  }
  func.func @transform_5(%arg0: i32) -> (i32, i32) {
    %c0_i32 = arith.constant 0 : i32
    %c0_i32_0 = arith.constant 0 : i32
    return %arg0, %c0_i32 : i32, i32
  }
}

module attributes {stable_mosaic.version = 11 : i64} {
  func.func @_fc_kernel(%arg0: i32, %arg1: i32, %arg2: memref<2x100xf32, #tpu.memory_space<vmem>>, %arg3: memref<100x1024xbf16, #tpu.memory_space<vmem>>, %arg4: memref<1x1024xf32, #tpu.memory_space<vmem>>, %arg5: memref<1024x1024xbf16, #tpu.memory_space<vmem>>, %arg6: memref<1x1024xf32, #tpu.memory_space<vmem>>, %arg7: memref<2x1024xbf16, #tpu.memory_space<vmem>>) attributes {dimension_semantics = [#tpu.dimension_semantics<parallel>, #tpu.dimension_semantics<parallel>], iteration_bounds = array<i64: 1, 2>, scalar_prefetch = 0 : i64, scratch_operands = 0 : i64, tpu.core_type = #tpu.core_type<tc>, window_params = [{transform_indices = @transform_0, window_bounds = array<i64: 2, 100>}, {pipeline_mode = #tpu.pipeline_mode<synchronous>, transform_indices = @transform_1, window_bounds = array<i64: 100, 1024>}, {pipeline_mode = #tpu.pipeline_mode<synchronous>, transform_indices = @transform_2, window_bounds = array<i64: 1, 1024>}, {transform_indices = @transform_3, window_bounds = array<i64: 1024, 1024>}, {transform_indices = @transform_4, window_bounds = array<i64: 1, 1024>}, {transform_indices = @transform_5, window_bounds = array<i64: 2, 1024>}]} {
    %c0 = arith.constant 0 : index
    %c0_0 = arith.constant 0 : index
    %0 = vector.load %arg2[%c0, %c0_0] : memref<2x100xf32, #tpu.memory_space<vmem>>, vector<2x100xf32>
    %1 = arith.truncf %0 : vector<2x100xf32> to vector<2x100xbf16>
    %c0_1 = arith.constant 0 : index
    %c0_2 = arith.constant 0 : index
    %2 = vector.load %arg3[%c0_1, %c0_2] : memref<100x1024xbf16, #tpu.memory_space<vmem>>, vector<100x1024xbf16>
    %cst = arith.constant dense<0.000000e+00> : vector<2x1024xf32>
    %3 = tpu.matmul %1, %2, %cst {dimension_numbers = #tpu.dot_dimension_numbers<[1], [0], [0], [1], [0, 0, 1, 1], [], []>} : vector<2x100xbf16>, vector<100x1024xbf16>, vector<2x1024xf32> -> vector<2x1024xf32>
    %c0_3 = arith.constant 0 : index
    %c0_4 = arith.constant 0 : index
    %4 = vector.load %arg4[%c0_3, %c0_4] : memref<1x1024xf32, #tpu.memory_space<vmem>>, vector<1x1024xf32>
    %5 = vector.broadcast %4 : vector<1x1024xf32> to vector<2x1024xf32>
    %6 = arith.addf %3, %5 : vector<2x1024xf32>
    %cst_5 = arith.constant 0.000000e+00 : f32
    %7 = vector.broadcast %cst_5 : f32 to vector<2x1024xf32>
    %8 = arith.maximumf %6, %7 : vector<2x1024xf32>
    %9 = arith.truncf %8 : vector<2x1024xf32> to vector<2x1024xbf16>
    %c0_6 = arith.constant 0 : index
    %c0_7 = arith.constant 0 : index
    %10 = vector.load %arg5[%c0_6, %c0_7] : memref<1024x1024xbf16, #tpu.memory_space<vmem>>, vector<1024x1024xbf16>
    %cst_8 = arith.constant dense<0.000000e+00> : vector<2x1024xf32>
    %11 = tpu.matmul %9, %10, %cst_8 {dimension_numbers = #tpu.dot_dimension_numbers<[1], [0], [0], [1], [0, 0, 1, 1], [], []>} : vector<2x1024xbf16>, vector<1024x1024xbf16>, vector<2x1024xf32> -> vector<2x1024xf32>
    %c0_9 = arith.constant 0 : index
    %c0_10 = arith.constant 0 : index
    %12 = vector.load %arg6[%c0_9, %c0_10] : memref<1x1024xf32, #tpu.memory_space<vmem>>, vector<1x1024xf32>
    %13 = vector.broadcast %12 : vector<1x1024xf32> to vector<2x1024xf32>
    %14 = arith.addf %11, %13 : vector<2x1024xf32>
    %cst_11 = arith.constant 0.000000e+00 : f32
    %15 = vector.broadcast %cst_11 : f32 to vector<2x1024xf32>
    %16 = arith.maximumf %14, %15 : vector<2x1024xf32>
    %17 = arith.truncf %16 : vector<2x1024xf32> to vector<2x1024xbf16>
    %c0_12 = arith.constant 0 : index
    %c0_13 = arith.constant 0 : index
    %18 = vector.load %arg7[%c0_12, %c0_13] : memref<2x1024xbf16, #tpu.memory_space<vmem>>, vector<2x1024xbf16>
    tpu.vector_store %arg7[%c0_12, %c0_13], %17 {strides = array<i32>} : memref<2x1024xbf16, #tpu.memory_space<vmem>>, vector<2x1024xbf16>,
    return
  }
  func.func @transform_0(%arg0: i32, %arg1: i32) -> (i32, i32) {
    %c0_i32 = arith.constant 0 : i32
    %c0_i32_0 = arith.constant 0 : i32
    return %arg0, %c0_i32 : i32, i32
  }
  func.func @transform_1(%arg0: i32, %arg1: i32) -> (i32, i32) {
    %c0_i32 = arith.constant 0 : i32
    %c0_i32_0 = arith.constant 0 : i32
    %c0_i32_1 = arith.constant 0 : i32
    return %c0_i32, %c0_i32_0 : i32, i32
  }
  func.func @transform_2(%arg0: i32, %arg1: i32) -> (i32, i32) {
    %c0_i32 = arith.constant 0 : i32
    %c0_i32_0 = arith.constant 0 : i32
    %c0_i32_1 = arith.constant 0 : i32
    return %c0_i32, %c0_i32_0 : i32, i32
  }
  func.func @transform_3(%arg0: i32, %arg1: i32) -> (i32, i32) {
    %c0_i32 = arith.constant 0 : i32
    %c0_i32_0 = arith.constant 0 : i32
    return %c0_i32, %arg1 : i32, i32
  }
  func.func @transform_4(%arg0: i32, %arg1: i32) -> (i32, i32) {
    %c0_i32 = arith.constant 0 : i32
    %c0_i32_0 = arith.constant 0 : i32
    return %c0_i32, %arg1 : i32, i32
  }
  func.func @transform_5(%arg0: i32, %arg1: i32) -> (i32, i32) {
    %c0_i32 = arith.constant 0 : i32
    return %arg0, %arg1 : i32, i32
  }
}

module attributes {stable_mosaic.version = 11 : i64} {
  func.func @_deconv_kernel(%arg0: i32, %arg1: memref<16x192xbf16, #tpu.memory_space<vmem>>, %arg2: memref<192x352xbf16, #tpu.memory_space<vmem>>, %arg3: memref<192x352xbf16, #tpu.memory_space<vmem>>, %arg4: memref<192x352xbf16, #tpu.memory_space<vmem>>, %arg5: memref<1x352xf32, #tpu.memory_space<vmem>>, %arg6: memref<16x352xbf16, #tpu.memory_space<vmem>>) attributes {dimension_semantics = [#tpu.dimension_semantics<parallel>], iteration_bounds = array<i64: 2>, scalar_prefetch = 0 : i64, scratch_operands = 0 : i64, tpu.core_type = #tpu.core_type<tc>, window_params = [{transform_indices = @transform_0, window_bounds = array<i64: 16, 192>}, {pipeline_mode = #tpu.pipeline_mode<synchronous>, transform_indices = @transform_1, window_bounds = array<i64: 192, 352>}, {pipeline_mode = #tpu.pipeline_mode<synchronous>, transform_indices = @transform_2, window_bounds = array<i64: 192, 352>}, {pipeline_mode = #tpu.pipeline_mode<synchronous>, transform_indices = @transform_3, window_bounds = array<i64: 192, 352>}, {pipeline_mode = #tpu.pipeline_mode<synchronous>, transform_indices = @transform_4, window_bounds = array<i64: 1, 352>}, {transform_indices = @transform_5, window_bounds = array<i64: 16, 352>}]} {
    %c0 = arith.constant 0 : index
    %c0_0 = arith.constant 0 : index
    %0 = vector.load %arg1[%c0, %c0_0] : memref<16x192xbf16, #tpu.memory_space<vmem>>, vector<16x192xbf16>
    %cst = arith.constant 0.000000e+00 : bf16
    %1 = vector.broadcast %cst : bf16 to vector<1x192xbf16>
    %2 = vector.extract_strided_slice %0 {offsets = [0, 0], sizes = [15, 192], strides = [1, 1]} : vector<16x192xbf16> to vector<15x192xbf16>
    %3 = tpu.concatenate %1, %2 in 0 : vector<1x192xbf16>, vector<15x192xbf16> -> vector<16x192xbf16>
    %4 = vector.extract_strided_slice %0 {offsets = [1, 0], sizes = [15, 192], strides = [1, 1]} : vector<16x192xbf16> to vector<15x192xbf16>
    %5 = tpu.concatenate %4, %1 in 0 : vector<15x192xbf16>, vector<1x192xbf16> -> vector<16x192xbf16>
    %6 = tpu.iota {dimensions = array<i32: 0>} : vector<16x1xi32>
    %c15_i32 = arith.constant 15 : i32
    %7 = vector.broadcast %c15_i32 : i32 to vector<16x1xi32>
    %8 = arith.andi %6, %7 : vector<16x1xi32>
    %c0_i32 = arith.constant 0 : i32
    %9 = vector.broadcast %c0_i32 : i32 to vector<16x1xi32>
    %10 = arith.cmpi eq, %8, %9 : vector<16x1xi32>
    %11 = vector.shape_cast %10 : vector<16x1xi1> to vector<16x1xi1>
    %12 = vector.broadcast %11 : vector<16x1xi1> to vector<16x192xi1>
    %13 = vector.shape_cast %1 : vector<1x192xbf16> to vector<1x192xbf16>
    %14 = vector.broadcast %13 : vector<1x192xbf16> to vector<16x192xbf16>
    %15 = arith.select %12, %14, %3 : vector<16x192xi1>, vector<16x192xbf16>
    %c15_i32_1 = arith.constant 15 : i32
    %16 = vector.broadcast %c15_i32_1 : i32 to vector<16x1xi32>
    %17 = arith.cmpi eq, %8, %16 : vector<16x1xi32>
    %18 = vector.shape_cast %17 : vector<16x1xi1> to vector<16x1xi1>
    %19 = vector.broadcast %18 : vector<16x1xi1> to vector<16x192xi1>
    %20 = vector.shape_cast %1 : vector<1x192xbf16> to vector<1x192xbf16>
    %21 = vector.broadcast %20 : vector<1x192xbf16> to vector<16x192xbf16>
    %22 = arith.select %19, %21, %5 : vector<16x192xi1>, vector<16x192xbf16>
    %c0_2 = arith.constant 0 : index
    %c0_3 = arith.constant 0 : index
    %23 = vector.load %arg3[%c0_2, %c0_3] : memref<192x352xbf16, #tpu.memory_space<vmem>>, vector<192x352xbf16>
    %cst_4 = arith.constant dense<0.000000e+00> : vector<16x352xf32>
    %24 = tpu.matmul %0, %23, %cst_4 {dimension_numbers = #tpu.dot_dimension_numbers<[1], [0], [0], [1], [0, 0, 1, 1], [], []>} : vector<16x192xbf16>, vector<192x352xbf16>, vector<16x352xf32> -> vector<16x352xf32>
    %c0_5 = arith.constant 0 : index
    %c0_6 = arith.constant 0 : index
    %25 = vector.load %arg2[%c0_5, %c0_6] : memref<192x352xbf16, #tpu.memory_space<vmem>>, vector<192x352xbf16>
    %cst_7 = arith.constant dense<0.000000e+00> : vector<16x352xf32>
    %26 = tpu.matmul %15, %25, %cst_7 {dimension_numbers = #tpu.dot_dimension_numbers<[1], [0], [0], [1], [0, 0, 1, 1], [], []>} : vector<16x192xbf16>, vector<192x352xbf16>, vector<16x352xf32> -> vector<16x352xf32>
    %27 = arith.addf %24, %26 : vector<16x352xf32>
    %c0_8 = arith.constant 0 : index
    %c0_9 = arith.constant 0 : index
    %28 = vector.load %arg4[%c0_8, %c0_9] : memref<192x352xbf16, #tpu.memory_space<vmem>>, vector<192x352xbf16>
    %cst_10 = arith.constant dense<0.000000e+00> : vector<16x352xf32>
    %29 = tpu.matmul %22, %28, %cst_10 {dimension_numbers = #tpu.dot_dimension_numbers<[1], [0], [0], [1], [0, 0, 1, 1], [], []>} : vector<16x192xbf16>, vector<192x352xbf16>, vector<16x352xf32> -> vector<16x352xf32>
    %30 = arith.addf %27, %29 : vector<16x352xf32>
    %c0_11 = arith.constant 0 : index
    %c0_12 = arith.constant 0 : index
    %31 = vector.load %arg5[%c0_11, %c0_12] : memref<1x352xf32, #tpu.memory_space<vmem>>, vector<1x352xf32>
    %32 = vector.broadcast %31 : vector<1x352xf32> to vector<16x352xf32>
    %33 = arith.addf %30, %32 : vector<16x352xf32>
    %cst_13 = arith.constant 0.000000e+00 : f32
    %34 = vector.broadcast %cst_13 : f32 to vector<16x352xf32>
    %35 = arith.maximumf %33, %34 : vector<16x352xf32>
    %36 = arith.truncf %35 : vector<16x352xf32> to vector<16x352xbf16>
    %c0_14 = arith.constant 0 : index
    %c0_15 = arith.constant 0 : index
    %37 = vector.load %arg6[%c0_14, %c0_15] : memref<16x352xbf16, #tpu.memory_space<vmem>>, vector<16x352xbf16>
    tpu.vector_store %arg6[%c0_14, %c0_15], %36 {strides = array<i32>} : memref<16x352xbf16, #tpu.memory_space<vmem>>, vector<16x352xbf16>,
    return
  }
  func.func @transform_0(%arg0: i32) -> (i32, i32) {
    %c0_i32 = arith.constant 0 : i32
    %c0_i32_0 = arith.constant 0 : i32
    return %arg0, %c0_i32 : i32, i32
  }
  func.func @transform_1(%arg0: i32) -> (i32, i32) {
    %c0_i32 = arith.constant 0 : i32
    %c0_i32_0 = arith.constant 0 : i32
    %c0_i32_1 = arith.constant 0 : i32
    return %c0_i32, %c0_i32_0 : i32, i32
  }
  func.func @transform_2(%arg0: i32) -> (i32, i32) {
    %c0_i32 = arith.constant 0 : i32
    %c0_i32_0 = arith.constant 0 : i32
    %c0_i32_1 = arith.constant 0 : i32
    return %c0_i32, %c0_i32_0 : i32, i32
  }
  func.func @transform_3(%arg0: i32) -> (i32, i32) {
    %c0_i32 = arith.constant 0 : i32
    %c0_i32_0 = arith.constant 0 : i32
    %c0_i32_1 = arith.constant 0 : i32
    return %c0_i32, %c0_i32_0 : i32, i32
  }
  func.func @transform_4(%arg0: i32) -> (i32, i32) {
    %c0_i32 = arith.constant 0 : i32
    %c0_i32_0 = arith.constant 0 : i32
    %c0_i32_1 = arith.constant 0 : i32
    return %c0_i32, %c0_i32_0 : i32, i32
  }
  func.func @transform_5(%arg0: i32) -> (i32, i32) {
    %c0_i32 = arith.constant 0 : i32
    %c0_i32_0 = arith.constant 0 : i32
    return %arg0, %c0_i32 : i32, i32
  }
}

module attributes {stable_mosaic.version = 11 : i64} {
  func.func @_deconv_kernel(%arg0: i32, %arg1: memref<32x176xbf16, #tpu.memory_space<vmem>>, %arg2: memref<176x42xbf16, #tpu.memory_space<vmem>>, %arg3: memref<176x42xbf16, #tpu.memory_space<vmem>>, %arg4: memref<176x42xbf16, #tpu.memory_space<vmem>>, %arg5: memref<1x42xf32, #tpu.memory_space<vmem>>, %arg6: memref<32x42xf32, #tpu.memory_space<vmem>>) attributes {dimension_semantics = [#tpu.dimension_semantics<parallel>], iteration_bounds = array<i64: 2>, scalar_prefetch = 0 : i64, scratch_operands = 0 : i64, tpu.core_type = #tpu.core_type<tc>, window_params = [{transform_indices = @transform_0, window_bounds = array<i64: 32, 176>}, {pipeline_mode = #tpu.pipeline_mode<synchronous>, transform_indices = @transform_1, window_bounds = array<i64: 176, 42>}, {pipeline_mode = #tpu.pipeline_mode<synchronous>, transform_indices = @transform_2, window_bounds = array<i64: 176, 42>}, {pipeline_mode = #tpu.pipeline_mode<synchronous>, transform_indices = @transform_3, window_bounds = array<i64: 176, 42>}, {pipeline_mode = #tpu.pipeline_mode<synchronous>, transform_indices = @transform_4, window_bounds = array<i64: 1, 42>}, {transform_indices = @transform_5, window_bounds = array<i64: 32, 42>}]} {
    %c0 = arith.constant 0 : index
    %c0_0 = arith.constant 0 : index
    %0 = vector.load %arg1[%c0, %c0_0] : memref<32x176xbf16, #tpu.memory_space<vmem>>, vector<32x176xbf16>
    %cst = arith.constant 0.000000e+00 : bf16
    %1 = vector.broadcast %cst : bf16 to vector<1x176xbf16>
    %2 = vector.extract_strided_slice %0 {offsets = [0, 0], sizes = [31, 176], strides = [1, 1]} : vector<32x176xbf16> to vector<31x176xbf16>
    %3 = tpu.concatenate %1, %2 in 0 : vector<1x176xbf16>, vector<31x176xbf16> -> vector<32x176xbf16>
    %4 = vector.extract_strided_slice %0 {offsets = [1, 0], sizes = [31, 176], strides = [1, 1]} : vector<32x176xbf16> to vector<31x176xbf16>
    %5 = tpu.concatenate %4, %1 in 0 : vector<31x176xbf16>, vector<1x176xbf16> -> vector<32x176xbf16>
    %6 = tpu.iota {dimensions = array<i32: 0>} : vector<32x1xi32>
    %c31_i32 = arith.constant 31 : i32
    %7 = vector.broadcast %c31_i32 : i32 to vector<32x1xi32>
    %8 = arith.andi %6, %7 : vector<32x1xi32>
    %c0_i32 = arith.constant 0 : i32
    %9 = vector.broadcast %c0_i32 : i32 to vector<32x1xi32>
    %10 = arith.cmpi eq, %8, %9 : vector<32x1xi32>
    %11 = vector.shape_cast %10 : vector<32x1xi1> to vector<32x1xi1>
    %12 = vector.broadcast %11 : vector<32x1xi1> to vector<32x176xi1>
    %13 = vector.shape_cast %1 : vector<1x176xbf16> to vector<1x176xbf16>
    %14 = vector.broadcast %13 : vector<1x176xbf16> to vector<32x176xbf16>
    %15 = arith.select %12, %14, %3 : vector<32x176xi1>, vector<32x176xbf16>
    %c31_i32_1 = arith.constant 31 : i32
    %16 = vector.broadcast %c31_i32_1 : i32 to vector<32x1xi32>
    %17 = arith.cmpi eq, %8, %16 : vector<32x1xi32>
    %18 = vector.shape_cast %17 : vector<32x1xi1> to vector<32x1xi1>
    %19 = vector.broadcast %18 : vector<32x1xi1> to vector<32x176xi1>
    %20 = vector.shape_cast %1 : vector<1x176xbf16> to vector<1x176xbf16>
    %21 = vector.broadcast %20 : vector<1x176xbf16> to vector<32x176xbf16>
    %22 = arith.select %19, %21, %5 : vector<32x176xi1>, vector<32x176xbf16>
    %c0_2 = arith.constant 0 : index
    %c0_3 = arith.constant 0 : index
    %23 = vector.load %arg3[%c0_2, %c0_3] : memref<176x42xbf16, #tpu.memory_space<vmem>>, vector<176x42xbf16>
    %cst_4 = arith.constant dense<0.000000e+00> : vector<32x42xf32>
    %24 = tpu.matmul %0, %23, %cst_4 {dimension_numbers = #tpu.dot_dimension_numbers<[1], [0], [0], [1], [0, 0, 1, 1], [], []>} : vector<32x176xbf16>, vector<176x42xbf16>, vector<32x42xf32> -> vector<32x42xf32>
    %c0_5 = arith.constant 0 : index
    %c0_6 = arith.constant 0 : index
    %25 = vector.load %arg2[%c0_5, %c0_6] : memref<176x42xbf16, #tpu.memory_space<vmem>>, vector<176x42xbf16>
    %cst_7 = arith.constant dense<0.000000e+00> : vector<32x42xf32>
    %26 = tpu.matmul %15, %25, %cst_7 {dimension_numbers = #tpu.dot_dimension_numbers<[1], [0], [0], [1], [0, 0, 1, 1], [], []>} : vector<32x176xbf16>, vector<176x42xbf16>, vector<32x42xf32> -> vector<32x42xf32>
    %27 = arith.addf %24, %26 : vector<32x42xf32>
    %c0_8 = arith.constant 0 : index
    %c0_9 = arith.constant 0 : index
    %28 = vector.load %arg4[%c0_8, %c0_9] : memref<176x42xbf16, #tpu.memory_space<vmem>>, vector<176x42xbf16>
    %cst_10 = arith.constant dense<0.000000e+00> : vector<32x42xf32>
    %29 = tpu.matmul %22, %28, %cst_10 {dimension_numbers = #tpu.dot_dimension_numbers<[1], [0], [0], [1], [0, 0, 1, 1], [], []>} : vector<32x176xbf16>, vector<176x42xbf16>, vector<32x42xf32> -> vector<32x42xf32>
    %30 = arith.addf %27, %29 : vector<32x42xf32>
    %c0_11 = arith.constant 0 : index
    %c0_12 = arith.constant 0 : index
    %31 = vector.load %arg5[%c0_11, %c0_12] : memref<1x42xf32, #tpu.memory_space<vmem>>, vector<1x42xf32>
    %32 = vector.broadcast %31 : vector<1x42xf32> to vector<32x42xf32>
    %33 = arith.addf %30, %32 : vector<32x42xf32>
    %34 = math.tanh %33 : vector<32x42xf32>
    %c0_13 = arith.constant 0 : index
    %c0_14 = arith.constant 0 : index
    %35 = vector.load %arg6[%c0_13, %c0_14] : memref<32x42xf32, #tpu.memory_space<vmem>>, vector<32x42xf32>
    tpu.vector_store %arg6[%c0_13, %c0_14], %34 {strides = array<i32>} : memref<32x42xf32, #tpu.memory_space<vmem>>, vector<32x42xf32>,
    return
  }
  func.func @transform_0(%arg0: i32) -> (i32, i32) {
    %c0_i32 = arith.constant 0 : i32
    %c0_i32_0 = arith.constant 0 : i32
    return %arg0, %c0_i32 : i32, i32
  }
  func.func @transform_1(%arg0: i32) -> (i32, i32) {
    %c0_i32 = arith.constant 0 : i32
    %c0_i32_0 = arith.constant 0 : i32
    %c0_i32_1 = arith.constant 0 : i32
    return %c0_i32, %c0_i32_0 : i32, i32
  }
  func.func @transform_2(%arg0: i32) -> (i32, i32) {
    %c0_i32 = arith.constant 0 : i32
    %c0_i32_0 = arith.constant 0 : i32
    %c0_i32_1 = arith.constant 0 : i32
    return %c0_i32, %c0_i32_0 : i32, i32
  }
  func.func @transform_3(%arg0: i32) -> (i32, i32) {
    %c0_i32 = arith.constant 0 : i32
    %c0_i32_0 = arith.constant 0 : i32
    %c0_i32_1 = arith.constant 0 : i32
    return %c0_i32, %c0_i32_0 : i32, i32
  }
  func.func @transform_4(%arg0: i32) -> (i32, i32) {
    %c0_i32 = arith.constant 0 : i32
    %c0_i32_0 = arith.constant 0 : i32
    %c0_i32_1 = arith.constant 0 : i32
    return %c0_i32, %c0_i32_0 : i32, i32
  }
  func.func @transform_5(%arg0: i32) -> (i32, i32) {
    %c0_i32 = arith.constant 0 : i32
    %c0_i32_0 = arith.constant 0 : i32
    return %arg0, %c0_i32 : i32, i32
  }
}

</mosaic_0001>

<bundles_post_ra>
// kernel: forward.5
= control target key start
LH: loop header
LB: loop body
LE: loop exit
PB: predicated region body
PF: predicated region fallthrough
CT: control target
= control target key end

     0   :  { %s2080_s18 = smov 0   ;;  %s2631_s0 = inlined_call_operand.vmem [shape: bf16[16,256], index: 0, kind: input, shape index: {}]   ;;  %s2632_s1 = inlined_call_operand.vmem [shape: bf16[256,384], index: 1, kind: input, shape index: {}]   ;;  %s2633_s2 = inlined_call_operand.vmem [shape: bf16[256,384], index: 2, kind: input, shape index: {}]   ;;  %s2634_s3 = inlined_call_operand.vmem [shape: bf16[256,384], index: 3, kind: input, shape index: {}]   ;;  %s2635_s4 = inlined_call_operand.vmem [shape: f32[1,384], index: 4, kind: input, shape index: {}]   ;;  %s2636_s5 = inlined_call_operand.vmem [shape: bf16[16,384], index: 5, kind: output, shape index: {}]  }
   0x1 LB: > { %s1590_s19 = sadd.s32 4294967295, %s2047_s18   ;;  %p1594_p0 = scmp.ge.s32.totalorder %s2047_s18, 1  ;;  %s2047_s18 = sphi %s2080_s18, %s15_s18  }
   0x2   : > { %p187_p1 = scmp.lt.s32.totalorder %s2047_s18, 3 }
   0x4   : > { %p188_p2 = pnand %p1594_p0, %p187_p1 }
   0x5   : > { %v1847_v0 = vld [vmem:[%s2632_s1 + $0x4] ss:$12 sps:$4 sm:$0xff] (!%p188_p2)   ;;  %v1849_v1 = vld [vmem:[%s2632_s1 + $0xc8] ss:$12 sps:$4 sm:$0xff] (!%p188_p2)   ;;  %v1850_v2 = vld [vmem:[%s2632_s1] ss:$12 sps:$4 sm:$0xff] (!%p188_p2)   ;;  %v266_v15 = vlaneseq (!%p188_p2) }
   0x6   : > { %191 = sbr.rel (%p188_p2) target bundleno = 388 (0x184), region = 40  ;;  %673 = vmatprep.subr.bf16.mxu0 (!%p188_p2), %v1847_v0  ;;  %1771 = vmatprep.subr.bf16.mxu1 (!%p188_p2), %v1849_v1  ;;  %v1851_v3 = vld [vmem:[%s2632_s1 + $0x8] ss:$12 sps:$4 sm:$0xff] (!%p188_p2)   ;;  %v1854_v5 = vld [vmem:[%s2632_s1 + $0xe0] ss:$12 sps:$4 sm:$0xff] (!%p188_p2)   ;;  %p2117_p3 = scmp.lt.s32.totalorder (!%p188_p2), %s1590_s19, 1 }
   0x7   : > { %674 = vmatpush1.bf16.msra.mxu0 (!%p188_p2), %v1850_v2  ;;  %v1852_v4 = vld [vmem:[%s2632_s1 + $0x1c] ss:$12 sps:$4 sm:$0xff] (!%p188_p2)   ;;  %1772 = vmatpush3.bf16.msra.mxu1 (!%p188_p2), %v1851_v3  ;;  %v1855_v6 = vld [vmem:[%s2632_s1 + $0x18] ss:$12 sps:$4 sm:$0xff] (!%p188_p2)   ;;  %v1856_v7 = vld [vmem:[%s2632_s1 + $0x20] ss:$12 sps:$4 sm:$0xff] (!%p188_p2)  }
   0x8   : > { %675 = vmatprep.subr.bf16.mxu0 (!%p188_p2), %v1852_v4  ;;  %1773 = vmatprep.subr.bf16.mxu1 (!%p188_p2), %v1854_v5  ;;  %v1857_v8 = vld [vmem:[%s2632_s1 + $0x34] ss:$12 sps:$4 sm:$0xff] (!%p188_p2)   ;;  %v1859_v9 = vld [vmem:[%s2632_s1 + $0xf8] ss:$12 sps:$4 sm:$0xff] (!%p188_p2)   ;;  %v1860_v10 = vld [vmem:[%s2632_s1 + $0x30] ss:$12 sps:$4 sm:$0xff] (!%p188_p2)  }
   0x9   : > { %v1861_v11 = vld [vmem:[%s2632_s1 + $0x38] ss:$12 sps:$4 sm:$0xff] (!%p188_p2)   ;;  %v1864_v13 = vld [vmem:[%s2632_s1 + $0x110] ss:$12 sps:$4 sm:$0xff] (!%p188_p2)   ;;  %v1865_v14 = vld [vmem:[%s2632_s1 + $0x48] ss:$12 sps:$4 sm:$0xff] (!%p188_p2)  }
   0xa   : > { %v1862_v12 = vld [vmem:[%s2632_s1 + $0x4c] ss:$12 sps:$4 sm:$0xff] (!%p188_p2)   ;;  %v1866_v16 = vld [vmem:[%s2632_s1 + $0x50] ss:$12 sps:$4 sm:$0xff] (!%p188_p2)   ;;  %v1869_v18 = vld [vmem:[%s2632_s1 + $0x128] ss:$12 sps:$4 sm:$0xff] (!%p188_p2)  }
   0xb   : > { %676 = vmatpush1.bf16.msra.mxu0 (!%p188_p2), %v1855_v6  ;;  %1774 = vmatpush3.bf16.msra.mxu1 (!%p188_p2), %v1856_v7  ;;  %v1867_v17 = vld [vmem:[%s2632_s1 + $0x64] ss:$12 sps:$4 sm:$0xff] (!%p188_p2)   ;;  %v1870_v19 = vld [vmem:[%s2632_s1 + $0x60] ss:$12 sps:$4 sm:$0xff] (!%p188_p2)   ;;  %v1871_v20 = vld [vmem:[%s2632_s1 + $0x68] ss:$12 sps:$4 sm:$0xff] (!%p188_p2)  }
   0xc   : > { %677 = vmatprep.subr.bf16.mxu0 (!%p188_p2), %v1857_v8  ;;  %1775 = vmatprep.subr.bf16.mxu1 (!%p188_p2), %v1859_v9  ;;  %v2160_v21 = vshrl.u32 (!%p188_p2), %v266_v15, 7  ;;  %v1872_v22 = vld [vmem:[%s2632_s1 + $0x7c] ss:$12 sps:$4 sm:$0xff] (!%p188_p2)   ;;  %v1874_v23 = vld [vmem:[%s2632_s1 + $0x140] ss:$12 sps:$4 sm:$0xff] (!%p188_p2)   ;;  %vm250_vm2 = vcmask (!%p188_p2), 1040384  }
   0xd   : > { %s2649_s19 = smov (!%p2117_p3, %s1590_s19), 1  ;;  %v1875_v24 = vld [vmem:[%s2632_s1 + $0x78] ss:$12 sps:$4 sm:$0xff]   ;;  %v1876_v25 = vld [vmem:[%s2632_s1 + $0x80] ss:$12 sps:$4 sm:$0xff]   ;;  %v2049_v46 = vmov 0  }
   0xe   : > { %s1766_s23 = sshll.u32 %s2649_s19, 3  ;;  %v268_v26 = vand.u32 7, %v2160_v21  ;;  %v1877_v27 = vld [vmem:[%s2632_s1 + $0x94] ss:$12 sps:$4 sm:$0xff]   ;;  %v1879_v28 = vld [vmem:[%s2632_s1 + $0x158] ss:$12 sps:$4 sm:$0xff]  }
   0xf   : > { %678 = vmatpush1.bf16.msra.mxu0 %v1860_v10  ;;  %1776 = vmatpush3.bf16.msra.mxu1 %v1861_v11  ;;  %v1880_v29 = vld [vmem:[%s2632_s1 + $0x90] ss:$12 sps:$4 sm:$0xff]   ;;  %s219_s7 = scalar_lea.vmem %s2631_s0, %s1766_s23  ;;  %v1881_v30 = vld [vmem:[%s2632_s1 + $0x98] ss:$12 sps:$4 sm:$0xff]   ;;  %vm251_vm1 = vsmask.f32 256 }
  0x10   : > { %679 = vmatprep.subr.bf16.mxu0 %v1862_v12  ;;  %1777 = vmatprep.subr.bf16.mxu1 %v1864_v13  ;;  %v1882_v31 = vld [vmem:[%s2632_s1 + $0xac] ss:$12 sps:$4 sm:$0xff]   ;;  %v1884_v32 = vld [vmem:[%s2632_s1 + $0x170] ss:$12 sps:$4 sm:$0xff]   ;;  %vm2197_vm0 = vcmp.eq.s32.totalorder %v268_v26, 0  ;;  %v228_v34 = vld [vmem:[%s219_s7] sm:$0xff] }
  0x11   : > { %v1885_v35 = vld [vmem:[%s2632_s1 + $0xa8] ss:$12 sps:$4 sm:$0xff]   ;;  %v2204_v36 = vcombine.low %v228_v34, %v228_v34  ;;  %v2206_v37 = vcombine.high %v228_v34, %v228_v34  ;;  %v1886_v38 = vld [vmem:[%s2632_s1 + $0xb0] ss:$12 sps:$4 sm:$0xff]   ;;  %vm272_vm3 = vmpackc.low %vm2197_vm0, %vm2197_vm0  ;;  %vm2217_vm4 = vcmp.eq.s32.totalorder %v268_v26, 7  ;;  %vm261_vm8 = vcmask 1043456  }
  0x12   : > { %v1887_v39 = vld [vmem:[%s2632_s1 + $0xc4] ss:$12 sps:$4 sm:$0xff]   ;;  %v273_v47 = vsel %vm272_vm3, 65537, %v2049_v46  ;;  %v1894_v48 = vld [vmem:[%s2632_s1 + $0xc0] ss:$12 sps:$4 sm:$0xff]   ;;  %vm282_vm5 = vmpackc.low %vm2217_vm4, %vm2217_vm4  ;;  %s1837_s14 = smul.u32 12, %s2649_s19 }
  0x13   : > { %680 = vmatpush1.bf16.msra.mxu0 %v1865_v14  ;;  %1778 = vmatpush3.bf16.msra.mxu1 %v1866_v16  ;;  %v235_v41 = vshrl.u32 %v2204_v36, 16  ;;  %v238_v42 = vshll.u32 %v2204_v36, 16  ;;  %v242_v43 = vshrl.u32 %v2206_v37, 16  ;;  %v245_v44 = vshll.u32 %v2206_v37, 16  ;;  %v1893_v45 = vld [vmem:[%s2633_s2 + $0x4] ss:$12 sps:$4 sm:$0xff]   ;;  %vm252_vm6 = vmand %vm250_vm2, %vm251_vm1 }
  0x14   : > { %681 = vmatprep.subr.bf16.mxu0 %v1867_v17  ;;  %1779 = vmatprep.subr.bf16.mxu1 %v1869_v18  ;;  %v1600_v52 = vcombine.low %v273_v47, %v273_v47  ;;  %v1895_v53 = vld [vmem:[%s2632_s1 + $0xdc] ss:$12 sps:$4 sm:$0xff]   ;;  %v1891_v58 = vld [vmem:[%s2633_s2] ss:$12 sps:$4 sm:$0xff]   ;;  %v2252_v59 = vsel %vm282_vm5, 65537, %v2049_v46  ;;  %s224_s17 = scalar_lea.vmem %s2636_s5, %s1837_s14 }
  0x15   : > { %v237_v49 = vrot.slane %v235_v41, 7  ;;  %v244_v50 = vrot.slane %v242_v43, 7  ;;  %v255_v51 = vrot.slane %v238_v42, 1  ;;  %v1899_v62 = vld [vmem:[%s2633_s2 + $0x1c] ss:$12 sps:$4 sm:$0xff]  }
  0x16   : > { %vm2245_vm7 = vcmp.eq.s16.totalorder %v1600_v52, 0  ;;  %v1900_v63 = vld [vmem:[%s2632_s1 + $0xd8] ss:$12 sps:$4 sm:$0xff]   ;;  %v1901_v0 = vld [vmem:[%s2632_s1 + $0xf4] ss:$12 sps:$4 sm:$0xff]  }
  0x17   : > { %682 = vmatpush1.bf16.msra.mxu0 %v1870_v19  ;;  %1780 = vmatpush3.bf16.msra.mxu1 %v1871_v20  ;;  %v240_v54 = vor.u32 %v238_v42, %v237_v49  ;;  %v247_v55 = vor.u32 %v245_v44, %v244_v50  ;;  %v2243_v56 = vor.u32 %v255_v51, %v235_v41  ;;  %v1897_v1 = vld [vmem:[%s2633_s2 + $0x18] ss:$12 sps:$4 sm:$0xff]   ;;  %v1905_v2 = vld [vmem:[%s2633_s2 + $0x34] ss:$12 sps:$4 sm:$0xff]   ;;  %v1906_v3 = vld [vmem:[%s2632_s1 + $0xf0] ss:$12 sps:$4 sm:$0xff]  }
  0x18   : > { %683 = vmatprep.subr.bf16.mxu0 %v1872_v22  ;;  %1781 = vmatprep.subr.bf16.mxu1 %v1874_v23  ;;  %v1907_v4 = vld [vmem:[%s2632_s1 + $0x10c] ss:$12 sps:$4 sm:$0xff]   ;;  %v1903_v5 = vld [vmem:[%s2633_s2 + $0x30] ss:$12 sps:$4 sm:$0xff]   ;;  %v1912_v7 = vld [vmem:[%s2632_s1 + $0x108] ss:$12 sps:$4 sm:$0xff]  }
  0x19   : > { %v2254_v60 = vsel %vm252_vm6, 0, %v240_v54  ;;  %v254_v61 = vsel %vm252_vm6, 0, %v247_v55  ;;  %v1911_v6 = vld [vmem:[%s2633_s2 + $0x4c] ss:$12 sps:$4 sm:$0xff]   ;;  %v1913_v8 = vld [vmem:[%s2632_s1 + $0x124] ss:$12 sps:$4 sm:$0xff]  }
  0x1a   : > { %1655 = vmatprep.mubr.msk.bf16.mxu1 %vm2245_vm7, %v254_v61  ;;  %1651 = vmatprep.mubr.msk.bf16.mxu0 %vm2245_vm7, %v254_v61  ;;  %v1909_v9 = vld [vmem:[%s2633_s2 + $0x48] ss:$12 sps:$4 sm:$0xff]   ;;  %v1917_v10 = vld [vmem:[%s2633_s2 + $0x64] ss:$12 sps:$4 sm:$0xff]   ;;  %v1918_v11 = vld [vmem:[%s2632_s1 + $0x120] ss:$12 sps:$4 sm:$0xff]  }
  0x1b   : > { %684 = vmatpush1.bf16.msra.mxu0 %v1875_v24  ;;  %1782 = vmatpush3.bf16.msra.mxu1 %v1876_v25  ;;  %v1919_v12 = vld [vmem:[%s2632_s1 + $0x13c] ss:$12 sps:$4 sm:$0xff]   ;;  %v1915_v13 = vld [vmem:[%s2633_s2 + $0x60] ss:$12 sps:$4 sm:$0xff]   ;;  %v1924_v15 = vld [vmem:[%s2632_s1 + $0x138] ss:$12 sps:$4 sm:$0xff]  }
  0x1c   : > { %685 = vmatprep.subr.bf16.mxu0 %v1877_v27  ;;  %1783 = vmatprep.subr.bf16.mxu1 %v1879_v28  ;;  %v1923_v14 = vld [vmem:[%s2633_s2 + $0x7c] ss:$12 sps:$4 sm:$0xff]   ;;  %v1925_v16 = vld [vmem:[%s2632_s1 + $0x154] ss:$12 sps:$4 sm:$0xff]   ;;  %v1921_v17 = vld [vmem:[%s2633_s2 + $0x78] ss:$12 sps:$4 sm:$0xff]  }
  0x1d   : > { %v1929_v18 = vld [vmem:[%s2633_s2 + $0x94] ss:$12 sps:$4 sm:$0xff]   ;;  %v1930_v19 = vld [vmem:[%s2632_s1 + $0x150] ss:$12 sps:$4 sm:$0xff]   ;;  %v1931_v20 = vld [vmem:[%s2632_s1 + $0x16c] ss:$12 sps:$4 sm:$0xff]  }
  0x1e   : > { %v1927_v22 = vld [vmem:[%s2633_s2 + $0x90] ss:$12 sps:$4 sm:$0xff]   ;;  %v1935_v23 = vld [vmem:[%s2633_s2 + $0xac] ss:$12 sps:$4 sm:$0xff]   ;;  %v1936_v24 = vld [vmem:[%s2632_s1 + $0x168] ss:$12 sps:$4 sm:$0xff]  }
  0x1f   : > { %686 = vmatpush1.bf16.msra.mxu0 %v1880_v29  ;;  %1784 = vmatpush3.bf16.msra.mxu1 %v1881_v30  ;;  %v1940_v25 = vld [vmem:[%s2633_s2 + $0xc8] ss:$12 sps:$4 sm:$0xff]   ;;  %v1939_v27 = vld [vmem:[%s2633_s2 + $0xc4] ss:$12 sps:$4 sm:$0xff]   ;;  %v1945_v29 = vld [vmem:[%s2633_s2 + $0xe0] ss:$12 sps:$4 sm:$0xff]  }
  0x20   : > { %687 = vmatprep.subr.bf16.mxu0 %v1882_v31  ;;  %1785 = vmatprep.subr.bf16.mxu1 %v1884_v32  ;;  %v1933_v26 = vld [vmem:[%s2633_s2 + $0xa8] ss:$12 sps:$4 sm:$0xff]   ;;  %v1937_v30 = vld [vmem:[%s2633_s2 + $0xc0] ss:$12 sps:$4 sm:$0xff]   ;;  %v1950_v33 = vld [vmem:[%s2633_s2 + $0xf8] ss:$12 sps:$4 sm:$0xff]  }
  0x21   : > { %v1941_v28 = vld [vmem:[%s2633_s2 + $0x8] ss:$12 sps:$4 sm:$0xff]   ;;  %v1946_v32 = vld [vmem:[%s2633_s2 + $0x20] ss:$12 sps:$4 sm:$0xff]   ;;  %v1942_v34 = vld [vmem:[%s2633_s2 + $0xd8] ss:$12 sps:$4 sm:$0xff]  }
  0x22   : > { %v1944_v31 = vld [vmem:[%s2633_s2 + $0xdc] ss:$12 sps:$4 sm:$0xff]   ;;  %v1954_v41 = vld [vmem:[%s2633_s2 + $0x10c] ss:$12 sps:$4 sm:$0xff]   ;;  %v1959_v47 = vld [vmem:[%s2633_s2 + $0x124] ss:$12 sps:$4 sm:$0xff]  }
  0x23   : > { %688 = vmatpush1.bf16.msra.mxu0 %v1885_v35  ;;  %1786 = vmatpush3.bf16.msra.mxu1 %v1886_v38  ;;  %v1949_v35 = vld [vmem:[%s2633_s2 + $0xf4] ss:$12 sps:$4 sm:$0xff]   ;;  %v1951_v38 = vld [vmem:[%s2633_s2 + $0x38] ss:$12 sps:$4 sm:$0xff]   ;;  %v1947_v40 = vld [vmem:[%s2633_s2 + $0xf0] ss:$12 sps:$4 sm:$0xff]  }
  0x24   : > { %689 = vmatprep.subr.bf16.mxu0 %v1887_v39  ;;  %1012 = vmatprep.subr.bf16.mxu1 %v1893_v45  ;;  %v1955_v39 = vld [vmem:[%s2633_s2 + $0x110] ss:$12 sps:$4 sm:$0xff]   ;;  %v1960_v45 = vld [vmem:[%s2633_s2 + $0x128] ss:$12 sps:$4 sm:$0xff]   ;;  %v1965_v49 = vld [vmem:[%s2633_s2 + $0x140] ss:$12 sps:$4 sm:$0xff]  }
  0x25   : > { %v1956_v42 = vld [vmem:[%s2633_s2 + $0x50] ss:$12 sps:$4 sm:$0xff]   ;;  %v1952_v46 = vld [vmem:[%s2633_s2 + $0x108] ss:$12 sps:$4 sm:$0xff]   ;;  %v1957_v50 = vld [vmem:[%s2633_s2 + $0x120] ss:$12 sps:$4 sm:$0xff]  }
  0x26   : > { %1657 = vmatmul.mubr.msk.bf16.vlgmr.msra.gmra.mrb[0].mxu1 %vm2245_vm7, %v2254_v60  ;;  %v1964_v51 = vld [vmem:[%s2633_s2 + $0x13c] ss:$12 sps:$4 sm:$0xff]   ;;  %v1966_v52 = vld [vmem:[%s2633_s2 + $0x80] ss:$12 sps:$4 sm:$0xff]   ;;  %v1962_v54 = vld [vmem:[%s2633_s2 + $0x138] ss:$12 sps:$4 sm:$0xff]  }
  0x27   : > { %690 = vmatpush1.bf16.msra.mxu0 %v1894_v48  ;;  %1013 = vmatpush1.bf16.msra.mxu1 %v1891_v58  ;;  %v1961_v48 = vld [vmem:[%s2633_s2 + $0x68] ss:$12 sps:$4 sm:$0xff]   ;;  %v1971_v57 = vld [vmem:[%s2633_s2 + $0x98] ss:$12 sps:$4 sm:$0xff]   ;;  %v1975_v58 = vld [vmem:[%s2633_s2 + $0x170] ss:$12 sps:$4 sm:$0xff]  }
  0x28   : > { %691 = vmatprep.subr.bf16.mxu0 %v1895_v53  ;;  %1044 = vmatprep.mubr.bf16.mxu1 %v2206_v37  ;;  %v1970_v53 = vld [vmem:[%s2633_s2 + $0x158] ss:$12 sps:$4 sm:$0xff]   ;;  %v1969_v55 = vld [vmem:[%s2633_s2 + $0x154] ss:$12 sps:$4 sm:$0xff]   ;;  %vm262_vm9 = vsmask.f32 3328 }
  0x29   : > { %1014 = vmatprep.subr.bf16.mxu1 %v1899_v62  ;;  %v1967_v61 = vld [vmem:[%s2633_s2 + $0x150] ss:$12 sps:$4 sm:$0xff]   ;;  %v1974_v62 = vld [vmem:[%s2633_s2 + $0x16c] ss:$12 sps:$4 sm:$0xff]   ;;  %vm2450_vm10 = vmand %vm261_vm8, %vm262_vm9 }
  0x2b   : > { %692 = vmatpush1.bf16.msra.mxu0 %v1900_v63  ;;  %1015 = vmatpush1.bf16.msra.mxu1 %v1897_v1  ;;  %v1976_v63 = vld [vmem:[%s2633_s2 + $0xb0] ss:$12 sps:$4 sm:$0xff]  }
  0x2c   : > { %693 = vmatprep.subr.bf16.mxu0 %v1901_v0  ;;  %1016 = vmatprep.subr.bf16.mxu1 %v1905_v2  ;;  %v1972_v0 = vld [vmem:[%s2633_s2 + $0x168] ss:$12 sps:$4 sm:$0xff]   ;;  %v1977_v2 = vld [vmem:[%s2634_s3] ss:$12 sps:$4 sm:$0xff]  }
  0x2f   : > { %694 = vmatpush1.bf16.msra.mxu0 %v1906_v3  ;;  %1017 = vmatpush1.bf16.msra.mxu1 %v1903_v5  ;;  %v1980_v3 = vld [vmem:[%s2634_s3 + $0xc8] ss:$12 sps:$4 sm:$0xff]   ;;  %v1601_v5 = vcombine.low %v2252_v59, %v2252_v59 }
  0x30   : > { %695 = vmatprep.subr.bf16.mxu0 %v1907_v4  ;;  %1018 = vmatprep.subr.bf16.mxu1 %v1911_v6  ;;  %v1984_v6 = vld [vmem:[%s2634_s3 + $0x1c] ss:$12 sps:$4 sm:$0xff]  }
  0x31   : > { %vm2479_vm11 = vcmp.eq.s16.totalorder %v1601_v5, 0 }
  0x33   : > { %696 = vmatpush1.bf16.msra.mxu0 %v1912_v7  ;;  %1019 = vmatpush1.bf16.msra.mxu1 %v1909_v9  ;;  %v1981_v7 = vld [vmem:[%s2634_s3 + $0x8] ss:$12 sps:$4 sm:$0xff]  }
  0x34   : > { %697 = vmatprep.subr.bf16.mxu0 %v1913_v8  ;;  %1020 = vmatprep.subr.bf16.mxu1 %v1917_v10  ;;  %v1989_v9 = vld [vmem:[%s2634_s3 + $0x34] ss:$12 sps:$4 sm:$0xff]  }
  0x35   : > { %v1986_v10 = vld [vmem:[%s2634_s3 + $0x20] ss:$12 sps:$4 sm:$0xff]  }
  0x37   : > { %698 = vmatpush1.bf16.msra.mxu0 %v1918_v11  ;;  %1021 = vmatpush1.bf16.msra.mxu1 %v1915_v13  ;;  %v1987_v11 = vld [vmem:[%s2634_s3 + $0x30] ss:$12 sps:$4 sm:$0xff]   ;;  %v1991_v13 = vld [vmem:[%s2634_s3 + $0x38] ss:$12 sps:$4 sm:$0xff]  }
  0x38   : > { %699 = vmatprep.subr.bf16.mxu0 %v1919_v12  ;;  %1022 = vmatprep.subr.bf16.mxu1 %v1923_v14  ;;  %v1990_v12 = vld [vmem:[%s2634_s3 + $0xf8] ss:$12 sps:$4 sm:$0xff]   ;;  %v1992_v14 = vld [vmem:[%s2634_s3 + $0x48] ss:$12 sps:$4 sm:$0xff]  }
  0x3b   : > { %700 = vmatpush1.bf16.msra.mxu0 %v1924_v15  ;;  %1023 = vmatpush1.bf16.msra.mxu1 %v1921_v17  ;;  %v1995_v15 = vld [vmem:[%s2634_s3 + $0x110] ss:$12 sps:$4 sm:$0xff]  }
  0x3c   : > { %701 = vmatprep.subr.bf16.mxu0 %v1925_v16  ;;  %1024 = vmatprep.subr.bf16.mxu1 %v1929_v18  ;;  %v1999_v16 = vld [vmem:[%s2634_s3 + $0x64] ss:$12 sps:$4 sm:$0xff]   ;;  %v1997_v18 = vld [vmem:[%s2634_s3 + $0x60] ss:$12 sps:$4 sm:$0xff]  }
  0x3d   : > { %v1996_v17 = vld [vmem:[%s2634_s3 + $0x50] ss:$12 sps:$4 sm:$0xff]  }
  0x3f   : > { %702 = vmatpush1.bf16.msra.mxu0 %v1930_v19  ;;  %1025 = vmatpush1.bf16.msra.mxu1 %v1927_v22  ;;  %v2000_v19 = vld [vmem:[%s2634_s3 + $0x128] ss:$12 sps:$4 sm:$0xff]  }
  0x40   : > { %703 = vmatprep.subr.bf16.mxu0 %v1931_v20  ;;  %1026 = vmatprep.subr.bf16.mxu1 %v1935_v23  ;;  %v2004_v20 = vld [vmem:[%s2634_s3 + $0x7c] ss:$12 sps:$4 sm:$0xff]   ;;  %v2002_v23 = vld [vmem:[%s2634_s3 + $0x78] ss:$12 sps:$4 sm:$0xff]  }
  0x41   : > { %v2001_v22 = vld [vmem:[%s2634_s3 + $0x68] ss:$12 sps:$4 sm:$0xff]  }
  0x43   : > { %704 = vmatpush1.bf16.msra.mxu0 %v1936_v24  ;;  %1027 = vmatpush1.bf16.msra.mxu1 %v1933_v26  ;;  %v2005_v24 = vld [vmem:[%s2634_s3 + $0x140] ss:$12 sps:$4 sm:$0xff]  }
  0x44   : > { %1793 = vmatprep.subr.bf16.mxu0 %v1940_v25  ;;  %1028 = vmatprep.subr.bf16.mxu1 %v1939_v27  ;;  %v2009_v25 = vld [vmem:[%s2634_s3 + $0x94] ss:$12 sps:$4 sm:$0xff]   ;;  %v2007_v27 = vld [vmem:[%s2634_s3 + $0x90] ss:$12 sps:$4 sm:$0xff]  }
  0x45   : > { %v2006_v26 = vld [vmem:[%s2634_s3 + $0x80] ss:$12 sps:$4 sm:$0xff]  }
  0x46   : > { %1653 = vmatmul.mubr.msk.bf16.vlgmr.msra.gmra.mrb[0].mxu0 %vm2245_vm7, %v2254_v60  ;;  %v257_v60 = vrot.slane %v245_v44, 1  ;;  %v1979_v44 = vld [vmem:[%s2634_s3 + $0x4] ss:$12 sps:$4 sm:$0xff]  }
  0x47   : > { %1794 = vmatpush3.bf16.msra.mxu0 %v1941_v28  ;;  %1085 = vmatprep.mubr.bf16.mxu0 %v2206_v37  ;;  %v1982_v37 = vld [vmem:[%s2634_s3 + $0x18] ss:$12 sps:$4 sm:$0xff]  }
  0x48   : > { %1795 = vmatprep.subr.bf16.mxu0 %v1945_v29  ;;  %1029 = vmatpush1.bf16.msra.mxu1 %v1937_v30  ;;  %v258_v4 = vor.u32 %v257_v60, %v242_v43  ;;  %v1985_v43 = vld [vmem:[%s2634_s3 + $0xe0] ss:$12 sps:$4 sm:$0xff]   ;;  %v2010_v28 = vld [vmem:[%s2634_s3 + $0x158] ss:$12 sps:$4 sm:$0xff]  }
  0x49   : > { %1030 = vmatprep.subr.bf16.mxu1 %v1944_v31  ;;  %v2014_v29 = vld [vmem:[%s2634_s3 + $0xac] ss:$12 sps:$4 sm:$0xff]   ;;  %v2012_v31 = vld [vmem:[%s2634_s3 + $0xa8] ss:$12 sps:$4 sm:$0xff]  }
  0x4a   : > { %v265_v59 = vsel %vm2450_vm10, %v258_v4, 0  ;;  %v2011_v30 = vld [vmem:[%s2634_s3 + $0x98] ss:$12 sps:$4 sm:$0xff]  }
  0x4b   : > { %1796 = vmatpush3.bf16.msra.mxu0 %v1946_v32  ;;  %v2015_v32 = vld [vmem:[%s2634_s3 + $0x170] ss:$12 sps:$4 sm:$0xff]  }
  0x4c   : > { %1797 = vmatprep.subr.bf16.mxu0 %v1950_v33  ;;  %1031 = vmatpush1.bf16.msra.mxu1 %v1942_v34  ;;  %v2019_v33 = vld [vmem:[%s2634_s3 + $0xc4] ss:$12 sps:$4 sm:$0xff]  }
  0x4d   : > { %1032 = vmatprep.subr.bf16.mxu1 %v1949_v35  ;;  %v2016_v34 = vld [vmem:[%s2634_s3 + $0xb0] ss:$12 sps:$4 sm:$0xff]   ;;  %v2017_v35 = vld [vmem:[%s2634_s3 + $0xc0] ss:$12 sps:$4 sm:$0xff]  }
  0x4f   : > { %1798 = vmatpush3.bf16.msra.mxu0 %v1951_v38  ;;  %v2022_v38 = vld [vmem:[%s2634_s3 + $0xdc] ss:$12 sps:$4 sm:$0xff]  }
  0x50   : > { %1799 = vmatprep.subr.bf16.mxu0 %v1955_v39  ;;  %1033 = vmatpush1.bf16.msra.mxu1 %v1947_v40  ;;  %v264_v39 = vsel %vm2450_vm10, %v2243_v56, 0  ;;  %v2020_v40 = vld [vmem:[%s2634_s3 + $0xd8] ss:$12 sps:$4 sm:$0xff]  }
  0x51   : > { %1034 = vmatprep.subr.bf16.mxu1 %v1954_v41  ;;  %v2025_v41 = vld [vmem:[%s2634_s3 + $0xf4] ss:$12 sps:$4 sm:$0xff]   ;;  %v2028_v56 = vld [vmem:[%s2634_s3 + $0x10c] ss:$12 sps:$4 sm:$0xff]  }
  0x53   : > { %1800 = vmatpush3.bf16.msra.mxu0 %v1956_v42  ;;  %v2023_v42 = vld [vmem:[%s2634_s3 + $0xf0] ss:$12 sps:$4 sm:$0xff]  }
  0x54   : > { %1801 = vmatprep.subr.bf16.mxu0 %v1960_v45  ;;  %1035 = vmatpush1.bf16.msra.mxu1 %v1952_v46  ;;  %v2026_v45 = vld [vmem:[%s2634_s3 + $0x108] ss:$12 sps:$4 sm:$0xff]   ;;  %v2031_v46 = vld [vmem:[%s2634_s3 + $0x124] ss:$12 sps:$4 sm:$0xff]  }
  0x55   : > { %1036 = vmatprep.subr.bf16.mxu1 %v1959_v47  ;;  %v2029_v47 = vld [vmem:[%s2634_s3 + $0x120] ss:$12 sps:$4 sm:$0xff]  }
  0x57   : > { %1802 = vmatpush3.bf16.msra.mxu0 %v1961_v48  ;;  %v2034_v48 = vld [vmem:[%s2634_s3 + $0x13c] ss:$12 sps:$4 sm:$0xff]  }
  0x58   : > { %1803 = vmatprep.subr.bf16.mxu0 %v1965_v49  ;;  %1037 = vmatpush1.bf16.msra.mxu1 %v1957_v50  ;;  %v2032_v49 = vld [vmem:[%s2634_s3 + $0x138] ss:$12 sps:$4 sm:$0xff]   ;;  %v2037_v50 = vld [vmem:[%s2634_s3 + $0x154] ss:$12 sps:$4 sm:$0xff]  }
  0x59   : > { %1038 = vmatprep.subr.bf16.mxu1 %v1964_v51  ;;  %v2035_v51 = vld [vmem:[%s2634_s3 + $0x150] ss:$12 sps:$4 sm:$0xff]  }
  0x5b   : > { %1804 = vmatpush3.bf16.msra.mxu0 %v1966_v52  ;;  %v2040_v52 = vld [vmem:[%s2634_s3 + $0x16c] ss:$12 sps:$4 sm:$0xff]  }
  0x5c   : > { %1805 = vmatprep.subr.bf16.mxu0 %v1970_v53  ;;  %1039 = vmatpush1.bf16.msra.mxu1 %v1962_v54  ;;  %v2038_v53 = vld [vmem:[%s2634_s3 + $0x168] ss:$12 sps:$4 sm:$0xff]  }
  0x5d   : > { %1040 = vmatprep.subr.bf16.mxu1 %v1969_v55 }
  0x5f   : > { %1806 = vmatpush3.bf16.msra.mxu0 %v1971_v57 }
  0x60   : > { %1807 = vmatprep.subr.bf16.mxu0 %v1975_v58  ;;  %1041 = vmatpush1.bf16.msra.mxu1 %v1967_v61 }
  0x61   : > { %1042 = vmatprep.subr.bf16.mxu1 %v1974_v62 }
  0x63   : > { %1808 = vmatpush3.bf16.msra.mxu0 %v1976_v63 }
  0x64   : > { %1413 = vmatprep.subr.bf16.mxu0 %v1979_v44  ;;  %1043 = vmatpush1.bf16.msra.mxu1 %v1972_v0 }
  0x65   : > { %1815 = vmatprep.subr.bf16.mxu1 %v1980_v3 }
  0x66   : > { %1086 = vmatmul.mubr.bf16.vlgmr.msra.gmra.mrb[4].mxu0 %v2204_v36 }
  0x67   : > { %1414 = vmatpush1.bf16.msra.mxu0 %v1977_v2  ;;  %1755 = vmatprep.mubr.msk.bf16.mxu0 %vm2479_vm11, %v265_v59 }
  0x68   : > { %1415 = vmatprep.subr.bf16.mxu0 %v1984_v6  ;;  %1045 = vmatmul.mubr.bf16.vlgmr.msra.gmra.mrb[4].mxu1 %v2204_v36  ;;  %v1994_v36 = vld [vmem:[%s2634_s3 + $0x4c] ss:$12 sps:$4 sm:$0xff]  }
  0x69   : > { %1816 = vmatpush3.bf16.msra.mxu1 %v1981_v7  ;;  %1759 = vmatprep.mubr.msk.bf16.mxu1 %vm2479_vm11, %v265_v59 }
  0x6a   : > { %1817 = vmatprep.subr.bf16.mxu1 %v1985_v43 }
  0x6b   : > { %1416 = vmatpush1.bf16.msra.mxu0 %v1982_v37 }
  0x6c   : > { %1417 = vmatprep.subr.bf16.mxu0 %v1989_v9  ;;  %v1509_v9 = vsub.s32 2, %v2160_v21 }
  0x6d   : > { %1818 = vmatpush3.bf16.msra.mxu1 %v1986_v10  ;;  %v1497_v10 = vld [vmem:[%s2635_s4] sm:$0x7] }
  0x6e   : > { %1819 = vmatprep.subr.bf16.mxu1 %v1990_v12 }
  0x6f   : > { %1418 = vmatpush1.bf16.msra.mxu0 %v1987_v11 }
  0x70   : > { %1419 = vmatprep.subr.bf16.mxu0 %v1994_v36 }
  0x71   : > { %1820 = vmatpush3.bf16.msra.mxu1 %v1991_v13  ;;  %v1510_v13 = vrot.slane %v1497_v10, %v1509_v9 }
  0x72   : > { %1821 = vmatprep.subr.bf16.mxu1 %v1995_v15 }
  0x73   : > { %1420 = vmatpush1.bf16.msra.mxu0 %v1992_v14 }
  0x74   : > { %1421 = vmatprep.subr.bf16.mxu0 %v1999_v16 }
  0x75   : > { %1822 = vmatpush3.bf16.msra.mxu1 %v1996_v17 }
  0x76   : > { %1823 = vmatprep.subr.bf16.mxu1 %v2000_v19 }
  0x77   : > { %1422 = vmatpush1.bf16.msra.mxu0 %v1997_v18 }
  0x78   : > { %1423 = vmatprep.subr.bf16.mxu0 %v2004_v20  ;;  %v1501_v20 = vsub.s32 0, %v2160_v21 }
  0x79   : > { %1824 = vmatpush3.bf16.msra.mxu1 %v2001_v22  ;;  %v1505_v22 = vsub.s32 1, %v2160_v21 }
  0x7a   : > { %1825 = vmatprep.subr.bf16.mxu1 %v2005_v24 }
  0x7b   : > { %1424 = vmatpush1.bf16.msra.mxu0 %v2002_v23  ;;  %v1502_v23 = vrot.slane %v1497_v10, %v1501_v20 }
  0x7c   : > { %1425 = vmatprep.subr.bf16.mxu0 %v2009_v25  ;;  %v1506_v25 = vrot.slane %v1497_v10, %v1505_v22 }
  0x7d   : > { %1826 = vmatpush3.bf16.msra.mxu1 %v2006_v26 }
  0x7e   : > { %1827 = vmatprep.subr.bf16.mxu1 %v2010_v28 }
  0x7f   : > { %1426 = vmatpush1.bf16.msra.mxu0 %v2007_v27 }
  0x80   : > { %1427 = vmatprep.subr.bf16.mxu0 %v2014_v29 }
  0x81   : > { %1828 = vmatpush3.bf16.msra.mxu1 %v2011_v30 }
  0x82   : > { %1829 = vmatprep.subr.bf16.mxu1 %v2015_v32 }
  0x83   : > { %1428 = vmatpush1.bf16.msra.mxu0 %v2012_v31 }
  0x84   : > { %1429 = vmatprep.subr.bf16.mxu0 %v2019_v33 }
  0x85   : > { %1830 = vmatpush3.bf16.msra.mxu1 %v2016_v34 }
  0x87   : > { %1430 = vmatpush1.bf16.msra.mxu0 %v2017_v35 }
  0x88   : > { %1431 = vmatprep.subr.bf16.mxu0 %v2022_v38  ;;  %1761 = vmatmul.mubr.msk.bf16.vlgmr.msra.gmra.mrb[8].mxu1 %vm2479_vm11, %v264_v39 }
  0x8b   : > { %1432 = vmatpush1.bf16.msra.mxu0 %v2020_v40 }
  0x8c   : > { %1433 = vmatprep.subr.bf16.mxu0 %v2025_v41 }
  0x8f   : > { %1434 = vmatpush1.bf16.msra.mxu0 %v2023_v42 }
  0x90   : > { %1435 = vmatprep.subr.bf16.mxu0 %v2028_v56 }
  0x93   : > { %1436 = vmatpush1.bf16.msra.mxu0 %v2026_v45 }
  0x94   : > { %1437 = vmatprep.subr.bf16.mxu0 %v2031_v46 }
  0x97   : > { %1438 = vmatpush1.bf16.msra.mxu0 %v2029_v47 }
  0x98   : > { %1439 = vmatprep.subr.bf16.mxu0 %v2034_v48 }
  0x9b   : > { %1440 = vmatpush1.bf16.msra.mxu0 %v2032_v49 }
  0x9c   : > { %1441 = vmatprep.subr.bf16.mxu0 %v2037_v50 }
  0x9f   : > { %1442 = vmatpush1.bf16.msra.mxu0 %v2035_v51 }
  0xa0   : > { %1443 = vmatprep.subr.bf16.mxu0 %v2040_v52 }
  0xa3   : > { %1444 = vmatpush1.bf16.msra.mxu0 %v2038_v53 }
  0xa6   : > { %1757 = vmatmul.mubr.msk.bf16.vlgmr.msra.gmra.mrb[8].mxu0 %vm2479_vm11, %v264_v39 }
  0xf9   : > { %v1787_v54 = vpop.f32.mrb[0].mxu1 }
  0xfa   : > { %v1788_v55 = vpop.f32.mrb[1].mxu1 }
  0xfb   : > { %v1789_v57 = vadd.f32 %v1788_v55, %v1787_v54  ;;  %v1790_v58 = vpop.f32.mrb[2].mxu1 }
  0xfc   : > { %v1791_v60 = vpop.f32.mrb[3].mxu1 }
 0x119   : > { %v707_v61 = vpop.f32.mrb[0].mxu0 }
 0x11a   : > { %v709_v62 = vpop.f32.mrb[1].mxu0 }
 0x11b   : > { %v711_v63 = vpop.f32.mrb[2].mxu0 }
 0x11c   : > { %v712_v44 = vpop.f32.mrb[3].mxu0 }
 0x139   : > { %v1809_v0 = vpop.f32.mrb[4].mxu0 }
 0x13a   : > { %v1810_v1 = vpop.f32.mrb[5].mxu0 }
 0x13b   : > { %v1811_v2 = vadd.f32 %v1810_v1, %v1809_v0  ;;  %v1812_v3 = vpop.f32.mrb[6].mxu0  ;;  %v1046_v4 = vpop.f32.mrb[4].mxu1 }
 0x13c   : > { %v1813_v5 = vpop.f32.mrb[7].mxu0  ;;  %v1047_v6 = vadd.f32 %v1046_v4, %v707_v61  ;;  %v1048_v7 = vpop.f32.mrb[5].mxu1 }
 0x13d   : > { %v1088_v37 = vadd.f32 %v1811_v2, %v1789_v57  ;;  %v1049_v43 = vadd.f32 %v1048_v7, %v709_v62  ;;  %v1050_v59 = vpop.f32.mrb[6].mxu1 }
 0x13e   : > { %v1051_v8 = vpop.f32.mrb[7].mxu1 }
 0x15b   : > { %v1831_v11 = vpop.f32.mrb[8].mxu1 }
 0x15c   : > { %v1832_v12 = vpop.f32.mrb[9].mxu1 }
 0x15d   : > { %v1833_v36 = vadd.f32 %v1832_v12, %v1831_v11  ;;  %v1834_v14 = vpop.f32.mrb[10].mxu1 }
 0x15e   : > { %v1835_v15 = vpop.f32.mrb[11].mxu1 }
 0x15f   : > { %v1496_v16 = vadd.f32 %v1833_v36, %v1088_v37 }
 0x161   : > { %v1516_v17 = vadd.f32 %v1510_v13, %v1496_v16 }
 0x163   : > { %v1519_v18 = vmax.f32 %v1516_v17, 0.0 }
 0x165   : > { %v1768_v19 = vpack.c.bf16 %v1519_v18, %v1519_v18 }
 0x167   : > { %1534 = vst [vmem:[%s224_s17 + $0x8] sm:$0xf] %v1768_v19 }
 0x179   : > { %v1447_v24 = vpop.f32.mrb[8].mxu0 }
 0x17a   : > { %v1494_v26 = vadd.f32 %v1447_v24, %v1047_v6  ;;  %v1449_v27 = vpop.f32.mrb[9].mxu0 }
 0x17b   : > { %v1495_v28 = vadd.f32 %v1449_v27, %v1049_v43  ;;  %v1451_v29 = vpop.f32.mrb[10].mxu0 }
 0x17c   : > { %v1514_v30 = vadd.f32 %v1502_v23, %v1494_v26  ;;  %v1452_v31 = vpop.f32.mrb[11].mxu0 }
 0x17d   : > { %v1515_v32 = vadd.f32 %v1506_v25, %v1495_v28 }
 0x17e   : > { %v1517_v33 = vmax.f32 %v1514_v30, 0.0 }
 0x17f   : > { %v1518_v34 = vmax.f32 %v1515_v32, 0.0 }
 0x181   : > { %v1767_v35 = vpack.c.bf16 %v1518_v34, %v1517_v33 }
 0x183   : > { %1533 = vst [vmem:[%s224_s17] sm:$0xff] %v1767_v35 }
 0x184 PF: > { %s15_s18 = sadd.s32 1, %s2047_s18  }
 0x185   : > { %p12_p4 = scmp.ge.s32.totalorder %s15_s18, 4  }
 0x187   :  { %14 = sbr.rel (!%p12_p4) target bundleno = 1 (0x1), region = 70 }

// kernel: forward.7
= control target key start
LH: loop header
LB: loop body
LE: loop exit
PB: predicated region body
PF: predicated region fallthrough
CT: control target
= control target key end

     0   :  { %s1083_s18 = smov 0   ;;  %s1378_s0 = inlined_call_operand.vmem [shape: bf16[64,176], index: 0, kind: input, shape index: {}]   ;;  %s1379_s1 = inlined_call_operand.vmem [shape: bf16[176,42], index: 1, kind: input, shape index: {}]   ;;  %s1380_s2 = inlined_call_operand.vmem [shape: bf16[176,42], index: 2, kind: input, shape index: {}]   ;;  %s1381_s3 = inlined_call_operand.vmem [shape: bf16[176,42], index: 3, kind: input, shape index: {}]   ;;  %s1382_s4 = inlined_call_operand.vmem [shape: f32[1,42], index: 4, kind: input, shape index: {}]   ;;  %s1383_s5 = inlined_call_operand.vmem [shape: f32[64,42], index: 5, kind: output, shape index: {}]  }
   0x1 LB: > { %s895_s19 = sadd.s32 4294967295, %s1049_s18   ;;  %p899_p0 = scmp.ge.s32.totalorder %s1049_s18, 1  ;;  %s1049_s18 = sphi %s1083_s18, %s15_s18  }
   0x2   : > { %p189_p1 = scmp.lt.s32.totalorder %s1049_s18, 3 }
   0x4   : > { %p190_p2 = pnand %p899_p0, %p189_p1 }
   0x5   : > { %v996_v0 = vld [vmem:[%s1379_s1] sm:$0xff] (!%p190_p2)   ;;  %v1051_v1 = vmov (!%p190_p2), 0   ;;  %v998_v3 = vld [vmem:[%s1379_s1 + $0x8] sm:$0xff] (!%p190_p2)   ;;  %s900_s28 = sshll.u32 (!%p190_p2), %s895_s19, 2  ;;  %v1000_v5 = vld [vmem:[%s1379_s1 + $0x10] sm:$0xff] (!%p190_p2)   ;;  %v312_v7 = vlaneseq (!%p190_p2)  ;;  %vm495_vm1 = vcmask (!%p190_p2), 392192  }
   0x6   : > { %193 = sbr.rel (%p190_p2) target bundleno = 326 (0x146), region = 40  ;;  %502 = vmatprep.subr.bf16.mxu0 (!%p190_p2), %v1051_v1  ;;  %623 = vmatprep.subr.bf16.mxu1 (!%p190_p2), %v1051_v1  ;;  %v997_v2 = vld [vmem:[%s1380_s2] sm:$0xff] (!%p190_p2)   ;;  %v999_v4 = vld [vmem:[%s1380_s2 + $0x8] sm:$0xff] (!%p190_p2)   ;;  %v1001_v6 = vld [vmem:[%s1380_s2 + $0x10] sm:$0xff] (!%p190_p2)   ;;  %p219_p3 = scmp.lt.s32.totalorder (!%p190_p2), %s900_s28, 7  ;;  %vm289_vm2 = vcmask (!%p190_p2), 1040384  }
   0x7   : > { %503 = vmatpush1.bf16.msra.mxu0 (!%p190_p2), %v996_v0  ;;  %624 = vmatpush1.bf16.msra.mxu1 (!%p190_p2), %v997_v2  ;;  %v1002_v8 = vld [vmem:[%s1379_s1 + $0x18] sm:$0xff] (!%p190_p2)   ;;  %v313_v10 = vshrl.u32 (!%p190_p2), %v312_v7, 7  ;;  %v1004_v11 = vld [vmem:[%s1379_s1 + $0x20] sm:$0xff] (!%p190_p2)   ;;  %v1006_v14 = vld [vmem:[%s1379_s1 + $0x28] sm:$0xff] (!%p190_p2)   ;;  %vm254_vm3 = vsmask.f32 (!%p190_p2), 256 }
   0x8   : > { %504 = vmatprep.subr.bf16.mxu0 (!%p190_p2), %v1051_v1  ;;  %625 = vmatprep.subr.bf16.mxu1 (!%p190_p2), %v1051_v1  ;;  %v1003_v9 = vld [vmem:[%s1380_s2 + $0x18] sm:$0xff] (!%p190_p2)   ;;  %v1005_v12 = vld [vmem:[%s1380_s2 + $0x20] sm:$0xff] (!%p190_p2)   ;;  %v1007_v15 = vld [vmem:[%s1380_s2 + $0x28] sm:$0xff] (!%p190_p2)   ;;  %vm1052_vm5 = vmmov (!%p190_p2), 0   ;;  %vm293_vm13 = vsmask.f32 (!%p190_p2), 7424 }
   0x9   : > { %v317_v13 = vand.u32 (!%p190_p2), 31, %v313_v10  ;;  %v1008_v17 = vld [vmem:[%s1379_s1 + $0x30] sm:$0xff] (!%p190_p2)   ;;  %v1010_v20 = vld [vmem:[%s1379_s1 + $0x38] sm:$0xff] (!%p190_p2)   ;;  %vm334_vm6 = vmpackc.low (!%p190_p2), %vm1052_vm5, %vm1052_vm5  ;;  %v316_v31 = vadd.s32 (!%p190_p2), 24, %v313_v10  ;;  %vm308_vm14 = vcmask (!%p190_p2), 1047552  }
   0xa   : > { %v1009_v19 = vld [vmem:[%s1380_s2 + $0x30] sm:$0xff] (!%p190_p2)   ;;  %v1011_v23 = vld [vmem:[%s1380_s2 + $0x38] sm:$0xff] (!%p190_p2)   ;;  %v1181_v26 = vsel (!%p190_p2), %vm334_vm6, 65537, %v1051_v1  ;;  %vm1189_vm7 = vmand (!%p190_p2), %vm289_vm2, %vm254_vm3 }
   0xb   : > { %505 = vmatpush1.bf16.msra.mxu0 (!%p190_p2), %v998_v3  ;;  %626 = vmatpush1.bf16.msra.mxu1 (!%p190_p2), %v999_v4  ;;  %vm1149_vm0 = vcmp.eq.s32.totalorder (!%p190_p2), %v317_v13, 0  ;;  %v1012_v32 = vld [vmem:[%s1379_s1 + $0x40] sm:$0xff] (!%p190_p2)   ;;  %v1014_v38 = vld [vmem:[%s1379_s1 + $0x48] sm:$0xff] (!%p190_p2)   ;;  %v320_v39 = vand.u32 (!%p190_p2), 31, %v316_v31  ;;  %v910_v47 = vcombine.low (!%p190_p2), %v1181_v26, %v1181_v26  ;;  %v1016_v48 = vld [vmem:[%s1379_s1 + $0x50] sm:$0xff] (!%p190_p2)  }
   0xc   : > { %506 = vmatprep.subr.bf16.mxu0 (!%p190_p2), %v1051_v1  ;;  %627 = vmatprep.subr.bf16.mxu1 (!%p190_p2), %v1051_v1  ;;  %vm333_vm4 = vmpackc.low (!%p190_p2), %vm1149_vm0, %vm1149_vm0  ;;  %v1013_v36 = vld [vmem:[%s1380_s2 + $0x40] sm:$0xff] (!%p190_p2)   ;;  %v1015_v44 = vld [vmem:[%s1380_s2 + $0x48] sm:$0xff] (!%p190_p2)  }
   0xd   : > { %s1399_s28 = smov (!%p219_p3, %s900_s28), 7  ;;  %v337_v24 = vsel %vm333_vm4, 65537, %v1051_v1  ;;  %vm1236_vm9 = vcmp.eq.s32.totalorder %v320_v39, 31  ;;  %v1017_v53 = vld [vmem:[%s1380_s2 + $0x50] sm:$0xff]   ;;  %vm1245_vm10 = vcmp.ne.s16.totalorder %v910_v47, 0  ;;  %v1021_v58 = vld [vmem:[%s1381_s3] sm:$0xff]   ;;  %vm1281_vm15 = vmand %vm308_vm14, %vm293_vm13 }
   0xe   : > { %s963_s16 = sshll.u32 %s1399_s28, 3  ;;  %v909_v29 = vcombine.low %v337_v24, %v1181_v26  ;;  %vm368_vm11 = vmpackc.low %vm1236_vm9, %vm1236_vm9  ;;  %v1022_v2 = vld [vmem:[%s1381_s3 + $0x8] sm:$0xff]   ;;  %v1025_v16 = vld [vmem:[%s1381_s3 + $0x20] sm:$0xff]  }
   0xf   : > { %507 = vmatpush1.bf16.msra.mxu0 %v1000_v5  ;;  %628 = vmatpush1.bf16.msra.mxu1 %v1001_v6  ;;  %s1146_s24 = scalar_lea.vmem %s1378_s0, %s963_s16  ;;  %v372_v63 = vsel %vm368_vm11, 65537, %v1051_v1  ;;  %vm928_vm0 = vmneg %vm1245_vm10  ;;  %s229_s27 = scalar_lea.vmem %s1383_s5, %s963_s16 }
  0x10   : > { %508 = vmatprep.subr.bf16.mxu0 %v1051_v1  ;;  %629 = vmatprep.subr.bf16.mxu1 %v1051_v1  ;;  %v1157_v18 = vld [vmem:[%s1146_s24 + $0x4] ss:$8 sps:$4 sm:$0xff]   ;;  %v1184_v27 = vld [vmem:[%s1146_s24] ss:$8 sps:$4 sm:$0xff]   ;;  %vm1198_vm8 = vcmp.ne.s16.totalorder %v909_v29, 0  ;;  %v912_v6 = vcombine.low %v1181_v26, %v372_v63 }
  0x11   : > { %v263_v21 = vshrl.u32 %v1157_v18, 16  ;;  %v266_v22 = vshll.u32 %v1157_v18, 16  ;;  %941 = vmatprep.mubr.msk.bf16.mxu1 %vm495_vm1, %v1157_v18  ;;  %v256_v35 = vshrl.u32 %v1184_v27, 16  ;;  %v259_v41 = vshll.u32 %v1184_v27, 16  ;;  %v1029_v42 = vld [vmem:[%s1146_s24 + $0x14] ss:$8 sps:$4 sm:$0xff]   ;;  %vm925_vm12 = vmneg %vm1198_vm8 }
  0x12   : > { %v1221_v43 = vld [vmem:[%s1146_s24 + $0x10] ss:$8 sps:$4 sm:$0xff]   ;;  %v278_v45 = vshrl.u32 %v1029_v42, 16  ;;  %v281_v46 = vshll.u32 %v1029_v42, 16  ;;  %vm1296_vm2 = vcmp.ne.s16.totalorder %v912_v6, 0 }
  0x13   : > { %509 = vmatpush1.bf16.msra.mxu0 %v1002_v8  ;;  %630 = vmatpush1.bf16.msra.mxu1 %v1003_v9  ;;  %v265_v25 = vrot.slane %v263_v21, 7  ;;  %v258_v40 = vrot.slane %v256_v35, 7  ;;  %v270_v51 = vshrl.u32 %v1221_v43, 16  ;;  %v298_v55 = vrot.slane %v266_v22, 1  ;;  %v1023_v8 = vld [vmem:[%s1381_s3 + $0x10] sm:$0xff]  }
  0x14   : > { %510 = vmatprep.subr.bf16.mxu0 %v1051_v1  ;;  %631 = vmatprep.subr.bf16.mxu1 %v1051_v1  ;;  %v280_v50 = vrot.slane %v278_v45, 7  ;;  %v273_v61 = vshll.u32 %v1221_v43, 16  ;;  %v300_v62 = vrot.slane %v281_v46, 1  ;;  %v1027_v18 = vld [vmem:[%s1381_s3 + $0x30] sm:$0xff]  }
  0x15   : > { %v268_v30 = vor.u32 %v266_v22, %v265_v25  ;;  %v261_v49 = vor.u32 %v259_v41, %v258_v40  ;;  %v272_v60 = vrot.slane %v270_v51, 7  ;;  %v299_v4 = vor.u32 %v298_v55, %v263_v21  ;;  %v1033_v22 = vld [vmem:[%s1381_s3 + $0x48] sm:$0xff]  }
  0x16   : > { %v283_v54 = vor.u32 %v281_v46, %v280_v50  ;;  %v303_v5 = vor.u32 %v300_v62, %v278_v45  ;;  %v294_v21 = vrot.slane %v259_v41, 1 }
  0x17   : > { %511 = vmatpush1.bf16.msra.mxu0 %v1004_v11  ;;  %632 = vmatpush1.bf16.msra.mxu1 %v1005_v12  ;;  %v292_v34 = vsel %vm1189_vm7, 0, %v268_v30  ;;  %v291_v57 = vsel %vm1189_vm7, 0, %v261_v49  ;;  %v275_v3 = vor.u32 %v273_v61, %v272_v60  ;;  %v301_v10 = vsel %vm293_vm13, %v299_v4, %v300_v62  ;;  %v960_v49 = vld [vmem:[%s1382_s4] ss:$0 sm:$0xff] }
  0x18   : > { %512 = vmatprep.subr.bf16.mxu0 %v1051_v1  ;;  %633 = vmatprep.subr.bf16.mxu1 %v1051_v1  ;;  %v350_v37 = vsel %vm1198_vm8, 0, %v292_v34  ;;  %v284_v59 = vsel %vm254_vm3, %v265_v25, %v283_v54  ;;  %v311_v11 = vsel %vm1281_vm15, %v303_v5, 0  ;;  %v382_v13 = vsel %vm1245_vm10, 0, %v301_v10  ;;  %v1034_v25 = vld [vmem:[%s1381_s3 + $0x50] sm:$0xff]  }
  0x19   : > { %924 = vmatprep.mubr.msk.bf16.mxu0 %vm495_vm1, %v350_v37  ;;  %v352_v0 = vsel %vm1245_vm10, 0, %v284_v59  ;;  %v276_v9 = vsel %vm254_vm3, %v258_v40, %v275_v3  ;;  %v295_v24 = vor.u32 %v294_v21, %v256_v35  ;;  %vm834_vm3 = vcmask 343040  }
  0x1b   : > { %513 = vmatpush1.bf16.msra.mxu0 %v1006_v14  ;;  %634 = vmatpush1.bf16.msra.mxu1 %v1007_v15  ;;  %v1024_v14 = vld [vmem:[%s1381_s3 + $0x18] sm:$0xff]   ;;  %v384_v15 = vsel %vm1296_vm2, 0, %v311_v11 }
  0x1c   : > { %514 = vmatprep.subr.bf16.mxu0 %v1051_v1  ;;  %635 = vmatprep.subr.bf16.mxu1 %v1051_v1 }
  0x1f   : > { %515 = vmatpush1.bf16.msra.mxu0 %v1008_v17  ;;  %636 = vmatpush1.bf16.msra.mxu1 %v1009_v19  ;;  %v1026_v17 = vld [vmem:[%s1381_s3 + $0x28] sm:$0xff]   ;;  %v1028_v19 = vld [vmem:[%s1381_s3 + $0x38] sm:$0xff]  }
  0x20   : > { %516 = vmatprep.subr.bf16.mxu0 %v1051_v1  ;;  %637 = vmatprep.subr.bf16.mxu1 %v1051_v1 }
  0x23   : > { %517 = vmatpush1.bf16.msra.mxu0 %v1010_v20  ;;  %638 = vmatpush1.bf16.msra.mxu1 %v1011_v23  ;;  %v1032_v20 = vld [vmem:[%s1381_s3 + $0x40] sm:$0xff]   ;;  %v296_v23 = vrot.slane %v273_v61, 1 }
  0x24   : > { %518 = vmatprep.subr.bf16.mxu0 %v1051_v1  ;;  %639 = vmatprep.subr.bf16.mxu1 %v1051_v1 }
  0x25   : > { %v302_v26 = vor.u32 %v296_v23, %v270_v51  ;;  %v297_v28 = vsel %vm293_vm13, %v295_v24, %v296_v23 }
  0x27   : > { %519 = vmatpush1.bf16.msra.mxu0 %v1012_v32  ;;  %640 = vmatpush1.bf16.msra.mxu1 %v1013_v36 }
  0x28   : > { %520 = vmatprep.subr.bf16.mxu0 %v1051_v1  ;;  %641 = vmatprep.subr.bf16.mxu1 %v1051_v1 }
  0x2b   : > { %521 = vmatpush1.bf16.msra.mxu0 %v1014_v38  ;;  %642 = vmatpush1.bf16.msra.mxu1 %v1015_v44 }
  0x2c   : > { %522 = vmatprep.subr.bf16.mxu0 %v1051_v1  ;;  %643 = vmatprep.subr.bf16.mxu1 %v1051_v1 }
  0x2f   : > { %523 = vmatpush1.bf16.msra.mxu0 %v1016_v48  ;;  %644 = vmatpush1.bf16.msra.mxu1 %v1017_v53 }
  0x30   : > { %766 = vmatprep.subr.bf16.mxu0 %v1051_v1  ;;  %964 = vmatprep.subr.bf16.mxu1 %v1051_v1 }
  0x32   : > { %926 = vmatmul.mubr.msk.bf16.vlgmr.msra.gmra.mrb[0].mxu0 %vm925_vm12, %v291_v57  ;;  %656 = vmatmul.mubr.bf16.vlgmr.msra.gmra.mrb[0].mxu1 %v1184_v27  ;;  %v310_v27 = vsel %vm1281_vm15, %v302_v26, 0 }
  0x33   : > { %767 = vmatpush1.bf16.msra.mxu0 %v1021_v58  ;;  %975 = vmatpush1.bf16.msra.mxu1 %v1021_v58 }
  0x34   : > { %768 = vmatprep.subr.bf16.mxu0 %v1051_v1  ;;  %965 = vmatprep.subr.bf16.mxu1 %v1051_v1 }
  0x35   : > { %927 = vmatprep.mubr.msk.bf16.mxu0 %vm495_vm1, %v352_v0  ;;  %942 = vmatprep.mubr.msk.bf16.mxu1 %vm495_vm1, %v1029_v42 }
  0x37   : > { %769 = vmatpush1.bf16.msra.mxu0 %v1022_v2  ;;  %976 = vmatpush1.bf16.msra.mxu1 %v1022_v2 }
  0x38   : > { %770 = vmatprep.subr.bf16.mxu0 %v1051_v1  ;;  %966 = vmatprep.subr.bf16.mxu1 %v1051_v1 }
  0x3a   : > { %929 = vmatmul.mubr.msk.bf16.gmra.mrb[4].mxu0 %vm928_vm0, %v276_v9  ;;  %664 = vmatmul.mubr.bf16.gmra.mrb[4].mxu1 %v1221_v43 }
  0x3b   : > { %771 = vmatpush1.bf16.msra.mxu0 %v1023_v8  ;;  %977 = vmatpush1.bf16.msra.mxu1 %v1023_v8 }
  0x3c   : > { %772 = vmatprep.subr.bf16.mxu0 %v1051_v1  ;;  %967 = vmatprep.subr.bf16.mxu1 %v1051_v1 }
  0x3d   : > { %954 = vmatprep.mubr.msk.bf16.mxu0 %vm495_vm1, %v382_v13  ;;  %957 = vmatprep.mubr.msk.bf16.mxu1 %vm495_vm1, %v384_v15  ;;  %vm958_vm1 = vmneg %vm1296_vm2 }
  0x3f   : > { %773 = vmatpush1.bf16.msra.mxu0 %v1024_v14  ;;  %978 = vmatpush1.bf16.msra.mxu1 %v1024_v14 }
  0x40   : > { %774 = vmatprep.subr.bf16.mxu0 %v1051_v1  ;;  %968 = vmatprep.subr.bf16.mxu1 %v1051_v1 }
  0x43   : > { %775 = vmatpush1.bf16.msra.mxu0 %v1025_v16  ;;  %979 = vmatpush1.bf16.msra.mxu1 %v1025_v16 }
  0x44   : > { %776 = vmatprep.subr.bf16.mxu0 %v1051_v1  ;;  %969 = vmatprep.subr.bf16.mxu1 %v1051_v1 }
  0x47   : > { %777 = vmatpush1.bf16.msra.mxu0 %v1026_v17  ;;  %980 = vmatpush1.bf16.msra.mxu1 %v1026_v17 }
  0x48   : > { %778 = vmatprep.subr.bf16.mxu0 %v1051_v1  ;;  %970 = vmatprep.subr.bf16.mxu1 %v1051_v1 }
  0x4b   : > { %779 = vmatpush1.bf16.msra.mxu0 %v1027_v18  ;;  %981 = vmatpush1.bf16.msra.mxu1 %v1027_v18 }
  0x4c   : > { %780 = vmatprep.subr.bf16.mxu0 %v1051_v1  ;;  %971 = vmatprep.subr.bf16.mxu1 %v1051_v1 }
  0x4f   : > { %781 = vmatpush1.bf16.msra.mxu0 %v1028_v19  ;;  %982 = vmatpush1.bf16.msra.mxu1 %v1028_v19 }
  0x50   : > { %782 = vmatprep.subr.bf16.mxu0 %v1051_v1  ;;  %972 = vmatprep.subr.bf16.mxu1 %v1051_v1 }
  0x53   : > { %783 = vmatpush1.bf16.msra.mxu0 %v1032_v20  ;;  %983 = vmatpush1.bf16.msra.mxu1 %v1032_v20 }
  0x54   : > { %784 = vmatprep.subr.bf16.mxu0 %v1051_v1  ;;  %973 = vmatprep.subr.bf16.mxu1 %v1051_v1 }
  0x57   : > { %785 = vmatpush1.bf16.msra.mxu0 %v1033_v22  ;;  %984 = vmatpush1.bf16.msra.mxu1 %v1033_v22 }
  0x58   : > { %786 = vmatprep.subr.bf16.mxu0 %v1051_v1  ;;  %974 = vmatprep.subr.bf16.mxu1 %v1051_v1 }
  0x5b   : > { %787 = vmatpush1.bf16.msra.mxu0 %v1034_v25  ;;  %985 = vmatpush1.bf16.msra.mxu1 %v1034_v25 }
  0x5e   : > { %956 = vmatmul.mubr.msk.bf16.vlgmr.msra.gmra.mrb[8].mxu0 %vm928_vm0, %v297_v28  ;;  %959 = vmatmul.mubr.msk.bf16.vlgmr.msra.gmra.mrb[8].mxu1 %vm958_vm1, %v310_v27 }
 0x105   : > { %v536_v29 = vpop.f32.mrb[0].mxu0  ;;  %v657_v30 = vpop.f32.mrb[0].mxu1 }
 0x106   : > { %v538_v31 = vpop.f32.mrb[1].mxu0  ;;  %v658_v32 = vadd.f32 %v657_v30, %v536_v29  ;;  %v659_v1 = vpop.f32.mrb[1].mxu1 }
 0x107   : > { %v539_v33 = vpop.f32.mrb[2].mxu0  ;;  %v660_v34 = vpop.f32.mrb[2].mxu1 }
 0x108   : > { %v541_v35 = vpop.f32.mrb[3].mxu0  ;;  %v661_v36 = vadd.f32 %v660_v34, %v539_v33  ;;  %v662_v37 = vpop.f32.mrb[3].mxu1 }
 0x10d   : > { %v544_v38 = vpop.f32.mrb[4].mxu0  ;;  %v665_v40 = vpop.f32.mrb[4].mxu1 }
 0x10e   : > { %v546_v39 = vpop.f32.mrb[5].mxu0  ;;  %v666_v41 = vadd.f32 %v665_v40, %v544_v38  ;;  %v667_v43 = vpop.f32.mrb[5].mxu1 }
 0x10f   : > { %v547_v42 = vpop.f32.mrb[6].mxu0  ;;  %v668_v45 = vpop.f32.mrb[6].mxu1 }
 0x110   : > { %v549_v44 = vpop.f32.mrb[7].mxu0  ;;  %v669_v46 = vadd.f32 %v668_v45, %v547_v42  ;;  %v670_v47 = vpop.f32.mrb[7].mxu1 }
 0x131   : > { %v800_v48 = vpop.f32.mrb[8].mxu0  ;;  %v808_v51 = vpop.f32.mrb[8].mxu1 }
 0x132   : > { %v815_v50 = vadd.f32 %v800_v48, %v658_v32  ;;  %v802_v52 = vpop.f32.mrb[9].mxu0  ;;  %v817_v53 = vadd.f32 %v808_v51, %v666_v41  ;;  %v810_v54 = vpop.f32.mrb[9].mxu1 }
 0x133   : > { %v803_v55 = vpop.f32.mrb[10].mxu0  ;;  %v811_v58 = vpop.f32.mrb[10].mxu1 }
 0x134   : > { %v826_v56 = vadd.f32 %v960_v49, %v815_v50  ;;  %v816_v57 = vadd.f32 %v803_v55, %v661_v36  ;;  %v805_v59 = vpop.f32.mrb[11].mxu0  ;;  %v828_v60 = vadd.f32 %v960_v49, %v817_v53  ;;  %v818_v61 = vadd.f32 %v811_v58, %v669_v46  ;;  %v813_v62 = vpop.f32.mrb[11].mxu1 }
 0x136   : > { %1035 = vtanh.f32 %v826_v56  ;;  %v827_v63 = vadd.f32 %v960_v49, %v816_v57  ;;  %v829_v0 = vadd.f32 %v960_v49, %v818_v61 }
 0x138   : > { %1037 = vtanh.f32 %v827_v63 }
 0x139   : > { %1039 = vtanh.f32 %v828_v60 }
 0x13a   : > { %1041 = vtanh.f32 %v829_v0 }
 0x140   : > { %v1036_v2 = vpop.eup %1035 }
 0x141   : > { %835 = vst.msk [vmem:[%s229_s27] sm:$0xff] %vm834_vm3, %v1036_v2 }
 0x142   : > { %v1038_v3 = vpop.eup %1037 }
 0x143   : > { %v1040_v4 = vpop.eup %1039  ;;  %836 = vst.msk [vmem:[%s229_s27 + $0x8] sm:$0xff] %vm834_vm3, %v1038_v3 }
 0x144   : > { %v1042_v5 = vpop.eup %1041  ;;  %837 = vst.msk [vmem:[%s229_s27 + $0x10] sm:$0xff] %vm834_vm3, %v1040_v4 }
 0x145   : > { %838 = vst.msk [vmem:[%s229_s27 + $0x18] sm:$0xff] %vm834_vm3, %v1042_v5 }
 0x146 PF: > { %s15_s18 = sadd.s32 1, %s1049_s18  }
 0x147   : > { %p12_p4 = scmp.ge.s32.totalorder %s15_s18, 4  }
 0x149   :  { %14 = sbr.rel (!%p12_p4) target bundleno = 1 (0x1), region = 70 }

// kernel: forward.6
= control target key start
LH: loop header
LB: loop body
LE: loop exit
PB: predicated region body
PF: predicated region fallthrough
CT: control target
= control target key end

     0   :  { %s1768_s18 = smov 0   ;;  %s2242_s0 = inlined_call_operand.vmem [shape: bf16[32,192], index: 0, kind: input, shape index: {}]   ;;  %s2243_s1 = inlined_call_operand.vmem [shape: bf16[192,352], index: 1, kind: input, shape index: {}]   ;;  %s2244_s2 = inlined_call_operand.vmem [shape: bf16[192,352], index: 2, kind: input, shape index: {}]   ;;  %s2245_s3 = inlined_call_operand.vmem [shape: bf16[192,352], index: 3, kind: input, shape index: {}]   ;;  %s2246_s4 = inlined_call_operand.vmem [shape: f32[1,352], index: 4, kind: input, shape index: {}]   ;;  %s2247_s5 = inlined_call_operand.vmem [shape: bf16[32,352], index: 5, kind: output, shape index: {}]  }
   0x1 LB: > { %s1415_s19 = sadd.s32 4294967295, %s1734_s18   ;;  %p1419_p0 = scmp.ge.s32.totalorder %s1734_s18, 1  ;;  %s1734_s18 = sphi %s1768_s18, %s15_s18  }
   0x2   : > { %p189_p1 = scmp.lt.s32.totalorder %s1734_s18, 3 }
   0x4   : > { %p190_p2 = pnand %p1419_p0, %p189_p1 }
   0x5   : > { %v1581_v0 = vld [vmem:[%s2243_s1 + $0x4] ss:$12 sps:$4 sm:$0xff] (!%p190_p2)   ;;  %v1736_v1 = vmov (!%p190_p2), 0   ;;  %v1583_v2 = vld [vmem:[%s2243_s1 + $0x8] ss:$12 sps:$4 sm:$0xff] (!%p190_p2)   ;;  %s1420_s17 = sshll.u32 (!%p190_p2), %s1415_s19, 1  ;;  %v278_v14 = vlaneseq (!%p190_p2) }
   0x6   : > { %193 = sbr.rel (%p190_p2) target bundleno = 373 (0x175), region = 40  ;;  %650 = vmatprep.subr.bf16.mxu1 (!%p190_p2), %v1736_v1  ;;  %607 = vmatprep.subr.bf16.mxu0 (!%p190_p2), %v1581_v0  ;;  %v1584_v3 = vld [vmem:[%s2243_s1] ss:$12 sps:$4 sm:$0xff] (!%p190_p2)   ;;  %v1585_v4 = vld [vmem:[%s2243_s1 + $0x1c] ss:$12 sps:$4 sm:$0xff] (!%p190_p2)   ;;  %p220_p3 = scmp.lt.s32.totalorder (!%p190_p2), %s1420_s17, 3 }
   0x7   : > { %651 = vmatpush1.bf16.msra.mxu1 (!%p190_p2), %v1583_v2  ;;  %608 = vmatpush1.bf16.msra.mxu0 (!%p190_p2), %v1584_v3  ;;  %v1587_v5 = vld [vmem:[%s2243_s1 + $0x20] ss:$12 sps:$4 sm:$0xff] (!%p190_p2)   ;;  %v1588_v6 = vld [vmem:[%s2243_s1 + $0x18] ss:$12 sps:$4 sm:$0xff] (!%p190_p2)   ;;  %v1592_v9 = vld [vmem:[%s2243_s1 + $0x30] ss:$12 sps:$4 sm:$0xff] (!%p190_p2)  }
   0x8   : > { %652 = vmatprep.subr.bf16.mxu1 (!%p190_p2), %v1736_v1  ;;  %609 = vmatprep.subr.bf16.mxu0 (!%p190_p2), %v1585_v4  ;;  %v1589_v7 = vld [vmem:[%s2243_s1 + $0x34] ss:$12 sps:$4 sm:$0xff] (!%p190_p2)   ;;  %v1591_v8 = vld [vmem:[%s2243_s1 + $0x38] ss:$12 sps:$4 sm:$0xff] (!%p190_p2)   ;;  %v1595_v11 = vld [vmem:[%s2243_s1 + $0x50] ss:$12 sps:$4 sm:$0xff] (!%p190_p2)  }
   0x9   : > { %v1593_v10 = vld [vmem:[%s2243_s1 + $0x4c] ss:$12 sps:$4 sm:$0xff] (!%p190_p2)   ;;  %v1596_v12 = vld [vmem:[%s2243_s1 + $0x48] ss:$12 sps:$4 sm:$0xff] (!%p190_p2)   ;;  %v1597_v13 = vld [vmem:[%s2243_s1 + $0x64] ss:$12 sps:$4 sm:$0xff] (!%p190_p2)  }
   0xa   : > { %v1599_v15 = vld [vmem:[%s2243_s1 + $0x68] ss:$12 sps:$4 sm:$0xff] (!%p190_p2)   ;;  %v1600_v16 = vld [vmem:[%s2243_s1 + $0x60] ss:$12 sps:$4 sm:$0xff] (!%p190_p2)   ;;  %v1831_v18 = vshrl.u32 (!%p190_p2), %v278_v14, 7  ;;  %vm262_vm2 = vcmask (!%p190_p2), 1040384  }
   0xb   : > { %653 = vmatpush1.bf16.msra.mxu1 (!%p190_p2), %v1587_v5  ;;  %610 = vmatpush1.bf16.msra.mxu0 (!%p190_p2), %v1588_v6  ;;  %v1601_v17 = vld [vmem:[%s2243_s1 + $0x7c] ss:$12 sps:$4 sm:$0xff] (!%p190_p2)   ;;  %v1603_v19 = vld [vmem:[%s2243_s1 + $0x80] ss:$12 sps:$4 sm:$0xff] (!%p190_p2)   ;;  %v1604_v20 = vld [vmem:[%s2243_s1 + $0x78] ss:$12 sps:$4 sm:$0xff] (!%p190_p2)  }
   0xc   : > { %654 = vmatprep.subr.bf16.mxu1 (!%p190_p2), %v1736_v1  ;;  %611 = vmatprep.subr.bf16.mxu0 (!%p190_p2), %v1589_v7  ;;  %v1605_v21 = vld [vmem:[%s2243_s1 + $0x94] ss:$12 sps:$4 sm:$0xff] (!%p190_p2)   ;;  %v281_v22 = vand.u32 (!%p190_p2), 15, %v1831_v18  ;;  %v1607_v23 = vld [vmem:[%s2243_s1 + $0x98] ss:$12 sps:$4 sm:$0xff] (!%p190_p2)   ;;  %vm1737_vm4 = vmmov (!%p190_p2), 0  }
   0xd   : > { %s2261_s17 = smov (!%p220_p3, %s1420_s17), 3  ;;  %v1608_v24 = vld [vmem:[%s2243_s1 + $0x90] ss:$12 sps:$4 sm:$0xff]   ;;  %v1609_v25 = vld [vmem:[%s2243_s1 + $0xac] ss:$12 sps:$4 sm:$0xff]   ;;  %vm290_vm5 = vmpackc.low %vm1737_vm4, %vm1737_vm4  ;;  %vm603_vm7 = vcmask 523264  }
   0xe   : > { %s1557_s10 = sshll.u32 %s2261_s17, 3  ;;  %vm263_vm0 = vsmask.f32 256  ;;  %v1611_v26 = vld [vmem:[%s2243_s1 + $0xb0] ss:$12 sps:$4 sm:$0xff]   ;;  %vm1861_vm1 = vcmp.eq.s32.totalorder %v281_v22, 0 }
   0xf   : > { %655 = vmatpush1.bf16.msra.mxu1 %v1591_v8  ;;  %612 = vmatpush1.bf16.msra.mxu0 %v1592_v9  ;;  %s224_s22 = scalar_lea.vmem %s2242_s0, %s1557_s10  ;;  %v1612_v28 = vld [vmem:[%s2243_s1 + $0xa8] ss:$12 sps:$4 sm:$0xff]   ;;  %v1613_v29 = vld [vmem:[%s2243_s1 + $0xc4] ss:$12 sps:$4 sm:$0xff]   ;;  %v1616_v33 = vld [vmem:[%s2243_s1 + $0xc0] ss:$12 sps:$4 sm:$0xff]  }
  0x10   : > { %656 = vmatprep.subr.bf16.mxu1 %v1736_v1  ;;  %613 = vmatprep.subr.bf16.mxu0 %v1593_v10  ;;  %v1872_v30 = vld [vmem:[%s224_s22 + $0x4] ss:$8 sps:$4 sm:$0xff]   ;;  %v1615_v31 = vld [vmem:[%s2243_s1 + $0xc8] ss:$12 sps:$4 sm:$0xff]   ;;  %vm289_vm3 = vmpackc.low %vm1861_vm1, %vm1861_vm1  ;;  %v1896_v40 = vsel %vm290_vm5, 65537, %v1736_v1  ;;  %vm273_vm12 = vcmask 1047552  }
  0x11   : > { %v1877_v32 = vld [vmem:[%s224_s22] ss:$8 sps:$4 sm:$0xff]   ;;  %v254_v34 = vshrl.u32 %v1872_v30, 16  ;;  %v257_v35 = vshll.u32 %v1872_v30, 16  ;;  %v291_v37 = vsel %vm289_vm3, 65537, %v1736_v1  ;;  %vm1899_vm6 = vmand %vm262_vm2, %vm263_vm0  ;;  %s1570_s10 = smul.u32 12, %s2261_s17 }
  0x12   : > { %v1617_v36 = vld [vmem:[%s2243_s1 + $0xdc] ss:$12 sps:$4 sm:$0xff]   ;;  %v250_v38 = vshll.u32 %v1877_v32, 16  ;;  %v1427_v42 = vcombine.low %v291_v37, %v1896_v40  ;;  %v247_v43 = vshrl.u32 %v1877_v32, 16  ;;  %v1619_v45 = vld [vmem:[%s2243_s1 + $0xe0] ss:$12 sps:$4 sm:$0xff]  }
  0x13   : > { %657 = vmatpush1.bf16.msra.mxu1 %v1595_v11  ;;  %614 = vmatpush1.bf16.msra.mxu0 %v1596_v12  ;;  %v256_v39 = vrot.slane %v254_v34, 7  ;;  %v1620_v49 = vld [vmem:[%s2243_s1 + $0xd8] ss:$12 sps:$4 sm:$0xff]   ;;  %v1621_v51 = vld [vmem:[%s2243_s1 + $0xf4] ss:$12 sps:$4 sm:$0xff]   ;;  %v269_v37 = vrot.slane %v257_v35, 1  ;;  %s231_s13 = scalar_lea.vmem %s2247_s5, %s1570_s10 }
  0x14   : > { %658 = vmatprep.subr.bf16.mxu1 %v1736_v1  ;;  %615 = vmatprep.subr.bf16.mxu0 %v1597_v13  ;;  %v267_v44 = vrot.slane %v250_v38, 1  ;;  %vm1910_vm8 = vcmp.ne.s16.totalorder %v1427_v42, 0  ;;  %v1623_v53 = vld [vmem:[%s2243_s1 + $0xf8] ss:$12 sps:$4 sm:$0xff]   ;;  %v249_v54 = vrot.slane %v247_v43, 7  ;;  %vm1353_vm1 = vcmask 781312  }
  0x15   : > { %v259_v46 = vor.u32 %v257_v35, %v256_v39  ;;  %v1624_v55 = vld [vmem:[%s2243_s1 + $0xf0] ss:$12 sps:$4 sm:$0xff]   ;;  %v1625_v56 = vld [vmem:[%s2243_s1 + $0x10c] ss:$12 sps:$4 sm:$0xff]   ;;  %v1628_v59 = vld [vmem:[%s2243_s1 + $0x108] ss:$12 sps:$4 sm:$0xff]  }
  0x16   : > { %v1914_v48 = vor.u32 %v267_v44, %v247_v43  ;;  %v1627_v57 = vld [vmem:[%s2243_s1 + $0x110] ss:$12 sps:$4 sm:$0xff]   ;;  %v252_v58 = vor.u32 %v250_v38, %v249_v54  ;;  %v1635_v61 = vld [vmem:[%s2244_s2 + $0x8] ss:$12 sps:$4 sm:$0xff]   ;;  %vm1466_vm9 = vmneg %vm1910_vm8  ;;  %vm274_vm13 = vsmask.f32 7424  ;;  %v270_v44 = vor.u32 %v269_v37, %v254_v34 }
  0x17   : > { %659 = vmatpush1.bf16.msra.mxu1 %v1599_v15  ;;  %616 = vmatpush1.bf16.msra.mxu0 %v1600_v16  ;;  %v266_v50 = vsel %vm1899_vm6, 0, %v259_v46  ;;  %v1634_v60 = vld [vmem:[%s2244_s2 + $0x4] ss:$12 sps:$4 sm:$0xff]   ;;  %v1632_v63 = vld [vmem:[%s2244_s2] ss:$12 sps:$4 sm:$0xff]   ;;  %vm2088_vm14 = vmand %vm273_vm12, %vm274_vm13  ;;  %v1311_v37 = vsub.s32 1, %v1831_v18 }
  0x18   : > { %660 = vmatprep.subr.bf16.mxu1 %v1736_v1  ;;  %617 = vmatprep.subr.bf16.mxu0 %v1601_v17  ;;  %v298_v52 = vsel %vm1910_vm8, 0, %v266_v50  ;;  %v265_v62 = vsel %vm1899_vm6, 0, %v252_v58  ;;  %v1638_v0 = vld [vmem:[%s2244_s2 + $0x1c] ss:$12 sps:$4 sm:$0xff]   ;;  %v1639_v2 = vld [vmem:[%s2244_s2 + $0x20] ss:$12 sps:$4 sm:$0xff]  }
  0x19   : > { %1468 = vmatprep.mubr.msk.bf16.mxu1 %vm603_vm7, %v298_v52  ;;  %1465 = vmatprep.mubr.msk.bf16.mxu0 %vm603_vm7, %v298_v52  ;;  %v1636_v3 = vld [vmem:[%s2244_s2 + $0x18] ss:$12 sps:$4 sm:$0xff]   ;;  %v1642_v4 = vld [vmem:[%s2244_s2 + $0x34] ss:$12 sps:$4 sm:$0xff]   ;;  %v1640_v6 = vld [vmem:[%s2244_s2 + $0x30] ss:$12 sps:$4 sm:$0xff]  }
  0x1a   : > { %v1643_v5 = vld [vmem:[%s2244_s2 + $0x38] ss:$12 sps:$4 sm:$0xff]   ;;  %v1647_v8 = vld [vmem:[%s2244_s2 + $0x50] ss:$12 sps:$4 sm:$0xff]   ;;  %v1644_v9 = vld [vmem:[%s2244_s2 + $0x48] ss:$12 sps:$4 sm:$0xff]  }
  0x1b   : > { %661 = vmatpush1.bf16.msra.mxu1 %v1603_v19  ;;  %618 = vmatpush1.bf16.msra.mxu0 %v1604_v20  ;;  %v1646_v7 = vld [vmem:[%s2244_s2 + $0x4c] ss:$12 sps:$4 sm:$0xff]   ;;  %v1650_v10 = vld [vmem:[%s2244_s2 + $0x64] ss:$12 sps:$4 sm:$0xff]   ;;  %v1651_v11 = vld [vmem:[%s2244_s2 + $0x68] ss:$12 sps:$4 sm:$0xff]  }
  0x1c   : > { %662 = vmatprep.subr.bf16.mxu1 %v1736_v1  ;;  %619 = vmatprep.subr.bf16.mxu0 %v1605_v21  ;;  %v1648_v12 = vld [vmem:[%s2244_s2 + $0x60] ss:$12 sps:$4 sm:$0xff]   ;;  %v1654_v13 = vld [vmem:[%s2244_s2 + $0x7c] ss:$12 sps:$4 sm:$0xff]   ;;  %v1652_v15 = vld [vmem:[%s2244_s2 + $0x78] ss:$12 sps:$4 sm:$0xff]  }
  0x1d   : > { %v1655_v14 = vld [vmem:[%s2244_s2 + $0x80] ss:$12 sps:$4 sm:$0xff]   ;;  %v280_v17 = vadd.s32 8, %v1831_v18  ;;  %v1659_v19 = vld [vmem:[%s2244_s2 + $0x98] ss:$12 sps:$4 sm:$0xff]   ;;  %v277_v34 = vsel %vm2088_vm14, %v270_v44, 0 }
  0x1e   : > { %v1658_v16 = vld [vmem:[%s2244_s2 + $0x94] ss:$12 sps:$4 sm:$0xff]   ;;  %v1656_v20 = vld [vmem:[%s2244_s2 + $0x90] ss:$12 sps:$4 sm:$0xff]   ;;  %v1662_v21 = vld [vmem:[%s2244_s2 + $0xac] ss:$12 sps:$4 sm:$0xff]  }
  0x1f   : > { %663 = vmatpush1.bf16.msra.mxu1 %v1607_v23  ;;  %620 = vmatpush1.bf16.msra.mxu0 %v1608_v24  ;;  %v282_v22 = vand.u32 15, %v280_v17  ;;  %v1663_v23 = vld [vmem:[%s2244_s2 + $0xb0] ss:$12 sps:$4 sm:$0xff]   ;;  %v1660_v24 = vld [vmem:[%s2244_s2 + $0xa8] ss:$12 sps:$4 sm:$0xff]  }
  0x20   : > { %664 = vmatprep.subr.bf16.mxu1 %v1736_v1  ;;  %621 = vmatprep.subr.bf16.mxu0 %v1609_v25  ;;  %v1666_v25 = vld [vmem:[%s2244_s2 + $0xc4] ss:$12 sps:$4 sm:$0xff]   ;;  %v1667_v27 = vld [vmem:[%s2244_s2 + $0xc8] ss:$12 sps:$4 sm:$0xff]   ;;  %v1678_v42 = vld [vmem:[%s2244_s2 + $0x10c] ss:$12 sps:$4 sm:$0xff]  }
  0x21   : > { %vm2038_vm10 = vcmp.eq.s32.totalorder %v282_v22, 15  ;;  %v1675_v38 = vld [vmem:[%s2244_s2 + $0xf8] ss:$12 sps:$4 sm:$0xff]   ;;  %v1672_v41 = vld [vmem:[%s2244_s2 + $0xf0] ss:$12 sps:$4 sm:$0xff]  }
  0x22   : > { %vm306_vm11 = vmpackc.low %vm2038_vm10, %vm2038_vm10  ;;  %v1679_v43 = vld [vmem:[%s2244_s2 + $0x110] ss:$12 sps:$4 sm:$0xff]   ;;  %v1687_v52 = vld [vmem:[%s2245_s3 + $0x20] ss:$12 sps:$4 sm:$0xff]  }
  0x23   : > { %665 = vmatpush1.bf16.msra.mxu1 %v1611_v26  ;;  %622 = vmatpush1.bf16.msra.mxu0 %v1612_v28  ;;  %v1664_v28 = vld [vmem:[%s2244_s2 + $0xc0] ss:$12 sps:$4 sm:$0xff]   ;;  %v308_v39 = vsel %vm306_vm11, 65537, %v1736_v1  ;;  %v1686_v50 = vld [vmem:[%s2245_s3 + $0x1c] ss:$12 sps:$4 sm:$0xff]  }
  0x24   : > { %666 = vmatprep.subr.bf16.mxu1 %v1736_v1  ;;  %623 = vmatprep.subr.bf16.mxu0 %v1613_v29  ;;  %v1670_v29 = vld [vmem:[%s2244_s2 + $0xdc] ss:$12 sps:$4 sm:$0xff]   ;;  %v1428_v35 = vcombine.low %v1896_v40, %v308_v39  ;;  %v1682_v40 = vld [vmem:[%s2245_s3 + $0x4] ss:$12 sps:$4 sm:$0xff]   ;;  %v1690_v54 = vld [vmem:[%s2245_s3 + $0x34] ss:$12 sps:$4 sm:$0xff]  }
  0x25   : > { %v1692_v58 = vld [vmem:[%s2245_s3 + $0x48] ss:$12 sps:$4 sm:$0xff]   ;;  %v1726_v17 = vld [vmem:[%s2245_s3 + $0x10c] ss:$12 sps:$4 sm:$0xff]  }
  0x26   : > { %vm2100_vm15 = vcmp.ne.s16.totalorder %v1428_v35, 0 }
  0x27   : > { %667 = vmatpush1.bf16.msra.mxu1 %v1615_v31  ;;  %624 = vmatpush1.bf16.msra.mxu0 %v1616_v33  ;;  %v1671_v31 = vld [vmem:[%s2244_s2 + $0xe0] ss:$12 sps:$4 sm:$0xff]   ;;  %v1668_v33 = vld [vmem:[%s2244_s2 + $0xd8] ss:$12 sps:$4 sm:$0xff]   ;;  %vm1546_vm0 = vmneg %vm2100_vm15 }
  0x28   : > { %668 = vmatprep.subr.bf16.mxu1 %v1736_v1  ;;  %625 = vmatprep.subr.bf16.mxu0 %v1617_v36  ;;  %v1674_v36 = vld [vmem:[%s2244_s2 + $0xf4] ss:$12 sps:$4 sm:$0xff]  }
  0x2b   : > { %669 = vmatpush1.bf16.msra.mxu1 %v1619_v45  ;;  %626 = vmatpush1.bf16.msra.mxu0 %v1620_v49  ;;  %v1676_v45 = vld [vmem:[%s2244_s2 + $0x108] ss:$12 sps:$4 sm:$0xff]   ;;  %v1680_v49 = vld [vmem:[%s2245_s3] ss:$12 sps:$4 sm:$0xff]  }
  0x2c   : > { %670 = vmatprep.subr.bf16.mxu1 %v1736_v1  ;;  %627 = vmatprep.subr.bf16.mxu0 %v1621_v51  ;;  %v314_v51 = vsel %vm2100_vm15, 0, %v277_v34 }
  0x2f   : > { %671 = vmatpush1.bf16.msra.mxu1 %v1623_v53  ;;  %628 = vmatpush1.bf16.msra.mxu0 %v1624_v55  ;;  %v1684_v53 = vld [vmem:[%s2245_s3 + $0x18] ss:$12 sps:$4 sm:$0xff]   ;;  %v1688_v55 = vld [vmem:[%s2245_s3 + $0x30] ss:$12 sps:$4 sm:$0xff]  }
  0x30   : > { %672 = vmatprep.subr.bf16.mxu1 %v1736_v1  ;;  %629 = vmatprep.subr.bf16.mxu0 %v1625_v56  ;;  %v1694_v56 = vld [vmem:[%s2245_s3 + $0x4c] ss:$12 sps:$4 sm:$0xff]  }
  0x33   : > { %673 = vmatpush1.bf16.msra.mxu1 %v1627_v57  ;;  %630 = vmatpush1.bf16.msra.mxu0 %v1628_v59  ;;  %v1695_v57 = vld [vmem:[%s2245_s3 + $0x50] ss:$12 sps:$4 sm:$0xff]  }
  0x34   : > { %929 = vmatprep.subr.bf16.mxu1 %v1736_v1  ;;  %886 = vmatprep.subr.bf16.mxu0 %v1634_v60  ;;  %v1698_v59 = vld [vmem:[%s2245_s3 + $0x64] ss:$12 sps:$4 sm:$0xff]   ;;  %v1699_v60 = vld [vmem:[%s2245_s3 + $0x68] ss:$12 sps:$4 sm:$0xff]  }
  0x36   : > { %1470 = vmatmul.mubr.msk.bf16.vlgmr.msra.gmra.mrb[0].mxu1 %vm1466_vm9, %v265_v62  ;;  %1467 = vmatmul.mubr.msk.bf16.vlgmr.msra.gmra.mrb[0].mxu0 %vm1466_vm9, %v265_v62  ;;  %v1702_v62 = vld [vmem:[%s2245_s3 + $0x7c] ss:$12 sps:$4 sm:$0xff]  }
  0x37   : > { %930 = vmatpush1.bf16.msra.mxu1 %v1635_v61  ;;  %887 = vmatpush1.bf16.msra.mxu0 %v1632_v63  ;;  %v1696_v61 = vld [vmem:[%s2245_s3 + $0x60] ss:$12 sps:$4 sm:$0xff]  }
  0x38   : > { %931 = vmatprep.subr.bf16.mxu1 %v1736_v1  ;;  %888 = vmatprep.subr.bf16.mxu0 %v1638_v0  ;;  %v1703_v63 = vld [vmem:[%s2245_s3 + $0x80] ss:$12 sps:$4 sm:$0xff]   ;;  %v1700_v0 = vld [vmem:[%s2245_s3 + $0x78] ss:$12 sps:$4 sm:$0xff]  }
  0x39   : > { %1508 = vmatprep.mubr.msk.bf16.mxu1 %vm603_vm7, %v1872_v30  ;;  %1507 = vmatprep.mubr.msk.bf16.mxu0 %vm603_vm7, %v1872_v30  ;;  %v1683_v30 = vld [vmem:[%s2245_s3 + $0x8] ss:$12 sps:$4 sm:$0xff]  }
  0x3b   : > { %932 = vmatpush1.bf16.msra.mxu1 %v1639_v2  ;;  %889 = vmatpush1.bf16.msra.mxu0 %v1636_v3  ;;  %v1706_v2 = vld [vmem:[%s2245_s3 + $0x94] ss:$12 sps:$4 sm:$0xff]   ;;  %v1707_v3 = vld [vmem:[%s2245_s3 + $0x98] ss:$12 sps:$4 sm:$0xff]  }
  0x3c   : > { %933 = vmatprep.subr.bf16.mxu1 %v1736_v1  ;;  %890 = vmatprep.subr.bf16.mxu0 %v1642_v4  ;;  %v1704_v4 = vld [vmem:[%s2245_s3 + $0x90] ss:$12 sps:$4 sm:$0xff]  }
  0x3f   : > { %934 = vmatpush1.bf16.msra.mxu1 %v1643_v5  ;;  %891 = vmatpush1.bf16.msra.mxu0 %v1640_v6  ;;  %v1710_v5 = vld [vmem:[%s2245_s3 + $0xac] ss:$12 sps:$4 sm:$0xff]   ;;  %v1711_v6 = vld [vmem:[%s2245_s3 + $0xb0] ss:$12 sps:$4 sm:$0xff]  }
  0x40   : > { %935 = vmatprep.subr.bf16.mxu1 %v1736_v1  ;;  %892 = vmatprep.subr.bf16.mxu0 %v1646_v7  ;;  %v1708_v7 = vld [vmem:[%s2245_s3 + $0xa8] ss:$12 sps:$4 sm:$0xff]  }
  0x43   : > { %936 = vmatpush1.bf16.msra.mxu1 %v1647_v8  ;;  %893 = vmatpush1.bf16.msra.mxu0 %v1644_v9  ;;  %v1714_v8 = vld [vmem:[%s2245_s3 + $0xc4] ss:$12 sps:$4 sm:$0xff]   ;;  %v1715_v9 = vld [vmem:[%s2245_s3 + $0xc8] ss:$12 sps:$4 sm:$0xff]  }
  0x44   : > { %937 = vmatprep.subr.bf16.mxu1 %v1736_v1  ;;  %894 = vmatprep.subr.bf16.mxu0 %v1650_v10  ;;  %v1712_v10 = vld [vmem:[%s2245_s3 + $0xc0] ss:$12 sps:$4 sm:$0xff]  }
  0x47   : > { %938 = vmatpush1.bf16.msra.mxu1 %v1651_v11  ;;  %895 = vmatpush1.bf16.msra.mxu0 %v1648_v12  ;;  %v1718_v11 = vld [vmem:[%s2245_s3 + $0xdc] ss:$12 sps:$4 sm:$0xff]   ;;  %v1719_v12 = vld [vmem:[%s2245_s3 + $0xe0] ss:$12 sps:$4 sm:$0xff]  }
  0x48   : > { %939 = vmatprep.subr.bf16.mxu1 %v1736_v1  ;;  %896 = vmatprep.subr.bf16.mxu0 %v1654_v13  ;;  %v1716_v13 = vld [vmem:[%s2245_s3 + $0xd8] ss:$12 sps:$4 sm:$0xff]  }
  0x4b   : > { %940 = vmatpush1.bf16.msra.mxu1 %v1655_v14  ;;  %897 = vmatpush1.bf16.msra.mxu0 %v1652_v15  ;;  %v1722_v14 = vld [vmem:[%s2245_s3 + $0xf4] ss:$12 sps:$4 sm:$0xff]   ;;  %v1723_v15 = vld [vmem:[%s2245_s3 + $0xf8] ss:$12 sps:$4 sm:$0xff]  }
  0x4c   : > { %941 = vmatprep.subr.bf16.mxu1 %v1736_v1  ;;  %898 = vmatprep.subr.bf16.mxu0 %v1658_v16  ;;  %v1720_v16 = vld [vmem:[%s2245_s3 + $0xf0] ss:$12 sps:$4 sm:$0xff]  }
  0x4f   : > { %942 = vmatpush1.bf16.msra.mxu1 %v1659_v19  ;;  %899 = vmatpush1.bf16.msra.mxu0 %v1656_v20  ;;  %v1727_v19 = vld [vmem:[%s2245_s3 + $0x110] ss:$12 sps:$4 sm:$0xff]   ;;  %v1724_v20 = vld [vmem:[%s2245_s3 + $0x108] ss:$12 sps:$4 sm:$0xff]  }
  0x50   : > { %943 = vmatprep.subr.bf16.mxu1 %v1736_v1  ;;  %900 = vmatprep.subr.bf16.mxu0 %v1662_v21  ;;  %v276_v21 = vsel %vm2088_vm14, %v1914_v48, 0  ;;  %v1303_v48 = vld [vmem:[%s2246_s4] sm:$0x7] }
  0x53   : > { %944 = vmatpush1.bf16.msra.mxu1 %v1663_v23  ;;  %901 = vmatpush1.bf16.msra.mxu0 %v1660_v24 }
  0x54   : > { %945 = vmatprep.subr.bf16.mxu1 %v1736_v1  ;;  %902 = vmatprep.subr.bf16.mxu0 %v1666_v25 }
  0x57   : > { %946 = vmatpush1.bf16.msra.mxu1 %v1667_v27  ;;  %903 = vmatpush1.bf16.msra.mxu0 %v1664_v28 }
  0x58   : > { %947 = vmatprep.subr.bf16.mxu1 %v1736_v1  ;;  %904 = vmatprep.subr.bf16.mxu0 %v1670_v29 }
  0x5b   : > { %948 = vmatpush1.bf16.msra.mxu1 %v1671_v31  ;;  %905 = vmatpush1.bf16.msra.mxu0 %v1668_v33  ;;  %v1307_v33 = vsub.s32 0, %v1831_v18 }
  0x5c   : > { %949 = vmatprep.subr.bf16.mxu1 %v1736_v1  ;;  %906 = vmatprep.subr.bf16.mxu0 %v1674_v36  ;;  %v1315_v36 = vsub.s32 2, %v1831_v18 }
  0x5e   : > { %v1316_v39 = vrot.slane %v1303_v48, %v1315_v36 }
  0x5f   : > { %950 = vmatpush1.bf16.msra.mxu1 %v1675_v38  ;;  %907 = vmatpush1.bf16.msra.mxu0 %v1672_v41  ;;  %v1308_v38 = vrot.slane %v1303_v48, %v1307_v33  ;;  %v1312_v41 = vrot.slane %v1303_v48, %v1311_v37 }
  0x60   : > { %951 = vmatprep.subr.bf16.mxu1 %v1736_v1  ;;  %908 = vmatprep.subr.bf16.mxu0 %v1678_v42 }
  0x63   : > { %952 = vmatpush1.bf16.msra.mxu1 %v1679_v43  ;;  %909 = vmatpush1.bf16.msra.mxu0 %v1676_v45 }
  0x64   : > { %1256 = vmatprep.subr.bf16.mxu1 %v1736_v1  ;;  %1213 = vmatprep.subr.bf16.mxu0 %v1682_v40 }
  0x66   : > { %962 = vmatmul.mubr.bf16.vlgmr.msra.gmra.mrb[4].mxu1 %v1877_v32  ;;  %919 = vmatmul.mubr.bf16.vlgmr.msra.gmra.mrb[0].mxu0 %v1877_v32  ;;  %v1691_v32 = vld [vmem:[%s2245_s3 + $0x38] ss:$12 sps:$4 sm:$0xff]  }
  0x67   : > { %1257 = vmatpush1.bf16.msra.mxu1 %v1683_v30  ;;  %1214 = vmatpush1.bf16.msra.mxu0 %v1680_v49 }
  0x68   : > { %1258 = vmatprep.subr.bf16.mxu1 %v1736_v1  ;;  %1215 = vmatprep.subr.bf16.mxu0 %v1686_v50 }
  0x69   : > { %1548 = vmatprep.mubr.msk.bf16.mxu1 %vm603_vm7, %v314_v51  ;;  %1545 = vmatprep.mubr.msk.bf16.mxu0 %vm603_vm7, %v314_v51 }
  0x6b   : > { %1259 = vmatpush1.bf16.msra.mxu1 %v1687_v52  ;;  %1216 = vmatpush1.bf16.msra.mxu0 %v1684_v53 }
  0x6c   : > { %1260 = vmatprep.subr.bf16.mxu1 %v1736_v1  ;;  %1217 = vmatprep.subr.bf16.mxu0 %v1690_v54 }
  0x6f   : > { %1261 = vmatpush1.bf16.msra.mxu1 %v1691_v32  ;;  %1218 = vmatpush1.bf16.msra.mxu0 %v1688_v55 }
  0x70   : > { %1262 = vmatprep.subr.bf16.mxu1 %v1736_v1  ;;  %1219 = vmatprep.subr.bf16.mxu0 %v1694_v56 }
  0x73   : > { %1263 = vmatpush1.bf16.msra.mxu1 %v1695_v57  ;;  %1220 = vmatpush1.bf16.msra.mxu0 %v1692_v58 }
  0x74   : > { %1264 = vmatprep.subr.bf16.mxu1 %v1736_v1  ;;  %1221 = vmatprep.subr.bf16.mxu0 %v1698_v59 }
  0x77   : > { %1265 = vmatpush1.bf16.msra.mxu1 %v1699_v60  ;;  %1222 = vmatpush1.bf16.msra.mxu0 %v1696_v61 }
  0x78   : > { %1266 = vmatprep.subr.bf16.mxu1 %v1736_v1  ;;  %1223 = vmatprep.subr.bf16.mxu0 %v1702_v62 }
  0x7b   : > { %1267 = vmatpush1.bf16.msra.mxu1 %v1703_v63  ;;  %1224 = vmatpush1.bf16.msra.mxu0 %v1700_v0 }
  0x7c   : > { %1268 = vmatprep.subr.bf16.mxu1 %v1736_v1  ;;  %1225 = vmatprep.subr.bf16.mxu0 %v1706_v2 }
  0x7f   : > { %1269 = vmatpush1.bf16.msra.mxu1 %v1707_v3  ;;  %1226 = vmatpush1.bf16.msra.mxu0 %v1704_v4 }
  0x80   : > { %1270 = vmatprep.subr.bf16.mxu1 %v1736_v1  ;;  %1227 = vmatprep.subr.bf16.mxu0 %v1710_v5 }
  0x83   : > { %1271 = vmatpush1.bf16.msra.mxu1 %v1711_v6  ;;  %1228 = vmatpush1.bf16.msra.mxu0 %v1708_v7 }
  0x84   : > { %1272 = vmatprep.subr.bf16.mxu1 %v1736_v1  ;;  %1229 = vmatprep.subr.bf16.mxu0 %v1714_v8 }
  0x87   : > { %1273 = vmatpush1.bf16.msra.mxu1 %v1715_v9  ;;  %1230 = vmatpush1.bf16.msra.mxu0 %v1712_v10 }
  0x88   : > { %1274 = vmatprep.subr.bf16.mxu1 %v1736_v1  ;;  %1231 = vmatprep.subr.bf16.mxu0 %v1718_v11 }
  0x8b   : > { %1275 = vmatpush1.bf16.msra.mxu1 %v1719_v12  ;;  %1232 = vmatpush1.bf16.msra.mxu0 %v1716_v13 }
  0x8c   : > { %1276 = vmatprep.subr.bf16.mxu1 %v1736_v1  ;;  %1233 = vmatprep.subr.bf16.mxu0 %v1722_v14 }
  0x8f   : > { %1277 = vmatpush1.bf16.msra.mxu1 %v1723_v15  ;;  %1234 = vmatpush1.bf16.msra.mxu0 %v1720_v16 }
  0x90   : > { %1278 = vmatprep.subr.bf16.mxu1 %v1736_v1  ;;  %1235 = vmatprep.subr.bf16.mxu0 %v1726_v17 }
  0x93   : > { %1279 = vmatpush1.bf16.msra.mxu1 %v1727_v19  ;;  %1236 = vmatpush1.bf16.msra.mxu0 %v1724_v20 }
  0x96   : > { %1550 = vmatmul.mubr.msk.bf16.vlgmr.msra.gmra.mrb[8].mxu1 %vm1546_vm0, %v276_v21  ;;  %1547 = vmatmul.mubr.msk.bf16.vlgmr.msra.gmra.mrb[0].mxu0 %vm1546_vm0, %v276_v21 }
 0x109   : > { %v684_v22 = vpop.f32.mrb[0].mxu1 }
 0x10a   : > { %v686_v23 = vpop.f32.mrb[1].mxu1 }
 0x10b   : > { %v687_v24 = vpop.f32.mrb[2].mxu1 }
 0x10c   : > { %v689_v1 = vpop.f32.mrb[3].mxu1 }
 0x139   : > { %v963_v25 = vpop.f32.mrb[4].mxu1 }
 0x13a   : > { %v964_v26 = vadd.f32 %v963_v25, %v684_v22  ;;  %v965_v27 = vpop.f32.mrb[5].mxu1 }
 0x13b   : > { %v966_v28 = vpop.f32.mrb[6].mxu1 }
 0x13c   : > { %v967_v29 = vadd.f32 %v966_v28, %v687_v24  ;;  %v968_v31 = vpop.f32.mrb[7].mxu1 }
 0x169   : > { %v1290_v42 = vpop.f32.mrb[8].mxu1  ;;  %v1247_v43 = vpop.f32.mrb[0].mxu0 }
 0x16a   : > { %v1299_v35 = vadd.f32 %v1290_v42, %v964_v26  ;;  %v1292_v44 = vpop.f32.mrb[9].mxu1  ;;  %v1320_v45 = vadd.f32 %v1308_v38, %v1247_v43  ;;  %v1249_v46 = vpop.f32.mrb[1].mxu0 }
 0x16b   : > { %v1293_v40 = vpop.f32.mrb[10].mxu1  ;;  %v1321_v34 = vadd.f32 %v1312_v41, %v1249_v46  ;;  %v1251_v49 = vpop.f32.mrb[2].mxu0 }
 0x16c   : > { %v1322_v30 = vadd.f32 %v1316_v39, %v1299_v35  ;;  %v1302_v47 = vadd.f32 %v1293_v40, %v967_v29  ;;  %v1295_v50 = vpop.f32.mrb[11].mxu1  ;;  %v1326_v51 = vmax.f32 %v1320_v45, 0.0  ;;  %v1323_v52 = vadd.f32 %v1308_v38, %v1251_v49  ;;  %v1253_v53 = vpop.f32.mrb[3].mxu0 }
 0x16d   : > { %v1327_v54 = vmax.f32 %v1321_v34, 0.0  ;;  %v1324_v55 = vadd.f32 %v1312_v41, %v1253_v53 }
 0x16e   : > { %v1328_v18 = vmax.f32 %v1322_v30, 0.0  ;;  %v1325_v32 = vadd.f32 %v1316_v39, %v1302_v47  ;;  %v1329_v56 = vmax.f32 %v1323_v52, 0.0 }
 0x16f   : > { %v1558_v58 = vpack.c.bf16 %v1327_v54, %v1326_v51  ;;  %v1330_v60 = vmax.f32 %v1324_v55, 0.0 }
 0x170   : > { %v1559_v57 = vpack.c.bf16 %v1328_v18, %v1328_v18  ;;  %v1331_v59 = vmax.f32 %v1325_v32, 0.0 }
 0x171   : > { %1352 = vst [vmem:[%s231_s13] sm:$0xff] %v1558_v58  ;;  %v1560_v62 = vpack.c.bf16 %v1330_v60, %v1329_v56 }
 0x172   : > { %1354 = vst.msk [vmem:[%s231_s13 + $0x8] sm:$0xf] %vm1353_vm1, %v1559_v57  ;;  %v1561_v61 = vpack.c.bf16 %v1331_v59, %v1331_v59 }
 0x173   : > { %1355 = vst [vmem:[%s231_s13 + $0xc] sm:$0xff] %v1560_v62 }
 0x174   : > { %1356 = vst.msk [vmem:[%s231_s13 + $0x14] sm:$0xf] %vm1353_vm1, %v1561_v61 }
 0x175 PF: > { %s15_s18 = sadd.s32 1, %s1734_s18  }
 0x176   : > { %p12_p4 = scmp.ge.s32.totalorder %s15_s18, 4  }
 0x178   :  { %14 = sbr.rel (!%p12_p4) target bundleno = 1 (0x1), region = 70 }

// kernel: forward.4
= control target key start
LH: loop header
LB: loop body
LE: loop exit
PB: predicated region body
PF: predicated region fallthrough
CT: control target
= control target key end

     0   :  { %s6825_s0 = inlined_call_operand.hbm [shape: f32[2,100], index: 0, kind: input, shape index: {}]   ;;  %s6826_s1 = inlined_call_operand.hbm [shape: bf16[100,1024], index: 1, kind: input, shape index: {}]   ;;  %s6827_s2 = inlined_call_operand.hbm [shape: f32[1,1024], index: 2, kind: input, shape index: {}]   ;;  %s6828_s3 = inlined_call_operand.hbm [shape: bf16[1024,2048], index: 3, kind: input, shape index: {}]   ;;  %s6829_s4 = inlined_call_operand.hbm [shape: f32[1,2048], index: 4, kind: input, shape index: {}]   ;;  %s6830_s5 = inlined_call_operand.vmem [shape: bf16[2,2048], index: 5, kind: output, shape index: {}]  }
   0x1   :  { %6844 = sst [smem:[#allocation14_spill]] %s6826_s1 }
   0x2   :  { %6845 = sst [smem:[#allocation15_spill]] %s6828_s3 }
   0x3   :  { %10 = vsyncpa [#allocation3], 0 }
   0x4   :  { %11 = vsyncpa [#allocation5], 0 }
   0x5   :  { %12 = vsyncpa [#allocation8], 0 }
   0x6   :  { %14 = vsyncpa [#allocation8 + $0x1], 0  ;;  %s5909_s18 = smov 0   ;;  %s5911_s19 = smov 0  }
   0x7   :  { %s5913_s20 = smov 0   ;;  %s5915_s21 = smov 0  }
   0x8   :  { %s5917_s22 = smov 0   ;;  %s5919_s23 = smov 0  }
   0x9 LB: > { %s6836_s24 = sadd.s32 4294967295, %s5867_s23   ;;  %p114_p0 = scmp.ne.s32.totalorder %s5855_s20, %s5851_s19  ;;  %s5867_s23 = sphi %s5919_s23, %s20_s23   ;;  %s5863_s22 = sphi %s5917_s22, %s6873_s22   ;;  %s5859_s21 = sphi %s5915_s21, %s6872_s21   ;;  %s5855_s20 = sphi %s5913_s20, %s6871_s20   ;;  %s5851_s19 = sphi %s5911_s19, %s6870_s19   ;;  %s5847_s18 = sphi %s5909_s18, %s6869_s18  }
   0xa   : > { %p115_p1 = scmp.eq.s32.totalorder %s5867_s23, 0  ;;  %p120_p2 = scmp.ne.s32.totalorder %s5851_s19, %s5847_s18 }
   0xb   : > { %p5945_p3 = scmp.eq.s32.totalorder %s6836_s24, 0  ;;  %p4902_p5 = scmp.ge.s32.totalorder %s5867_s23, 1 }
   0xc   : > { %p116_p4 = por %p115_p1, %p114_p0  ;;  %p185_p7 = scmp.lt.s32.totalorder %s5867_s23, 3 }
   0xd   : > { %s6846_s26 = scalar_select %p5945_p3, 1, 0 }
   0xe   : > { %p5952_p6 = por %p5945_p3, %p120_p2  ;;  %p5957_p8 = pnand %p4902_p5, %p185_p7 }
   0xf   : > { %s5869_s29 = smov [#allocation4]   ;;  %p5596_p10 = scmp.lt.s32.totalorder %s5867_s23, 2 }
  0x10   : > { %s6847_s27 = scalar_select %p5952_p6, 1, 0 }
  0x11   : > { %s6848_s28 = scalar_select %p5957_p8, 1, 0 }
  0x12   : > { %s210_s30 = sshll.u32 %s5869_s29, 4  ;;  %p5576_p9 = pneg %p5957_p8  ;;  %s211_s30 = int_to_ptr.vmem [resolvable:$true] %s210_s30 }
  0x13   : > { %p5970_p12 = pnand %p5596_p10, %p116_p4  ;;  %s29_s8 = sadd.s32 1, %s5863_s22 }
  0x14   : > { %p5966_p11 = pnand %p5576_p9, %p5945_p3  ;;  %s6851_s1 = sld [smem:[#allocation14_spill]] }
  0x15   : > { %s6850_s7 = scalar_select %p5970_p12, 1, 0 }
  0x16   : > { %s6849_s6 = scalar_select %p5966_p11, 1, 0 }
  0x17   : > { %p5983_p0 = pneg %p5966_p11 }
  0x1a   : > { %s5665_s11 = scalar_lea.hbm %s6851_s1, 6656 }
  0x1b   : > { %p5666_p13 = scmp.ne.s32.totalorder %s6851_s1, %s5665_s11  ;;  %p5672_p4 = scmp.lt.u32.totalorder %s5665_s11, %s6851_s1 }
  0x1d   : > { %p5668_p1 = pnand %p5983_p0, %p5666_p13 }
  0x1f   : > { %p5669_p2 = pneg %p5668_p1 }
  0x21   : > { %p5674_p5 = pnand %p5672_p4, %p5669_p2 }
  0x23   : > { %5677 = shalt.err (!%p5674_p5)
}
  0x24   : > { %s5678_s17 = scalar_lea.vmem %s211_s30, 6656  ;;  %p5686_p6 = scmp.lt.s32.totalorder %s211_s30, %s211_s30 }
  0x25   : > { %p5679_p7 = scmp.ne.s32.totalorder %s211_s30, %s5678_s17  ;;  %p5687_p3 = scmp.lt.s32.totalorder %s5678_s17, %s5678_s17 }
  0x27   : > { %p5681_p9 = pnand %p5679_p7, %p5983_p0  ;;  %p5688_p8 = por %p5687_p3, %p5686_p6 }
  0x29   : > { %p5682_p10 = pneg %p5681_p9 }
  0x2b   : > { %p5689_p12 = pnand %p5688_p8, %p5682_p10 }
  0x2d   : > { %5692 = shalt.err (!%p5689_p12)
}
  0x2e   : > { %s6837_s18 = smov 512   ;;  %s5871_s29 = smov 32  }
  0x2f   : > { %5582 = dma.hbm_to_vmem [thread:$0]  (!%p5966_p11), %s6851_s1, 6656, %s211_s30, [#allocation5], %s6837_s18, %s6837_s18, %s5871_s29  }
  0x30   : > { %p30_p3 = scmp.ge.s32.totalorder %s29_s8, 2  ;;  %s235_s11 = sand.u32 1, %s5867_s23  }
  0x31   : > { %s6838_s12 = sand.u32 1, %s5855_s20   ;;  %s5502_s16 = sshll.u32 %s5863_s22, 9 }
  0x32   : > { %s6875_s8 = smov (%p30_p3, %s29_s8), 0  ;;  %s4907_s13 = sshll.u32 %s6838_s12, 12 }
  0x33   : > { %6853 = sst [smem:[#allocation13_spill]] %s6875_s8  ;;  %s104_s15 = ssub.s32 %s5863_s22, %s6875_s8 }
  0x34   : > { %p105_p6 = scmp.eq.s32.totalorder %s104_s15, 0  ;;  %s6854_s3 = sld [smem:[#allocation15_spill]] }
  0x35   : > { %s239_s30 = scalar_lea.vmem [#allocation7], %s4907_s13  ;;  %s6855_s10 = sadd.s32 1, %s5855_s20 }
  0x36   : > { %s246_s9 = sshll.u32 %s239_s30, 4  ;;  %s6023_s12 = scalar_lea.sflag [#allocation8], %s235_s11  ;;  %s6021_s9 = int_to_ptr.vmem [resolvable:$true] %s246_s9 }
  0x37   : > { %s6019_s18 = scalar_select %p105_p6, %s5855_s20, %s6855_s10  }
  0x38   : > { %p6856_p12 = scmp.ne.s32.totalorder %s6850_s7, 0 }
  0x3a   : > { %s6014_s25 = scalar_lea.hbm %s6854_s3, %s5502_s16  ;;  %p6842_p13 = pneg %p6856_p12 }
  0x3b   : > { %s5693_s15 = scalar_lea.hbm %s6014_s25, 65536  ;;  %s5698_s13 = scalar_lea.hbm %s6854_s3, 131072 }
  0x3c   : > { %p5694_p8 = scmp.ne.s32.totalorder %s6014_s25, %s5693_s15  ;;  %p5699_p4 = scmp.lt.u32.totalorder %s6014_s25, %s6854_s3 }
  0x3d   : > { %p5700_p5 = scmp.lt.u32.totalorder %s5698_s13, %s5693_s15  ;;  %p5702_p9 = scmp.lt.u32.totalorder %s5693_s15, %s6014_s25 }
  0x3e   : > { %p5696_p1 = pnand %p6842_p13, %p5694_p8 }
  0x3f   : > { %p5701_p7 = por %p5700_p5, %p5699_p4 }
  0x40   : > { %p5697_p2 = pneg %p5696_p1 }
  0x41   : > { %p5703_p10 = por %p5702_p9, %p5701_p7 }
  0x43   : > { %p5704_p3 = pnand %p5703_p10, %p5697_p2 }
  0x45   : > { %5707 = shalt.err (!%p5704_p3)
}
  0x46   : > { %s5708_s11 = scalar_lea.vmem %s6021_s9, 65536  ;;  %s5872_s10 = smov [#allocation7]  }
  0x47   : > { %p5709_p6 = scmp.ne.s32.totalorder %s6021_s9, %s5708_s11  ;;  %s5713_s24 = sshll.u32 %s5872_s10, 4  ;;  %s5714_s24 = int_to_ptr.vmem [resolvable:$false] %s5713_s24 }
  0x48   : > { %s5715_s16 = scalar_lea.vmem %s5714_s24, 131072  ;;  %p5716_p11 = scmp.lt.s32.totalorder %s6021_s9, %s5714_s24 }
  0x49   : > { %p5711_p8 = pnand %p5709_p6, %p6842_p13  ;;  %p5717_p4 = scmp.lt.s32.totalorder %s5715_s16, %s5708_s11 }
  0x4b   : > { %p5712_p1 = pneg %p5711_p8  ;;  %p5718_p5 = por %p5717_p4, %p5716_p11 }
  0x4d   : > { %p5719_p7 = pnand %p5718_p5, %p5712_p1 }
  0x4f   : > { %5722 = shalt.err (!%p5719_p7)
}
  0x50   : > { %s5873_s15 = smov 1024   ;;  %s6857_s13 = smov 512  }
  0x51   : > { %5589 = dma.hbm_to_vmem [thread:$0]  (!%p6856_p12), %s6014_s25, 65536, %s6021_s9, %s6023_s12, %s5873_s15, %s6857_s13, %s5871_s29  }
  0x52   : > { %s5874_s17 = smov [#allocation2]   ;;  %s5723_s11 = scalar_lea.hbm %s6825_s0, 32 }
  0x53   : > { %s200_s30 = sshll.u32 %s5874_s17, 4  ;;  %p5724_p11 = scmp.ne.s32.totalorder %s6825_s0, %s5723_s11  ;;  %s201_s30 = int_to_ptr.vmem [resolvable:$true] %s200_s30 }
  0x54   : > { %p5730_p10 = scmp.lt.u32.totalorder %s5723_s11, %s6825_s0 }
  0x55   : > { %p5726_p2 = pnand %p5724_p11, %p5983_p0 }
  0x57   : > { %p5727_p9 = pneg %p5726_p2 }
  0x59   : > { %p5732_p3 = pnand %p5730_p10, %p5727_p9 }
  0x5b   : > { %5735 = shalt.err (!%p5732_p3)
}
  0x5c   : > { %s5736_s25 = scalar_lea.vmem %s201_s30, 32  ;;  %p5744_p4 = scmp.lt.s32.totalorder %s201_s30, %s201_s30 }
  0x5d   : > { %p5737_p6 = scmp.ne.s32.totalorder %s201_s30, %s5736_s25  ;;  %p5745_p5 = scmp.lt.s32.totalorder %s5736_s25, %s5736_s25 }
  0x5f   : > { %p5739_p8 = pnand %p5737_p6, %p5983_p0  ;;  %p5746_p7 = por %p5745_p5, %p5744_p4 }
  0x61   : > { %p5740_p1 = pneg %p5739_p8 }
  0x63   : > { %p5747_p13 = pnand %p5746_p7, %p5740_p1 }
  0x65   : > { %5750 = shalt.err (!%p5747_p13)
}
  0x66   : > { %p6858_p11 = scmp.ne.s32.totalorder %s6849_s6, 0  ;;  %s5875_s3 = smov [#allocation6]  }
  0x67   : > { %s224_s8 = sshll.u32 %s5875_s3, 4  ;;  %s6859_s9 = sand.u32 1, %s5855_s20   ;;  %s225_s8 = int_to_ptr.vmem [resolvable:$true] %s224_s8 }
  0x68   : > { %5579 = dma.hbm_to_vmem [thread:$0]  (!%p6858_p11), %s6825_s0, 32, %s201_s30, [#allocation3]  }
  0x69   : > { %s4910_s15 = sshll.u32 %s6859_s9, 3  ;;  %s5751_s10 = scalar_lea.hbm %s6827_s2, 128 }
  0x6a   : > { %p5752_p13 = scmp.ne.s32.totalorder %s6827_s2, %s5751_s10  ;;  %p5758_p10 = scmp.lt.u32.totalorder %s5751_s10, %s6827_s2 }
  0x6c   : > { %p5754_p2 = pnand %p5752_p13, %p5983_p0 }
  0x6e   : > { %p5755_p9 = pneg %p5754_p2 }
  0x70   : > { %p5760_p3 = pnand %p5758_p10, %p5755_p9 }
  0x72   : > { %5763 = shalt.err (!%p5760_p3)
}
  0x73   : > { %s5764_s30 = scalar_lea.vmem %s225_s8, 128  ;;  %p5772_p4 = scmp.lt.s32.totalorder %s225_s8, %s225_s8 }
  0x74   : > { %p5765_p6 = scmp.ne.s32.totalorder %s225_s8, %s5764_s30  ;;  %p5773_p5 = scmp.lt.s32.totalorder %s5764_s30, %s5764_s30 }
  0x76   : > { %p5767_p8 = pnand %p5765_p6, %p5983_p0  ;;  %p5774_p7 = por %p5773_p5, %p5772_p4 }
  0x78   : > { %p5768_p1 = pneg %p5767_p8 }
  0x7a   : > { %p5775_p12 = pnand %p5774_p7, %p5768_p1 }
  0x7c   : > { %5778 = shalt.err (!%p5775_p12)
}
  0x7d   : > { %5585 = dma.hbm_to_vmem [thread:$0]  (!%p6858_p11), %s6827_s2, 128, %s225_s8, [#allocation5]  }
  0x7e   : > { %s5503_s3 = sshll.u32 %s5863_s22, 7  ;;  %s260_s9 = scalar_lea.vmem [#allocation9], %s4910_s15 }
  0x7f   : > { %s268_s13 = sshll.u32 %s260_s9, 4  ;;  %s266_s10 = scalar_lea.hbm %s6829_s4, %s5503_s3  ;;  %s269_s13 = int_to_ptr.vmem [resolvable:$true] %s268_s13 }
  0x80   : > { %s5779_s11 = scalar_lea.hbm %s266_s10, 128  ;;  %p6860_p13 = scmp.ne.s32.totalorder %s6850_s7, 0 }
  0x81   : > { %p5780_p0 = scmp.ne.s32.totalorder %s266_s10, %s5779_s11  ;;  %s5784_s16 = scalar_lea.hbm %s6829_s4, 256 }
  0x82   : > { %p6861_p12 = pneg %p6860_p13  ;;  %p5785_p11 = scmp.lt.u32.totalorder %s266_s10, %s6829_s4 }
  0x83   : > { %p5786_p10 = scmp.lt.u32.totalorder %s5784_s16, %s5779_s11  ;;  %p5788_p6 = scmp.lt.u32.totalorder %s5779_s11, %s266_s10 }
  0x84   : > { %p5782_p2 = pnand %p5780_p0, %p6861_p12 }
  0x85   : > { %p5787_p3 = por %p5786_p10, %p5785_p11 }
  0x86   : > { %p5783_p9 = pneg %p5782_p2 }
  0x87   : > { %p5789_p8 = por %p5788_p6, %p5787_p3 }
  0x89   : > { %p5790_p1 = pnand %p5789_p8, %p5783_p9 }
  0x8b   : > { %5793 = shalt.err (!%p5790_p1)
}
  0x8c   : > { %s5794_s15 = scalar_lea.vmem %s269_s13, 128  ;;  %p6862_p5 = pmov %p6861_p12 }
  0x8d   : > { %p5795_p4 = scmp.ne.s32.totalorder %s269_s13, %s5794_s15  ;;  %s5876_s30 = smov [#allocation9]  }
  0x8e   : > { %s5799_s1 = sshll.u32 %s5876_s30, 4  ;;  %s5800_s1 = int_to_ptr.vmem [resolvable:$false] %s5799_s1 }
  0x8f   : > { %p5797_p7 = pnand %p5795_p4, %p6862_p5  ;;  %s5801_s29 = scalar_lea.vmem %s5800_s1, 256 }
  0x90   : > { %p5802_p12 = scmp.lt.s32.totalorder %s269_s13, %s5800_s1  ;;  %p5803_p2 = scmp.lt.s32.totalorder %s5801_s29, %s5794_s15 }
  0x91   : > { %p5798_p0 = pneg %p5797_p7 }
  0x92   : > { %p5804_p10 = por %p5803_p2, %p5802_p12 }
  0x94   : > { %p5805_p11 = pnand %p5804_p10, %p5798_p0 }
  0x96   : > { %5808 = shalt.err (!%p5805_p11)
}
  0x97   : > { %5592 = dma.hbm_to_vmem [thread:$0]  (!%p6860_p13), %s266_s10, 128, %s269_s13, %s6023_s12  }
  0x98   : > { %p6863_p9 = scmp.ne.s32.totalorder %s6848_s28, 0 }
  0x99   : > { %p6864_p3 = scmp.ne.s32.totalorder (!%p6863_p9), %s6846_s26, 0 }
  0x9a   : > { %277 = sbr.rel (%p6863_p9) target bundleno = 1099 (0x44b), region = 40 }
  0xa1   : > { %5834 = dma.done.wait (%p6864_p3), [#allocation3], 32  }
  0xa2   : > { %5836 = vsyncadd (%p6864_p3), [#allocation3], 4294967264 }
  0xa3   : > { %5838 = dma.done.wait (%p6864_p3), [#allocation5], 6784  }
  0xa4   : > { %5840 = vsyncadd (%p6864_p3), [#allocation5], 4294960512  ;;  %s6865_s3 = sadd.s32 4294967295, %s5867_s23   ;;  %s293_s28 = sand.u32 1, %s5851_s19  }
  0xa5   : > { %s291_s7 = sand.u32 1, %s6865_s3   ;;  %s4917_s12 = sshll.u32 %s293_s28, 12 }
  0xa6   : > { %s292_s9 = scalar_lea.sflag [#allocation8], %s291_s7  ;;  %s6125_s13 = scalar_lea.vmem [#allocation7], %s4917_s12 }
  0xa7   : > { %p6866_p13 = scmp.ne.s32.totalorder %s6847_s27, 0 }
  0xa9   : > { %5842 = dma.done.wait (%p6866_p13), %s292_s9, 65664  }
  0xaa   : > { %5844 = vsyncadd (%p6866_p13), %s292_s9, 4294901632  ;;  %v5877_v0 = vmov 0   ;;  %v353_v1 = vld [vmem:[#allocation4] sm:$0xff]  ;;  %v354_v11 = vld [vmem:[#allocation4 + $0x8] sm:$0xff]  ;;  %vm711_vm0 = vcmask 1041408   ;;  %vm707_vm1 = vcmask 818176  }
  0xab   : > { %768 = vmatprep.mubr.bf16.mxu0 %v5877_v0  ;;  %809 = vmatprep.mubr.bf16.mxu1 %v5877_v0  ;;  %v357_v2 = vld [vmem:[#allocation4 + $0x20] sm:$0xff]  ;;  %v358_v13 = vld [vmem:[#allocation4 + $0x28] sm:$0xff]  ;;  %v355_v51 = vld [vmem:[#allocation4 + $0x10] sm:$0xff]  ;;  %s4918_s26 = sshll.u32 %s293_s28, 3  ;;  %s4919_s17 = sshll.u32 %s5859_s21, 3 }
  0xac   : > { %v361_v3 = vld [vmem:[#allocation4 + $0x40] sm:$0xff]  ;;  %v4921_v4 = vcombine.high %v353_v1, %v357_v2  ;;  %v4920_v5 = vcombine.low %v353_v1, %v357_v2  ;;  %v362_v14 = vld [vmem:[#allocation4 + $0x48] sm:$0xff]  ;;  %v4923_v18 = vcombine.high %v354_v11, %v358_v13  ;;  %v4922_v19 = vcombine.low %v354_v11, %v358_v13  ;;  %v359_v52 = vld [vmem:[#allocation4 + $0x30] sm:$0xff]  ;;  %s304_s27 = scalar_lea.vmem [#allocation9], %s4918_s26  ;;  %p344_p6 = scmp.lt.s32.totalorder %s4919_s17, 15 }
  0xad   : > { %v365_v6 = vld [vmem:[#allocation4 + $0x60] sm:$0xff]  ;;  %v366_v15 = vld [vmem:[#allocation4 + $0x68] sm:$0xff]  ;;  %v351_v54 = vld [vmem:[#allocation2] sm:$0x3]  ;;  %v4925_v57 = vcombine.high %v355_v51, %v359_v52  ;;  %v4924_v2 = vcombine.low %v355_v51, %v359_v52 }
  0xae   : > { %v4929_v7 = vcombine.high %v361_v3, %v365_v6  ;;  %v369_v8 = vld [vmem:[#allocation4 + $0x80] sm:$0xff]  ;;  %736 = vmatprep.subr.bf16.mxu0 %v4921_v4  ;;  %v4928_v10 = vcombine.low %v361_v3, %v365_v6  ;;  %v4931_v20 = vcombine.high %v362_v14, %v366_v15  ;;  %v370_v21 = vld [vmem:[#allocation4 + $0x88] sm:$0xff]  ;;  %777 = vmatprep.subr.bf16.mxu1 %v4923_v18  ;;  %v363_v60 = vld [vmem:[#allocation4 + $0x50] sm:$0xff]  ;;  %s6877_s17 = smov (!%p344_p6, %s4919_s17), 15 }
  0xaf   : > { %v373_v9 = vld [vmem:[#allocation4 + $0xa0] sm:$0xff]  ;;  %737 = vmatpush1.bf16.msra.mxu0 %v4920_v5  ;;  %v374_v22 = vld [vmem:[#allocation4 + $0xa8] sm:$0xff]  ;;  %778 = vmatpush1.bf16.msra.mxu1 %v4922_v19  ;;  %v4930_v25 = vcombine.low %v362_v14, %v366_v15  ;;  %v367_v61 = vld [vmem:[#allocation4 + $0x70] sm:$0xff]  ;;  %v6135_v62 = vpack.c.bf16 %v351_v54, %v351_v54  ;;  %s348_s10 = scalar_lea.vmem %s6830_s5, %s6877_s17 }
  0xb0   : > { %738 = vmatprep.subr.bf16.mxu0 %v4929_v7  ;;  %v4937_v12 = vcombine.high %v369_v8, %v373_v9  ;;  %v377_v16 = vld [vmem:[#allocation4 + $0xc0] sm:$0xff]  ;;  %v4936_v23 = vcombine.low %v369_v8, %v373_v9  ;;  %779 = vmatprep.subr.bf16.mxu1 %v4931_v20  ;;  %v4939_v28 = vcombine.high %v370_v21, %v374_v22  ;;  %v378_v29 = vld [vmem:[#allocation4 + $0xc8] sm:$0xff]  ;;  %v356_v63 = vld [vmem:[#allocation4 + $0x18] sm:$0xff] }
  0xb1   : > { %v381_v17 = vld [vmem:[#allocation4 + $0xe0] sm:$0xff]  ;;  %v382_v30 = vld [vmem:[#allocation4 + $0xe8] sm:$0xff]  ;;  %v4938_v33 = vcombine.low %v370_v21, %v374_v22  ;;  %v360_v1 = vld [vmem:[#allocation4 + $0x38] sm:$0xff]  ;;  %v4933_v3 = vcombine.high %v363_v60, %v367_v61 }
  0xb2   : > { %v4945_v24 = vcombine.high %v377_v16, %v381_v17  ;;  %v385_v26 = vld [vmem:[#allocation4 + $0x100] sm:$0xff]  ;;  %v4944_v31 = vcombine.low %v377_v16, %v381_v17  ;;  %v4947_v36 = vcombine.high %v378_v29, %v382_v30  ;;  %v386_v37 = vld [vmem:[#allocation4 + $0x108] sm:$0xff]  ;;  %v4946_v41 = vcombine.low %v378_v29, %v382_v30  ;;  %v371_v5 = vld [vmem:[#allocation4 + $0x90] sm:$0xff] }
  0xb3   : > { %739 = vmatpush1.bf16.msra.mxu0 %v4928_v10  ;;  %v389_v27 = vld [vmem:[#allocation4 + $0x120] sm:$0xff]  ;;  %780 = vmatpush1.bf16.msra.mxu1 %v4930_v25  ;;  %v390_v38 = vld [vmem:[#allocation4 + $0x128] sm:$0xff]  ;;  %v375_v6 = vld [vmem:[#allocation4 + $0xb0] sm:$0xff]  ;;  %v4927_v7 = vcombine.high %v356_v63, %v360_v1  ;;  %v4932_v10 = vcombine.low %v363_v60, %v367_v61 }
  0xb4   : > { %740 = vmatprep.subr.bf16.mxu0 %v4937_v12  ;;  %v4953_v32 = vcombine.high %v385_v26, %v389_v27  ;;  %v393_v34 = vld [vmem:[#allocation4 + $0x140] sm:$0xff]  ;;  %781 = vmatprep.subr.bf16.mxu1 %v4939_v28  ;;  %v4952_v39 = vcombine.low %v385_v26, %v389_v27  ;;  %v4955_v43 = vcombine.high %v386_v37, %v390_v38  ;;  %v394_v44 = vld [vmem:[#allocation4 + $0x148] sm:$0xff]  ;;  %v364_v8 = vld [vmem:[#allocation4 + $0x58] sm:$0xff] }
  0xb5   : > { %v397_v35 = vld [vmem:[#allocation4 + $0x160] sm:$0xff]  ;;  %v398_v45 = vld [vmem:[#allocation4 + $0x168] sm:$0xff]  ;;  %v4954_v49 = vcombine.low %v386_v37, %v390_v38  ;;  %v368_v9 = vld [vmem:[#allocation4 + $0x78] sm:$0xff]  ;;  %v4941_v11 = vcombine.high %v371_v5, %v375_v6  ;;  %v4926_v12 = vcombine.low %v356_v63, %v360_v1  ;;  %v4940_v18 = vcombine.low %v371_v5, %v375_v6 }
  0xb6   : > { %v4961_v40 = vcombine.high %v393_v34, %v397_v35  ;;  %v401_v42 = vld [vmem:[#allocation4 + $0x180] sm:$0x33]  ;;  %v4960_v46 = vcombine.low %v393_v34, %v397_v35  ;;  %v4963_v50 = vcombine.high %v394_v44, %v398_v45  ;;  %v402_v53 = vld [vmem:[#allocation4 + $0x188] sm:$0x33]  ;;  %v4962_v56 = vcombine.low %v394_v44, %v398_v45  ;;  %v379_v13 = vld [vmem:[#allocation4 + $0xd0] sm:$0xff] }
  0xb7   : > { %741 = vmatpush1.bf16.msra.mxu0 %v4936_v23  ;;  %782 = vmatpush1.bf16.msra.mxu1 %v4938_v33  ;;  %v4969_v47 = vcombine.high %v401_v42, %v401_v42  ;;  %v4968_v48 = vcombine.low %v401_v42, %v401_v42  ;;  %v4971_v58 = vcombine.high %v402_v53, %v402_v53  ;;  %v383_v14 = vld [vmem:[#allocation4 + $0xf0] sm:$0xff]  ;;  %v372_v16 = vld [vmem:[#allocation4 + $0x98] sm:$0xff]  ;;  %v916_v45 = vld [vmem:[%s6125_s13] sm:$0xff] }
  0xb8   : > { %742 = vmatprep.subr.bf16.mxu0 %v4945_v24  ;;  %783 = vmatprep.subr.bf16.mxu1 %v4947_v36  ;;  %v4970_v59 = vcombine.low %v402_v53, %v402_v53  ;;  %v4935_v15 = vcombine.high %v364_v8, %v368_v9  ;;  %v376_v17 = vld [vmem:[#allocation4 + $0xb8] sm:$0xff]  ;;  %v4949_v19 = vcombine.high %v379_v13, %v383_v14  ;;  %v387_v21 = vld [vmem:[#allocation4 + $0x110] sm:$0xff]  ;;  %v924_v53 = vld [vmem:[%s6125_s13 + $0x40] sm:$0xff] }
  0xb9   : > { %v713_v55 = vsel %vm711_vm0, %v4968_v48, 0  ;;  %v4934_v20 = vcombine.low %v364_v8, %v368_v9  ;;  %v391_v22 = vld [vmem:[#allocation4 + $0x130] sm:$0xff]  ;;  %v4943_v23 = vcombine.high %v372_v16, %v376_v17  ;;  %v380_v24 = vld [vmem:[#allocation4 + $0xd8] sm:$0xff]  ;;  %v4948_v26 = vcombine.low %v379_v13, %v383_v14  ;;  %v928_v54 = vld [vmem:[%s6125_s13 + $0x60] sm:$0xff] }
  0xba   : > { %v719_v4 = vsel %vm711_vm0, %v4970_v59, 0  ;;  %v384_v25 = vld [vmem:[#allocation4 + $0xf8] sm:$0xff]  ;;  %v4957_v27 = vcombine.high %v387_v21, %v391_v22  ;;  %v4942_v28 = vcombine.low %v372_v16, %v376_v17  ;;  %v395_v29 = vld [vmem:[#allocation4 + $0x150] sm:$0xff]  ;;  %v4956_v34 = vcombine.low %v387_v21, %v391_v22  ;;  %v932_v61 = vld [vmem:[%s6125_s13 + $0x80] sm:$0xff] }
  0xbb   : > { %743 = vmatpush1.bf16.msra.mxu0 %v4944_v31  ;;  %784 = vmatpush1.bf16.msra.mxu1 %v4946_v41  ;;  %v399_v30 = vld [vmem:[#allocation4 + $0x170] sm:$0xff]  ;;  %v4951_v31 = vcombine.high %v380_v24, %v384_v25  ;;  %v392_v33 = vld [vmem:[#allocation4 + $0x138] sm:$0xff]  ;;  %v936_v63 = vld [vmem:[%s6125_s13 + $0xa0] sm:$0xff] }
  0xbc   : > { %744 = vmatprep.subr.bf16.mxu0 %v4953_v32  ;;  %785 = vmatprep.subr.bf16.mxu1 %v4955_v43  ;;  %v388_v32 = vld [vmem:[#allocation4 + $0x118] sm:$0xff]  ;;  %v4965_v35 = vcombine.high %v395_v29, %v399_v30  ;;  %v403_v36 = vld [vmem:[#allocation4 + $0x190] sm:$0x33]  ;;  %v5001_v5 = vcombine.high %v932_v61, %v936_v63  ;;  %v944_v8 = vld [vmem:[%s6125_s13 + $0xe0] sm:$0xff] }
  0xbd   : > { %v4959_v37 = vcombine.high %v388_v32, %v392_v33  ;;  %v396_v38 = vld [vmem:[#allocation4 + $0x158] sm:$0xff]  ;;  %v4973_v41 = vcombine.high %v403_v36, %v403_v36  ;;  %v4972_v42 = vcombine.low %v403_v36, %v403_v36  ;;  %v4958_v43 = vcombine.low %v388_v32, %v392_v33  ;;  %v925_v1 = vld [vmem:[%s6125_s13 + $0x48] sm:$0xff]  ;;  %v952_v16 = vld [vmem:[%s6125_s13 + $0x120] sm:$0xff] }
  0xbe   : > { %v933_v9 = vld [vmem:[%s6125_s13 + $0x88] sm:$0xff]  ;;  %v956_v22 = vld [vmem:[%s6125_s13 + $0x140] sm:$0xff] }
  0xbf   : > { %745 = vmatpush1.bf16.msra.mxu0 %v4952_v39  ;;  %786 = vmatpush1.bf16.msra.mxu1 %v4954_v49  ;;  %v400_v39 = vld [vmem:[#allocation4 + $0x178] sm:$0xff]  ;;  %v725_v48 = vsel %vm711_vm0, %v4972_v42, 0  ;;  %v941_v17 = vld [vmem:[%s6125_s13 + $0xc8] sm:$0xff] }
  0xc0   : > { %746 = vmatprep.subr.bf16.mxu0 %v4961_v40  ;;  %787 = vmatprep.subr.bf16.mxu1 %v4963_v50  ;;  %v4964_v40 = vcombine.low %v395_v29, %v399_v30  ;;  %v4967_v44 = vcombine.high %v396_v38, %v400_v39  ;;  %v4966_v49 = vcombine.low %v396_v38, %v400_v39  ;;  %v964_v30 = vld [vmem:[%s6125_s13 + $0x180] sm:$0xff]  ;;  %v957_v32 = vld [vmem:[%s6125_s13 + $0x148] sm:$0xff] }
  0xc1   : > { %v961_v33 = vld [vmem:[%s6125_s13 + $0x168] sm:$0xff]  ;;  %v976_v38 = vld [vmem:[%s6125_s13 + $0x1e0] sm:$0xff] }
  0xc2   : > { %v5027_v36 = vcombine.high %v957_v32, %v961_v33  ;;  %v965_v39 = vld [vmem:[%s6125_s13 + $0x188] sm:$0xff]  ;;  %v5026_v42 = vcombine.low %v957_v32, %v961_v33 }
  0xc3   : > { %747 = vmatpush1.bf16.msra.mxu0 %v4960_v46  ;;  %788 = vmatpush1.bf16.msra.mxu1 %v4962_v56  ;;  %v920_v46 = vld [vmem:[%s6125_s13 + $0x20] sm:$0xff]  ;;  %v921_v56 = vld [vmem:[%s6125_s13 + $0x28] sm:$0xff] }
  0xc4   : > { %4976 = vmatprep.subr.msk.bf16.mxu0 %vm711_vm0, %v4969_v47  ;;  %4978 = vmatprep.subr.msk.bf16.mxu1 %vm711_vm0, %v4971_v58  ;;  %v404_v47 = vld [vmem:[#allocation4 + $0x198] sm:$0x33]  ;;  %v4985_v50 = vcombine.high %v916_v45, %v920_v46  ;;  %v4993_v58 = vcombine.high %v924_v53, %v928_v54 }
  0xc5   : > { %v4975_v51 = vcombine.high %v404_v47, %v404_v47  ;;  %v4974_v52 = vcombine.low %v404_v47, %v404_v47  ;;  %v973_v47 = vld [vmem:[%s6125_s13 + $0x1c8] sm:$0xff] }
  0xc7   : > { %749 = vmatpush1.bf16.msra.mxu0 %v713_v55  ;;  %790 = vmatpush1.bf16.msra.mxu1 %v719_v4  ;;  %v917_v55 = vld [vmem:[%s6125_s13 + $0x8] sm:$0xff]  ;;  %v731_v59 = vsel %vm711_vm0, %v4974_v52, 0 }
  0xc8   : > { %818 = vmatprep.subr.bf16.mxu0 %v4925_v57  ;;  %859 = vmatprep.subr.bf16.mxu1 %v4927_v7  ;;  %v4984_v57 = vcombine.low %v916_v45, %v920_v46  ;;  %v4987_v60 = vcombine.high %v917_v55, %v921_v56  ;;  %v4986_v4 = vcombine.low %v917_v55, %v921_v56  ;;  %v940_v7 = vld [vmem:[%s6125_s13 + $0xc0] sm:$0xff]  ;;  %v981_v55 = vld [vmem:[%s6125_s13 + $0x208] sm:$0xff] }
  0xc9   : > { %v5009_v13 = vcombine.high %v940_v7, %v944_v8  ;;  %v980_v45 = vld [vmem:[%s6125_s13 + $0x200] sm:$0xff]  ;;  %v985_v56 = vld [vmem:[%s6125_s13 + $0x228] sm:$0xff] }
  0xca   : > { %4977 = vmatmul.mubr.msk.bf16.vlgmr.msra.gmra.mrb[0].mxu0 %vm707_vm1, %v6135_v62  ;;  %4979 = vmatmul.mubr.msk.bf16.vlgmr.msra.gmra.mrb[0].mxu1 %vm707_vm1, %v6135_v62  ;;  %v984_v46 = vld [vmem:[%s6125_s13 + $0x220] sm:$0xff] }
  0xcb   : > { %819 = vmatpush1.bf16.msra.mxu0 %v4924_v2  ;;  %850 = vmatprep.mubr.bf16.mxu0 %v5877_v0  ;;  %v929_v2 = vld [vmem:[%s6125_s13 + $0x68] sm:$0xff] }
  0xcc   : > { %820 = vmatprep.subr.bf16.mxu0 %v4933_v3  ;;  %860 = vmatpush1.bf16.msra.mxu1 %v4926_v12  ;;  %v4992_v3 = vcombine.low %v924_v53, %v928_v54  ;;  %v4995_v6 = vcombine.high %v925_v1, %v929_v2  ;;  %v4994_v12 = vcombine.low %v925_v1, %v929_v2  ;;  %v988_v53 = vld [vmem:[%s6125_s13 + $0x240] sm:$0xff]  ;;  %v989_v1 = vld [vmem:[%s6125_s13 + $0x248] sm:$0xff] }
  0xcd   : > { %861 = vmatprep.subr.bf16.mxu1 %v4935_v15  ;;  %891 = vmatprep.mubr.bf16.mxu1 %v5877_v0  ;;  %v4950_v0 = vcombine.low %v380_v24, %v384_v25  ;;  %v948_v15 = vld [vmem:[%s6125_s13 + $0x100] sm:$0xff]  ;;  %v949_v24 = vld [vmem:[%s6125_s13 + $0x108] sm:$0xff] }
  0xce   : > { %v953_v25 = vld [vmem:[%s6125_s13 + $0x128] sm:$0xff]  ;;  %v992_v54 = vld [vmem:[%s6125_s13 + $0x260] sm:$0xff] }
  0xcf   : > { %821 = vmatpush1.bf16.msra.mxu0 %v4932_v10  ;;  %v937_v10 = vld [vmem:[%s6125_s13 + $0xa8] sm:$0xff]  ;;  %v5019_v29 = vcombine.high %v949_v24, %v953_v25 }
  0xd0   : > { %822 = vmatprep.subr.bf16.mxu0 %v4941_v11  ;;  %862 = vmatpush1.bf16.msra.mxu1 %v4934_v20  ;;  %v5000_v11 = vcombine.low %v932_v61, %v936_v63  ;;  %v5003_v14 = vcombine.high %v933_v9, %v937_v10  ;;  %v5017_v20 = vcombine.high %v948_v15, %v952_v16  ;;  %v996_v61 = vld [vmem:[%s6125_s13 + $0x280] sm:$0xff]  ;;  %v993_v2 = vld [vmem:[%s6125_s13 + $0x268] sm:$0xff] }
  0xd1   : > { %863 = vmatprep.subr.bf16.mxu1 %v4943_v23  ;;  %v960_v23 = vld [vmem:[%s6125_s13 + $0x160] sm:$0xff] }
  0xd2   : > { %v1000_v63 = vld [vmem:[%s6125_s13 + $0x2a0] sm:$0xff] }
  0xd3   : > { %823 = vmatpush1.bf16.msra.mxu0 %v4940_v18  ;;  %v945_v18 = vld [vmem:[%s6125_s13 + $0xe8] sm:$0xff] }
  0xd4   : > { %824 = vmatprep.subr.bf16.mxu0 %v4949_v19  ;;  %864 = vmatpush1.bf16.msra.mxu1 %v4942_v28  ;;  %v5008_v19 = vcombine.low %v940_v7, %v944_v8  ;;  %v5011_v21 = vcombine.high %v941_v17, %v945_v18  ;;  %v5025_v28 = vcombine.high %v956_v22, %v960_v23  ;;  %v1004_v7 = vld [vmem:[%s6125_s13 + $0x2c0] sm:$0xff] }
  0xd5   : > { %865 = vmatprep.subr.bf16.mxu1 %v4951_v31  ;;  %v968_v31 = vld [vmem:[%s6125_s13 + $0x1a0] sm:$0xff] }
  0xd6   : > { %v1008_v8 = vld [vmem:[%s6125_s13 + $0x2e0] sm:$0xff] }
  0xd7   : > { %825 = vmatpush1.bf16.msra.mxu0 %v4948_v26  ;;  %v5016_v26 = vcombine.low %v948_v15, %v952_v16  ;;  %v1012_v15 = vld [vmem:[%s6125_s13 + $0x300] sm:$0xff] }
  0xd8   : > { %826 = vmatprep.subr.bf16.mxu0 %v4957_v27  ;;  %866 = vmatpush1.bf16.msra.mxu1 %v4950_v0  ;;  %v5010_v27 = vcombine.low %v941_v17, %v945_v18  ;;  %v5033_v0 = vcombine.high %v964_v30, %v968_v31  ;;  %v1016_v16 = vld [vmem:[%s6125_s13 + $0x320] sm:$0xff]  ;;  %v1005_v17 = vld [vmem:[%s6125_s13 + $0x2c8] sm:$0xff] }
  0xd9   : > { %867 = vmatprep.subr.bf16.mxu1 %v4959_v37  ;;  %v972_v37 = vld [vmem:[%s6125_s13 + $0x1c0] sm:$0xff]  ;;  %v1009_v18 = vld [vmem:[%s6125_s13 + $0x2e8] sm:$0xff] }
  0xdb   : > { %827 = vmatpush1.bf16.msra.mxu0 %v4956_v34  ;;  %v5024_v34 = vcombine.low %v956_v22, %v960_v23  ;;  %v1020_v22 = vld [vmem:[%s6125_s13 + $0x340] sm:$0xff] }
  0xdc   : > { %828 = vmatprep.subr.bf16.mxu0 %v4965_v35  ;;  %868 = vmatpush1.bf16.msra.mxu1 %v4958_v43  ;;  %v5018_v35 = vcombine.low %v949_v24, %v953_v25  ;;  %v5041_v43 = vcombine.high %v972_v37, %v976_v38  ;;  %v1024_v23 = vld [vmem:[%s6125_s13 + $0x360] sm:$0xff]  ;;  %v1013_v24 = vld [vmem:[%s6125_s13 + $0x308] sm:$0xff] }
  0xdd   : > { %869 = vmatprep.subr.bf16.mxu1 %v4967_v44  ;;  %v1017_v25 = vld [vmem:[%s6125_s13 + $0x328] sm:$0xff]  ;;  %v5088_v32 = vcombine.low %v1020_v22, %v1024_v23 }
  0xde   : > { %v5082_v33 = vcombine.low %v1013_v24, %v1017_v25 }
  0xdf   : > { %829 = vmatpush1.bf16.msra.mxu0 %v4964_v40  ;;  %v969_v40 = vld [vmem:[%s6125_s13 + $0x1a8] sm:$0xff] }
  0xe0   : > { %4980 = vmatprep.subr.msk.bf16.mxu0 %vm711_vm0, %v4973_v41  ;;  %870 = vmatpush1.bf16.msra.mxu1 %v4966_v49  ;;  %v5032_v41 = vcombine.low %v964_v30, %v968_v31  ;;  %v5035_v44 = vcombine.high %v965_v39, %v969_v40  ;;  %v5040_v49 = vcombine.low %v972_v37, %v976_v38  ;;  %v1021_v30 = vld [vmem:[%s6125_s13 + $0x348] sm:$0xff] }
  0xe1   : > { %4982 = vmatprep.subr.msk.bf16.mxu1 %vm711_vm0, %v4975_v51  ;;  %v5049_v51 = vcombine.high %v980_v45, %v984_v46  ;;  %v1025_v31 = vld [vmem:[%s6125_s13 + $0x368] sm:$0xff] }
  0xe2   : > { %v1033_v38 = vld [vmem:[%s6125_s13 + $0x3a8] sm:$0xff] }
  0xe3   : > { %831 = vmatpush1.bf16.msra.mxu0 %v725_v48  ;;  %v977_v48 = vld [vmem:[%s6125_s13 + $0x1e8] sm:$0xff] }
  0xe4   : > { %4030 = vmatprep.subr.bf16.mxu0 %v4985_v50  ;;  %872 = vmatpush1.bf16.msra.mxu1 %v731_v59  ;;  %v5034_v50 = vcombine.low %v965_v39, %v969_v40  ;;  %v5043_v52 = vcombine.high %v973_v47, %v977_v48  ;;  %v5057_v59 = vcombine.high %v988_v53, %v992_v54 }
  0xe5   : > { %4194 = vmatprep.subr.bf16.mxu1 %v4987_v60  ;;  %v5051_v60 = vcombine.high %v981_v55, %v985_v56  ;;  %v5090_v39 = vcombine.low %v1021_v30, %v1025_v31 }
  0xe6   : > { %4981 = vmatmul.mubr.msk.bf16.vlgmr.msra.gmra.mrb[4].mxu0 %vm707_vm1, %v6135_v62 }
  0xe7   : > { %4031 = vmatpush1.bf16.msra.mxu0 %v4984_v57  ;;  %4983 = vmatmul.mubr.msk.bf16.vlgmr.msra.gmra.mrb[4].mxu1 %vm707_vm1, %v6135_v62  ;;  %v5002_v62 = vcombine.low %v933_v9, %v937_v10  ;;  %v5048_v57 = vcombine.low %v980_v45, %v984_v46  ;;  %v997_v9 = vld [vmem:[%s6125_s13 + $0x288] sm:$0xff] }
  0xe8   : > { %4032 = vmatprep.subr.bf16.mxu0 %v4993_v58  ;;  %4195 = vmatpush1.bf16.msra.mxu1 %v4986_v4  ;;  %v5042_v58 = vcombine.low %v973_v47, %v977_v48  ;;  %v5050_v4 = vcombine.low %v981_v55, %v985_v56  ;;  %v1001_v10 = vld [vmem:[%s6125_s13 + $0x2a8] sm:$0xff] }
  0xe9   : > { %4196 = vmatprep.subr.bf16.mxu1 %v4995_v6  ;;  %v5059_v6 = vcombine.high %v989_v1, %v993_v2  ;;  %v1041_v46 = vld [vmem:[%s6125_s13 + $0x3e8] sm:$0xff] }
  0xeb   : > { %4033 = vmatpush1.bf16.msra.mxu0 %v4992_v3  ;;  %v5056_v3 = vcombine.low %v988_v53, %v992_v54  ;;  %v1049_v54 = vld [vmem:[%s6125_s13 + $0x428] sm:$0xff] }
  0xec   : > { %4034 = vmatprep.subr.bf16.mxu0 %v5001_v5  ;;  %4197 = vmatpush1.bf16.msra.mxu1 %v4994_v12  ;;  %v5065_v5 = vcombine.high %v996_v61, %v1000_v63  ;;  %v5058_v12 = vcombine.low %v989_v1, %v993_v2 }
  0xed   : > { %4198 = vmatprep.subr.bf16.mxu1 %v5003_v14  ;;  %v5067_v14 = vcombine.high %v997_v9, %v1001_v10 }
  0xef   : > { %4035 = vmatpush1.bf16.msra.mxu0 %v5000_v11  ;;  %v5064_v11 = vcombine.low %v996_v61, %v1000_v63  ;;  %v6224_v63 = vld [vmem:[#allocation6] sm:$0xff] }
  0xf0   : > { %4036 = vmatprep.subr.bf16.mxu0 %v5009_v13  ;;  %4199 = vmatpush1.bf16.msra.mxu1 %v5002_v62  ;;  %v5073_v13 = vcombine.high %v1004_v7, %v1008_v8  ;;  %v5066_v62 = vcombine.low %v997_v9, %v1001_v10 }
  0xf1   : > { %4200 = vmatprep.subr.bf16.mxu1 %v5011_v21  ;;  %v5075_v21 = vcombine.high %v1005_v17, %v1009_v18 }
  0xf3   : > { %4037 = vmatpush1.bf16.msra.mxu0 %v5008_v19  ;;  %v5072_v19 = vcombine.low %v1004_v7, %v1008_v8 }
  0xf4   : > { %4038 = vmatprep.subr.bf16.mxu0 %v5017_v20  ;;  %4201 = vmatpush1.bf16.msra.mxu1 %v5010_v27  ;;  %v5081_v20 = vcombine.high %v1012_v15, %v1016_v16  ;;  %v5074_v27 = vcombine.low %v1005_v17, %v1009_v18  ;;  %v1057_v17 = vld [vmem:[%s6125_s13 + $0x468] sm:$0xff] }
  0xf5   : > { %4202 = vmatprep.subr.bf16.mxu1 %v5019_v29  ;;  %v5083_v29 = vcombine.high %v1013_v24, %v1017_v25 }
  0xf7   : > { %4039 = vmatpush1.bf16.msra.mxu0 %v5016_v26  ;;  %v5080_v26 = vcombine.low %v1012_v15, %v1016_v16  ;;  %v1056_v15 = vld [vmem:[%s6125_s13 + $0x460] sm:$0xff]  ;;  %v1053_v16 = vld [vmem:[%s6125_s13 + $0x448] sm:$0xff] }
  0xf8   : > { %4040 = vmatprep.subr.bf16.mxu0 %v5025_v28  ;;  %4203 = vmatpush1.bf16.msra.mxu1 %v5018_v35  ;;  %v5089_v28 = vcombine.high %v1020_v22, %v1024_v23  ;;  %v1028_v35 = vld [vmem:[%s6125_s13 + $0x380] sm:$0xff]  ;;  %v5123_v22 = vcombine.high %v1053_v16, %v1057_v17 }
  0xf9   : > { %4204 = vmatprep.subr.bf16.mxu1 %v5027_v36  ;;  %v1029_v36 = vld [vmem:[%s6125_s13 + $0x388] sm:$0xff]  ;;  %v1060_v23 = vld [vmem:[%s6125_s13 + $0x480] sm:$0xff] }
  0xfa   : > { %v5098_v47 = vcombine.low %v1029_v36, %v1033_v38 }
  0xfb   : > { %4041 = vmatpush1.bf16.msra.mxu0 %v5024_v34  ;;  %v5091_v34 = vcombine.high %v1021_v30, %v1025_v31 }
  0xfc   : > { %4042 = vmatprep.subr.bf16.mxu0 %v5033_v0  ;;  %4205 = vmatpush1.bf16.msra.mxu1 %v5026_v42  ;;  %v1032_v0 = vld [vmem:[%s6125_s13 + $0x3a0] sm:$0xff] }
  0xfd   : > { %4206 = vmatprep.subr.bf16.mxu1 %v5035_v44  ;;  %v5097_v37 = vcombine.high %v1028_v35, %v1032_v0  ;;  %v5096_v40 = vcombine.low %v1028_v35, %v1032_v0  ;;  %v1036_v42 = vld [vmem:[%s6125_s13 + $0x3c0] sm:$0xff]  ;;  %v1037_v44 = vld [vmem:[%s6125_s13 + $0x3c8] sm:$0xff] }
  0xfe   : > { %v5106_v55 = vcombine.low %v1037_v44, %v1041_v46  ;;  %v1068_v35 = vld [vmem:[%s6125_s13 + $0x4c0] sm:$0xff] }
  0xff   : > { %4043 = vmatpush1.bf16.msra.mxu0 %v5032_v41  ;;  %v5099_v41 = vcombine.high %v1029_v36, %v1033_v38  ;;  %v1072_v36 = vld [vmem:[%s6125_s13 + $0x4e0] sm:$0xff]  ;;  %v1073_v38 = vld [vmem:[%s6125_s13 + $0x4e8] sm:$0xff] }
 0x100   : > { %4044 = vmatprep.subr.bf16.mxu0 %v5041_v43  ;;  %4207 = vmatpush1.bf16.msra.mxu1 %v5034_v50  ;;  %v1040_v43 = vld [vmem:[%s6125_s13 + $0x3e0] sm:$0xff] }
 0x101   : > { %4208 = vmatprep.subr.bf16.mxu1 %v5043_v52  ;;  %v5105_v45 = vcombine.high %v1036_v42, %v1040_v43  ;;  %v5104_v48 = vcombine.low %v1036_v42, %v1040_v43  ;;  %v1044_v50 = vld [vmem:[%s6125_s13 + $0x400] sm:$0xff]  ;;  %v1045_v52 = vld [vmem:[%s6125_s13 + $0x408] sm:$0xff] }
 0x102   : > { %v1076_v43 = vld [vmem:[%s6125_s13 + $0x500] sm:$0xff] }
 0x103   : > { %4045 = vmatpush1.bf16.msra.mxu0 %v5040_v49  ;;  %v5107_v49 = vcombine.high %v1037_v44, %v1041_v46  ;;  %v1080_v44 = vld [vmem:[%s6125_s13 + $0x520] sm:$0xff]  ;;  %v1081_v46 = vld [vmem:[%s6125_s13 + $0x528] sm:$0xff] }
 0x104   : > { %4046 = vmatprep.subr.bf16.mxu0 %v5049_v51  ;;  %4209 = vmatpush1.bf16.msra.mxu1 %v5042_v58  ;;  %v1048_v51 = vld [vmem:[%s6125_s13 + $0x420] sm:$0xff]  ;;  %v5115_v58 = vcombine.high %v1045_v52, %v1049_v54 }
 0x105   : > { %4210 = vmatprep.subr.bf16.mxu1 %v5051_v60  ;;  %v5113_v53 = vcombine.high %v1044_v50, %v1048_v51  ;;  %v5112_v56 = vcombine.low %v1044_v50, %v1048_v51  ;;  %v1084_v51 = vld [vmem:[%s6125_s13 + $0x540] sm:$0xff] }
 0x107   : > { %4047 = vmatpush1.bf16.msra.mxu0 %v5048_v57  ;;  %v5114_v57 = vcombine.low %v1045_v52, %v1049_v54  ;;  %v1088_v52 = vld [vmem:[%s6125_s13 + $0x560] sm:$0xff]  ;;  %v1089_v54 = vld [vmem:[%s6125_s13 + $0x568] sm:$0xff] }
 0x108   : > { %4048 = vmatprep.subr.bf16.mxu0 %v5057_v59  ;;  %4211 = vmatpush1.bf16.msra.mxu1 %v5050_v4  ;;  %v407_v59 = vlaneseq }
 0x109   : > { %4212 = vmatprep.subr.bf16.mxu1 %v5059_v6 }
 0x10a   : > { %v6221_v60 = vshrl.u32 %v407_v59, 7  ;;  %v1092_v59 = vld [vmem:[%s6125_s13 + $0x580] sm:$0xff] }
 0x10b   : > { %4049 = vmatpush1.bf16.msra.mxu0 %v5056_v3 }
 0x10c   : > { %4050 = vmatprep.subr.bf16.mxu0 %v5065_v5  ;;  %4213 = vmatpush1.bf16.msra.mxu1 %v5058_v12  ;;  %v409_v61 = vsub.s32 0, %v6221_v60  ;;  %v413_v1 = vsub.s32 1, %v6221_v60  ;;  %v421_v4 = vsub.s32 3, %v6221_v60  ;;  %v1052_v12 = vld [vmem:[%s6125_s13 + $0x440] sm:$0xff] }
 0x10d   : > { %4214 = vmatprep.subr.bf16.mxu1 %v5067_v14  ;;  %v5120_v31 = vcombine.low %v1052_v12, %v1056_v15 }
 0x10e   : > { %v410_v2 = vrot.slane %v6224_v63, %v409_v61  ;;  %v414_v3 = vrot.slane %v6224_v63, %v413_v1 }
 0x10f   : > { %4051 = vmatpush1.bf16.msra.mxu0 %v5064_v11 }
 0x110   : > { %4052 = vmatprep.subr.bf16.mxu0 %v5073_v13  ;;  %4215 = vmatpush1.bf16.msra.mxu1 %v5066_v62  ;;  %v422_v13 = vrot.slane %v6224_v63, %v421_v4 }
 0x111   : > { %4216 = vmatprep.subr.bf16.mxu1 %v5075_v21  ;;  %v5121_v21 = vcombine.high %v1052_v12, %v1056_v15  ;;  %v1101_v12 = vld [vmem:[%s6125_s13 + $0x5c8] sm:$0xff] }
 0x113   : > { %4053 = vmatpush1.bf16.msra.mxu0 %v5072_v19 }
 0x114   : > { %4054 = vmatprep.subr.bf16.mxu0 %v5081_v20  ;;  %4217 = vmatpush1.bf16.msra.mxu1 %v5074_v27  ;;  %v1061_v27 = vld [vmem:[%s6125_s13 + $0x488] sm:$0xff] }
 0x115   : > { %4218 = vmatprep.subr.bf16.mxu1 %v5083_v29 }
 0x117   : > { %4055 = vmatpush1.bf16.msra.mxu0 %v5080_v26  ;;  %v1064_v26 = vld [vmem:[%s6125_s13 + $0x4a0] sm:$0xff] }
 0x118   : > { %4056 = vmatprep.subr.bf16.mxu0 %v5089_v28  ;;  %4219 = vmatpush1.bf16.msra.mxu1 %v5082_v33  ;;  %v1065_v28 = vld [vmem:[%s6125_s13 + $0x4a8] sm:$0xff]  ;;  %v5129_v33 = vcombine.high %v1060_v23, %v1064_v26 }
 0x119   : > { %4220 = vmatprep.subr.bf16.mxu1 %v5091_v34  ;;  %v5131_v34 = vcombine.high %v1061_v27, %v1065_v28 }
 0x11b   : > { %4057 = vmatpush1.bf16.msra.mxu0 %v5088_v32  ;;  %v5122_v32 = vcombine.low %v1053_v16, %v1057_v17 }
 0x11c   : > { %4058 = vmatprep.subr.bf16.mxu0 %v5097_v37  ;;  %4221 = vmatpush1.bf16.msra.mxu1 %v5090_v39  ;;  %v1069_v37 = vld [vmem:[%s6125_s13 + $0x4c8] sm:$0xff]  ;;  %v5128_v39 = vcombine.low %v1060_v23, %v1064_v26  ;;  %v1108_v23 = vld [vmem:[%s6125_s13 + $0x600] sm:$0xff] }
 0x11d   : > { %4222 = vmatprep.subr.bf16.mxu1 %v5099_v41  ;;  %v5137_v41 = vcombine.high %v1068_v35, %v1072_v36  ;;  %v5139_v42 = vcombine.high %v1069_v37, %v1073_v38  ;;  %v1109_v26 = vld [vmem:[%s6125_s13 + $0x608] sm:$0xff] }
 0x11f   : > { %4059 = vmatpush1.bf16.msra.mxu0 %v5096_v40  ;;  %v5130_v40 = vcombine.low %v1061_v27, %v1065_v28  ;;  %v1113_v27 = vld [vmem:[%s6125_s13 + $0x628] sm:$0xff] }
 0x120   : > { %4060 = vmatprep.subr.bf16.mxu0 %v5105_v45  ;;  %4223 = vmatpush1.bf16.msra.mxu1 %v5098_v47  ;;  %v1077_v45 = vld [vmem:[%s6125_s13 + $0x508] sm:$0xff]  ;;  %v5136_v47 = vcombine.low %v1068_v35, %v1072_v36  ;;  %v1120_v36 = vld [vmem:[%s6125_s13 + $0x660] sm:$0xff] }
 0x121   : > { %4224 = vmatprep.subr.bf16.mxu1 %v5107_v49  ;;  %v5145_v49 = vcombine.high %v1076_v43, %v1080_v44  ;;  %v5147_v50 = vcombine.high %v1077_v45, %v1081_v46 }
 0x123   : > { %4061 = vmatpush1.bf16.msra.mxu0 %v5104_v48  ;;  %v5138_v48 = vcombine.low %v1069_v37, %v1073_v38  ;;  %v1117_v37 = vld [vmem:[%s6125_s13 + $0x648] sm:$0xff] }
 0x124   : > { %4071 = vmatprep.subr.bf16.mxu0 %v5113_v53  ;;  %4225 = vmatpush1.bf16.msra.mxu1 %v5106_v55  ;;  %v1085_v53 = vld [vmem:[%s6125_s13 + $0x548] sm:$0xff]  ;;  %v5144_v55 = vcombine.low %v1076_v43, %v1080_v44  ;;  %v1124_v44 = vld [vmem:[%s6125_s13 + $0x680] sm:$0xff] }
 0x125   : > { %4235 = vmatprep.subr.bf16.mxu1 %v5115_v58  ;;  %v5155_v58 = vcombine.high %v1085_v53, %v1089_v54  ;;  %v1121_v38 = vld [vmem:[%s6125_s13 + $0x668] sm:$0xff] }
 0x126   : > { %v5187_v43 = vcombine.high %v1117_v37, %v1121_v38 }
 0x19d   : > { %v770_v5 = vpop.f32.mrb[0].mxu0  ;;  %v6241_v18 = vpop.f32.mrb[0].mxu1 }
 0x19e   : > { %v771_v6 = vadd.f32 %v770_v5, %v410_v2  ;;  %v772_v7 = vpop.f32.mrb[1].mxu0  ;;  %v813_v62 = vpop.f32.mrb[1].mxu1  ;;  %v1096_v2 = vld [vmem:[%s6125_s13 + $0x5a0] sm:$0xff]  ;;  %v1097_v5 = vld [vmem:[%s6125_s13 + $0x5a8] sm:$0xff] }
 0x19f   : > { %v773_v8 = vadd.f32 %v772_v7, %v414_v3  ;;  %v774_v9 = vpop.f32.mrb[2].mxu0  ;;  %v814_v24 = vadd.f32 %v813_v62, %v422_v13  ;;  %v815_v25 = vpop.f32.mrb[2].mxu1  ;;  %v1093_v3 = vld [vmem:[%s6125_s13 + $0x588] sm:$0xff]  ;;  %v5154_v7 = vcombine.low %v1085_v53, %v1089_v54  ;;  %v5160_v16 = vcombine.low %v1092_v59, %v1096_v2  ;;  %v1136_v53 = vld [vmem:[%s6125_s13 + $0x6e0] sm:$0xff] }
 0x1a0   : > { %v900_v10 = vmax.f32 %v771_v6, 0.0  ;;  %v775_v11 = vpop.f32.mrb[3].mxu0  ;;  %v816_v29 = vpop.f32.mrb[3].mxu1  ;;  %v5152_v6 = vcombine.low %v1084_v51, %v1088_v52  ;;  %v5163_v9 = vcombine.high %v1093_v3, %v1097_v5  ;;  %v1105_v13 = vld [vmem:[%s6125_s13 + $0x5e8] sm:$0xff]  ;;  %v5162_v17 = vcombine.low %v1093_v3, %v1097_v5  ;;  %v1112_v25 = vld [vmem:[%s6125_s13 + $0x620] sm:$0xff] }
 0x1a1   : > { %v901_v14 = vmax.f32 %v773_v8, 0.0  ;;  %v903_v30 = vmax.f32 %v814_v24, 0.0  ;;  %v5161_v8 = vcombine.high %v1092_v59, %v1096_v2  ;;  %v1104_v11 = vld [vmem:[%s6125_s13 + $0x5e0] sm:$0xff]  ;;  %v1133_v54 = vld [vmem:[%s6125_s13 + $0x6c8] sm:$0xff] }
 0x1a2   : > { %v6245_v20 = vpack.c.bf16 %v900_v10, %v900_v10  ;;  %v1100_v10 = vld [vmem:[%s6125_s13 + $0x5c0] sm:$0xff]  ;;  %v1141_v5 = vld [vmem:[%s6125_s13 + $0x708] sm:$0xff] }
 0x1a3   : > { %v6243_v19 = vpack.c.bf16 %v901_v14, %v901_v14  ;;  %v6256_v0 = vpack.c.bf16 %v903_v30, %v903_v30  ;;  %v5168_v29 = vcombine.low %v1100_v10, %v1104_v11  ;;  %v5170_v30 = vcombine.low %v1101_v12, %v1105_v13  ;;  %v1140_v2 = vld [vmem:[%s6125_s13 + $0x700] sm:$0xff] }
 0x1a4   : > { %v1144_v3 = vld [vmem:[%s6125_s13 + $0x720] sm:$0xff] }
 0x1a5   : > { %4062 = vmatprep.mubr.bf16.mxu0 %v6243_v19  ;;  %4226 = vmatprep.mubr.bf16.mxu1 %v6243_v19 }
 0x1a6   : > { %4063 = vmatmul.mubr.bf16.vlgmr.msra.gmra.mrb[8].mxu0 %v6245_v20  ;;  %4227 = vmatmul.mubr.bf16.vlgmr.msra.gmra.mrb[8].mxu1 %v6245_v20 }
 0x1a7   : > { %4072 = vmatpush1.bf16.msra.mxu0 %v5112_v56  ;;  %4236 = vmatpush1.bf16.msra.mxu1 %v5114_v57  ;;  %v5146_v56 = vcombine.low %v1077_v45, %v1081_v46  ;;  %v5153_v57 = vcombine.high %v1084_v51, %v1088_v52  ;;  %v1128_v45 = vld [vmem:[%s6125_s13 + $0x6a0] sm:$0xff]  ;;  %v1125_v46 = vld [vmem:[%s6125_s13 + $0x688] sm:$0xff] }
 0x1a8   : > { %4073 = vmatprep.subr.bf16.mxu0 %v5121_v21  ;;  %4237 = vmatprep.subr.bf16.mxu1 %v5123_v22  ;;  %v5169_v21 = vcombine.high %v1100_v10, %v1104_v11  ;;  %v5171_v22 = vcombine.high %v1101_v12, %v1105_v13  ;;  %v1132_v52 = vld [vmem:[%s6125_s13 + $0x6c0] sm:$0xff]  ;;  %v1149_v13 = vld [vmem:[%s6125_s13 + $0x748] sm:$0xff] }
 0x1a9   : > { %4103 = vmatprep.mubr.bf16.mxu0 %v6256_v0  ;;  %4267 = vmatprep.mubr.bf16.mxu1 %v6256_v0  ;;  %v1148_v11 = vld [vmem:[%s6125_s13 + $0x740] sm:$0xff] }
 0x1aa   : > { %v1152_v12 = vld [vmem:[%s6125_s13 + $0x760] sm:$0xff] }
 0x1ab   : > { %4074 = vmatpush1.bf16.msra.mxu0 %v5120_v31  ;;  %4238 = vmatpush1.bf16.msra.mxu1 %v5122_v32  ;;  %v5177_v32 = vcombine.high %v1108_v23, %v1112_v25 }
 0x1ac   : > { %4075 = vmatprep.subr.bf16.mxu0 %v5129_v33  ;;  %4239 = vmatprep.subr.bf16.mxu1 %v5131_v34  ;;  %v5179_v33 = vcombine.high %v1109_v26, %v1113_v27  ;;  %v1116_v34 = vld [vmem:[%s6125_s13 + $0x640] sm:$0xff] }
 0x1af   : > { %4076 = vmatpush1.bf16.msra.mxu0 %v5128_v39  ;;  %4240 = vmatpush1.bf16.msra.mxu1 %v5130_v40  ;;  %v5176_v40 = vcombine.low %v1108_v23, %v1112_v25  ;;  %v1160_v25 = vld [vmem:[%s6125_s13 + $0x7a0] sm:$0xff] }
 0x1b0   : > { %4077 = vmatprep.subr.bf16.mxu0 %v5137_v41  ;;  %4241 = vmatprep.subr.bf16.mxu1 %v5139_v42  ;;  %v5178_v41 = vcombine.low %v1109_v26, %v1113_v27  ;;  %v5185_v42 = vcombine.high %v1116_v34, %v1120_v36  ;;  %v1157_v26 = vld [vmem:[%s6125_s13 + $0x788] sm:$0xff] }
 0x1b1   : > { %v1161_v27 = vld [vmem:[%s6125_s13 + $0x7a8] sm:$0xff] }
 0x1b3   : > { %4078 = vmatpush1.bf16.msra.mxu0 %v5136_v47  ;;  %4242 = vmatpush1.bf16.msra.mxu1 %v5138_v48  ;;  %v1129_v47 = vld [vmem:[%s6125_s13 + $0x6a8] sm:$0xff]  ;;  %v5184_v48 = vcombine.low %v1116_v34, %v1120_v36  ;;  %v1164_v36 = vld [vmem:[%s6125_s13 + $0x7c0] sm:$0xff] }
 0x1b4   : > { %4079 = vmatprep.subr.bf16.mxu0 %v5145_v49  ;;  %4243 = vmatprep.subr.bf16.mxu1 %v5147_v50  ;;  %v5186_v49 = vcombine.low %v1117_v37, %v1121_v38  ;;  %v5193_v50 = vcombine.high %v1124_v44, %v1128_v45  ;;  %v5195_v51 = vcombine.high %v1125_v46, %v1129_v47  ;;  %v1168_v37 = vld [vmem:[%s6125_s13 + $0x7e0] sm:$0xff]  ;;  %v1165_v38 = vld [vmem:[%s6125_s13 + $0x7c8] sm:$0xff] }
 0x1b7   : > { %4080 = vmatpush1.bf16.msra.mxu0 %v5144_v55  ;;  %4244 = vmatpush1.bf16.msra.mxu1 %v5146_v56  ;;  %v1137_v55 = vld [vmem:[%s6125_s13 + $0x6e8] sm:$0xff]  ;;  %v5192_v56 = vcombine.low %v1124_v44, %v1128_v45  ;;  %v5233_v44 = vcombine.high %v1164_v36, %v1168_v37 }
 0x1b8   : > { %4081 = vmatprep.subr.bf16.mxu0 %v5153_v57  ;;  %4245 = vmatprep.subr.bf16.mxu1 %v5155_v58  ;;  %v5194_v57 = vcombine.low %v1125_v46, %v1129_v47  ;;  %v5201_v58 = vcombine.high %v1132_v52, %v1136_v53  ;;  %v5203_v59 = vcombine.high %v1133_v54, %v1137_v55  ;;  %v1172_v46 = vld [vmem:[%s6125_s13 + $0x800] sm:$0xff] }
 0x1b9   : > { %v6279_v14 = vpop.f32.mrb[4].mxu0  ;;  %v1176_v47 = vld [vmem:[%s6125_s13 + $0x820] sm:$0xff] }
 0x1ba   : > { %v6281_v15 = vpop.f32.mrb[5].mxu0  ;;  %v6287_v28 = vpop.f32.mrb[4].mxu1 }
 0x1bb   : > { %4082 = vmatpush1.bf16.msra.mxu0 %v5152_v6  ;;  %4246 = vmatpush1.bf16.msra.mxu1 %v5154_v7  ;;  %v856_v62 = vpop.f32.mrb[6].mxu0  ;;  %v6289_v31 = vpop.f32.mrb[5].mxu1  ;;  %v1145_v6 = vld [vmem:[%s6125_s13 + $0x728] sm:$0xff]  ;;  %v5200_v7 = vcombine.low %v1132_v52, %v1136_v53  ;;  %v5241_v53 = vcombine.high %v1172_v46, %v1176_v47 }
 0x1bc   : > { %4083 = vmatprep.subr.bf16.mxu0 %v5161_v8  ;;  %4247 = vmatprep.subr.bf16.mxu1 %v5163_v9  ;;  %v857_v24 = vpop.f32.mrb[7].mxu0  ;;  %v897_v35 = vpop.f32.mrb[6].mxu1  ;;  %v5202_v8 = vcombine.low %v1133_v54, %v1137_v55  ;;  %v5209_v9 = vcombine.high %v1140_v2, %v1144_v3  ;;  %v5211_v10 = vcombine.high %v1141_v5, %v1145_v6  ;;  %v1180_v55 = vld [vmem:[%s6125_s13 + $0x840] sm:$0xff] }
 0x1bd   : > { %v898_v39 = vpop.f32.mrb[7].mxu1  ;;  %v5208_v62 = vcombine.low %v1140_v2, %v1144_v3  ;;  %v1156_v24 = vld [vmem:[%s6125_s13 + $0x780] sm:$0xff]  ;;  %v5227_v35 = vcombine.high %v1157_v26, %v1161_v27 }
 0x1be   : > { %v5225_v34 = vcombine.high %v1156_v24, %v1160_v25  ;;  %v1169_v39 = vld [vmem:[%s6125_s13 + $0x7e8] sm:$0xff] }
 0x1bf   : > { %4084 = vmatpush1.bf16.msra.mxu0 %v5160_v16  ;;  %4248 = vmatpush1.bf16.msra.mxu1 %v5162_v17  ;;  %v1153_v16 = vld [vmem:[%s6125_s13 + $0x768] sm:$0xff]  ;;  %v417_v17 = vsub.s32 2, %v6221_v60  ;;  %v5235_v45 = vcombine.high %v1165_v38, %v1169_v39  ;;  %v5234_v52 = vcombine.low %v1165_v38, %v1169_v39 }
 0x1c0   : > { %4085 = vmatprep.subr.bf16.mxu0 %v5169_v21  ;;  %4249 = vmatprep.subr.bf16.mxu1 %v5171_v22  ;;  %v5210_v21 = vcombine.low %v1141_v5, %v1145_v6  ;;  %v5217_v22 = vcombine.high %v1148_v11, %v1152_v12  ;;  %v5219_v23 = vcombine.high %v1149_v13, %v1153_v16 }
 0x1c3   : > { %4086 = vmatpush1.bf16.msra.mxu0 %v5168_v29  ;;  %4250 = vmatpush1.bf16.msra.mxu1 %v5170_v30  ;;  %v429_v29 = vsub.s32 5, %v6221_v60  ;;  %v418_v30 = vrot.slane %v6224_v63, %v417_v17 }
 0x1c4   : > { %4087 = vmatprep.subr.bf16.mxu0 %v5177_v32  ;;  %4251 = vmatprep.subr.bf16.mxu1 %v5179_v33  ;;  %v5216_v32 = vcombine.low %v1148_v11, %v1152_v12  ;;  %v5218_v33 = vcombine.low %v1149_v13, %v1153_v16 }
 0x1c7   : > { %4088 = vmatpush1.bf16.msra.mxu0 %v5176_v40  ;;  %4252 = vmatpush1.bf16.msra.mxu1 %v5178_v41  ;;  %v430_v40 = vrot.slane %v6224_v63, %v429_v29  ;;  %v812_v41 = vadd.f32 %v6241_v18, %v418_v30  ;;  %v5232_v18 = vcombine.low %v1164_v36, %v1168_v37 }
 0x1c8   : > { %4089 = vmatprep.subr.bf16.mxu0 %v5185_v42  ;;  %4253 = vmatprep.subr.bf16.mxu1 %v5187_v43  ;;  %v5224_v42 = vcombine.low %v1156_v24, %v1160_v25  ;;  %v5226_v43 = vcombine.low %v1157_v26, %v1161_v27  ;;  %v1201_v24 = vld [vmem:[%s6125_s13 + $0x8e8] sm:$0xff] }
 0x1cb   : > { %4090 = vmatpush1.bf16.msra.mxu0 %v5184_v48  ;;  %4254 = vmatpush1.bf16.msra.mxu1 %v5186_v49  ;;  %v1173_v48 = vld [vmem:[%s6125_s13 + $0x808] sm:$0xff] }
 0x1cc   : > { %4091 = vmatprep.subr.bf16.mxu0 %v5193_v50  ;;  %4255 = vmatprep.subr.bf16.mxu1 %v5195_v51  ;;  %v1177_v49 = vld [vmem:[%s6125_s13 + $0x828] sm:$0xff]  ;;  %v855_v50 = vadd.f32 %v6281_v15, %v430_v40  ;;  %v902_v51 = vmax.f32 %v812_v41, 0.0  ;;  %v5240_v15 = vcombine.low %v1172_v46, %v1176_v47  ;;  %v1212_v40 = vld [vmem:[%s6125_s13 + $0x940] sm:$0xff] }
 0x1cd   : > { %v5243_v54 = vcombine.high %v1173_v48, %v1177_v49  ;;  %v5242_v3 = vcombine.low %v1173_v48, %v1177_v49  ;;  %v1216_v41 = vld [vmem:[%s6125_s13 + $0x960] sm:$0xff] }
 0x1ce   : > { %v6337_v2 = vpack.c.bf16 %v902_v51, %v902_v51  ;;  %v5281_v46 = vcombine.high %v1212_v40, %v1216_v41  ;;  %v1220_v48 = vld [vmem:[%s6125_s13 + $0x980] sm:$0xff]  ;;  %v1225_v51 = vld [vmem:[%s6125_s13 + $0x9a8] sm:$0xff] }
 0x1cf   : > { %4092 = vmatpush1.bf16.msra.mxu0 %v5192_v56  ;;  %4256 = vmatpush1.bf16.msra.mxu1 %v5194_v57  ;;  %v1184_v56 = vld [vmem:[%s6125_s13 + $0x860] sm:$0xff]  ;;  %v1181_v57 = vld [vmem:[%s6125_s13 + $0x848] sm:$0xff] }
 0x1d0   : > { %4093 = vmatprep.subr.bf16.mxu0 %v5201_v58  ;;  %4257 = vmatprep.subr.bf16.mxu1 %v5203_v59  ;;  %v1185_v58 = vld [vmem:[%s6125_s13 + $0x868] sm:$0xff]  ;;  %v905_v59 = vmax.f32 %v855_v50, 0.0  ;;  %v5249_v5 = vcombine.high %v1180_v55, %v1184_v56  ;;  %v5248_v12 = vcombine.low %v1180_v55, %v1184_v56  ;;  %v1224_v49 = vld [vmem:[%s6125_s13 + $0x9a0] sm:$0xff] }
 0x1d1   : > { %v5251_v6 = vcombine.high %v1181_v57, %v1185_v58  ;;  %v5250_v13 = vcombine.low %v1181_v57, %v1185_v58  ;;  %v1221_v50 = vld [vmem:[%s6125_s13 + $0x988] sm:$0xff]  ;;  %v1228_v55 = vld [vmem:[%s6125_s13 + $0x9c0] sm:$0xff] }
 0x1d2   : > { %v6343_v11 = vpack.c.bf16 %v905_v59, %v905_v59  ;;  %v1232_v56 = vld [vmem:[%s6125_s13 + $0x9e0] sm:$0xff]  ;;  %v1229_v57 = vld [vmem:[%s6125_s13 + $0x9c8] sm:$0xff]  ;;  %v5288_v59 = vcombine.low %v1220_v48, %v1224_v49 }
 0x1d3   : > { %4094 = vmatpush1.bf16.msra.mxu0 %v5200_v7  ;;  %4258 = vmatpush1.bf16.msra.mxu1 %v5202_v8  ;;  %v1188_v7 = vld [vmem:[%s6125_s13 + $0x880] sm:$0xff]  ;;  %v1233_v58 = vld [vmem:[%s6125_s13 + $0x9e8] sm:$0xff] }
 0x1d4   : > { %4095 = vmatprep.subr.bf16.mxu0 %v5209_v9  ;;  %4259 = vmatprep.subr.bf16.mxu1 %v5211_v10  ;;  %v1192_v8 = vld [vmem:[%s6125_s13 + $0x8a0] sm:$0xff]  ;;  %v1189_v9 = vld [vmem:[%s6125_s13 + $0x888] sm:$0xff] }
 0x1d5   : > { %v1193_v10 = vld [vmem:[%s6125_s13 + $0x8a8] sm:$0xff]  ;;  %v5257_v16 = vcombine.high %v1188_v7, %v1192_v8  ;;  %v5256_v25 = vcombine.low %v1188_v7, %v1192_v8  ;;  %v1240_v7 = vld [vmem:[%s6125_s13 + $0xa20] sm:$0xff] }
 0x1d6   : > { %v5258_v26 = vcombine.low %v1189_v9, %v1193_v10  ;;  %v1237_v8 = vld [vmem:[%s6125_s13 + $0xa08] sm:$0xff] }
 0x1d7   : > { %4096 = vmatpush1.bf16.msra.mxu0 %v5208_v62  ;;  %4260 = vmatpush1.bf16.msra.mxu1 %v5210_v21  ;;  %v5259_v62 = vcombine.high %v1189_v9, %v1193_v10  ;;  %v1196_v21 = vld [vmem:[%s6125_s13 + $0x8c0] sm:$0xff]  ;;  %v1241_v9 = vld [vmem:[%s6125_s13 + $0xa28] sm:$0xff]  ;;  %v5296_v10 = vcombine.low %v1228_v55, %v1232_v56 }
 0x1d8   : > { %4097 = vmatprep.subr.bf16.mxu0 %v5217_v22  ;;  %4261 = vmatprep.subr.bf16.mxu1 %v5219_v23  ;;  %v1200_v22 = vld [vmem:[%s6125_s13 + $0x8e0] sm:$0xff]  ;;  %v1197_v23 = vld [vmem:[%s6125_s13 + $0x8c8] sm:$0xff] }
 0x1d9   : > { %v5265_v27 = vcombine.high %v1196_v21, %v1200_v22  ;;  %v5267_v30 = vcombine.high %v1197_v23, %v1201_v24  ;;  %v5264_v36 = vcombine.low %v1196_v21, %v1200_v22  ;;  %v5266_v37 = vcombine.low %v1197_v23, %v1201_v24  ;;  %v1248_v21 = vld [vmem:[%s6125_s13 + $0xa60] sm:$0xff]  ;;  %v1245_v22 = vld [vmem:[%s6125_s13 + $0xa48] sm:$0xff] }
 0x1da   : > { %v1249_v23 = vld [vmem:[%s6125_s13 + $0xa68] sm:$0xff] }
 0x1db   : > { %4098 = vmatpush1.bf16.msra.mxu0 %v5216_v32  ;;  %4262 = vmatpush1.bf16.msra.mxu1 %v5218_v33  ;;  %v1204_v32 = vld [vmem:[%s6125_s13 + $0x900] sm:$0xff] }
 0x1dc   : > { %4099 = vmatprep.subr.bf16.mxu0 %v5225_v34  ;;  %4263 = vmatprep.subr.bf16.mxu1 %v5227_v35  ;;  %v1208_v33 = vld [vmem:[%s6125_s13 + $0x920] sm:$0xff]  ;;  %v1205_v34 = vld [vmem:[%s6125_s13 + $0x908] sm:$0xff] }
 0x1dd   : > { %v1209_v35 = vld [vmem:[%s6125_s13 + $0x928] sm:$0xff]  ;;  %v5273_v38 = vcombine.high %v1204_v32, %v1208_v33 }
 0x1de   : > { %v5275_v39 = vcombine.high %v1205_v34, %v1209_v35 }
 0x1df   : > { %4100 = vmatpush1.bf16.msra.mxu0 %v5224_v42  ;;  %4264 = vmatpush1.bf16.msra.mxu1 %v5226_v43  ;;  %v1213_v42 = vld [vmem:[%s6125_s13 + $0x948] sm:$0xff] }
 0x1e0   : > { %4101 = vmatprep.subr.bf16.mxu0 %v5233_v44  ;;  %4265 = vmatprep.subr.bf16.mxu1 %v5235_v45  ;;  %v1217_v43 = vld [vmem:[%s6125_s13 + $0x968] sm:$0xff]  ;;  %v5272_v44 = vcombine.low %v1204_v32, %v1208_v33  ;;  %v5274_v45 = vcombine.low %v1205_v34, %v1209_v35  ;;  %v1256_v32 = vld [vmem:[%s6125_s13 + $0xaa0] sm:$0xff] }
 0x1e1   : > { %v5283_v47 = vcombine.high %v1213_v42, %v1217_v43  ;;  %v1253_v33 = vld [vmem:[%s6125_s13 + $0xa88] sm:$0xff] }
 0x1e2   : > { %v1257_v34 = vld [vmem:[%s6125_s13 + $0xaa8] sm:$0xff] }
 0x1e3   : > { %4102 = vmatpush1.bf16.msra.mxu0 %v5232_v18  ;;  %4266 = vmatpush1.bf16.msra.mxu1 %v5234_v52  ;;  %v5280_v18 = vcombine.low %v1212_v40, %v1216_v41  ;;  %v5282_v52 = vcombine.low %v1213_v42, %v1217_v43  ;;  %v1264_v40 = vld [vmem:[%s6125_s13 + $0xae0] sm:$0xff]  ;;  %v1261_v41 = vld [vmem:[%s6125_s13 + $0xac8] sm:$0xff] }
 0x1e4   : > { %4112 = vmatprep.subr.bf16.mxu0 %v5241_v53  ;;  %4276 = vmatprep.subr.bf16.mxu1 %v5243_v54  ;;  %v5289_v53 = vcombine.high %v1220_v48, %v1224_v49  ;;  %v5291_v54 = vcombine.high %v1221_v50, %v1225_v51  ;;  %v1265_v42 = vld [vmem:[%s6125_s13 + $0xae8] sm:$0xff]  ;;  %v1272_v48 = vld [vmem:[%s6125_s13 + $0xb20] sm:$0xff] }
 0x1e5   : > { %v1269_v49 = vld [vmem:[%s6125_s13 + $0xb08] sm:$0xff] }
 0x1e6   : > { %4104 = vmatmul.mubr.bf16.vlgmr.msra.gmra.mrb[8].mxu0 %v6337_v2  ;;  %4268 = vmatmul.mubr.bf16.vlgmr.msra.gmra.mrb[8].mxu1 %v6337_v2 }
 0x1e7   : > { %4113 = vmatpush1.bf16.msra.mxu0 %v5240_v15  ;;  %4277 = vmatpush1.bf16.msra.mxu1 %v5242_v3  ;;  %v5290_v15 = vcombine.low %v1221_v50, %v1225_v51  ;;  %v5297_v3 = vcombine.high %v1228_v55, %v1232_v56  ;;  %v1273_v50 = vld [vmem:[%s6125_s13 + $0xb28] sm:$0xff]  ;;  %v1280_v55 = vld [vmem:[%s6125_s13 + $0xb60] sm:$0xff] }
 0x1e8   : > { %4114 = vmatprep.subr.bf16.mxu0 %v5249_v5  ;;  %4278 = vmatprep.subr.bf16.mxu1 %v5251_v6  ;;  %v5299_v5 = vcombine.high %v1229_v57, %v1233_v58  ;;  %v1236_v6 = vld [vmem:[%s6125_s13 + $0xa00] sm:$0xff]  ;;  %v1277_v56 = vld [vmem:[%s6125_s13 + $0xb48] sm:$0xff] }
 0x1e9   : > { %4144 = vmatprep.mubr.bf16.mxu0 %v6343_v11  ;;  %4308 = vmatprep.mubr.bf16.mxu1 %v6343_v11  ;;  %v5304_v24 = vcombine.low %v1236_v6, %v1240_v7 }
 0x1eb   : > { %4115 = vmatpush1.bf16.msra.mxu0 %v5248_v12  ;;  %4279 = vmatpush1.bf16.msra.mxu1 %v5250_v13  ;;  %v5298_v12 = vcombine.low %v1229_v57, %v1233_v58  ;;  %v5305_v13 = vcombine.high %v1236_v6, %v1240_v7  ;;  %v1281_v57 = vld [vmem:[%s6125_s13 + $0xb68] sm:$0xff]  ;;  %v425_v58 = vsub.s32 4, %v6221_v60  ;;  %v1284_v6 = vld [vmem:[%s6125_s13 + $0xb80] sm:$0xff] }
 0x1ec   : > { %4116 = vmatprep.subr.bf16.mxu0 %v5257_v16  ;;  %4280 = vmatprep.subr.bf16.mxu1 %v5259_v62  ;;  %v5307_v16 = vcombine.high %v1237_v8, %v1241_v9  ;;  %v1244_v62 = vld [vmem:[%s6125_s13 + $0xa40] sm:$0xff] }
 0x1ed   : > { %v5312_v35 = vcombine.low %v1244_v62, %v1248_v21  ;;  %v1288_v7 = vld [vmem:[%s6125_s13 + $0xba0] sm:$0xff] }
 0x1ef   : > { %4117 = vmatpush1.bf16.msra.mxu0 %v5256_v25  ;;  %4281 = vmatpush1.bf16.msra.mxu1 %v5258_v26  ;;  %v5306_v25 = vcombine.low %v1237_v8, %v1241_v9  ;;  %v5313_v26 = vcombine.high %v1244_v62, %v1248_v21  ;;  %v1285_v8 = vld [vmem:[%s6125_s13 + $0xb88] sm:$0xff]  ;;  %v5353_v62 = vcombine.high %v1284_v6, %v1288_v7 }
 0x1f0   : > { %4118 = vmatprep.subr.bf16.mxu0 %v5265_v27  ;;  %4282 = vmatprep.subr.bf16.mxu1 %v5267_v30  ;;  %v5315_v27 = vcombine.high %v1245_v22, %v1249_v23  ;;  %v1252_v30 = vld [vmem:[%s6125_s13 + $0xa80] sm:$0xff]  ;;  %v1289_v9 = vld [vmem:[%s6125_s13 + $0xba8] sm:$0xff] }
 0x1f1   : > { %v5320_v43 = vcombine.low %v1252_v30, %v1256_v32  ;;  %v5355_v21 = vcombine.high %v1285_v8, %v1289_v9 }
 0x1f3   : > { %4119 = vmatpush1.bf16.msra.mxu0 %v5264_v36  ;;  %4283 = vmatpush1.bf16.msra.mxu1 %v5266_v37  ;;  %v5314_v36 = vcombine.low %v1245_v22, %v1249_v23  ;;  %v5321_v37 = vcombine.high %v1252_v30, %v1256_v32  ;;  %v1292_v22 = vld [vmem:[%s6125_s13 + $0xbc0] sm:$0xff]  ;;  %v5352_v30 = vcombine.low %v1284_v6, %v1288_v7  ;;  %v1325_v6 = vld [vmem:[%s6125_s13 + $0xcc8] sm:$0xff] }
 0x1f4   : > { %4120 = vmatprep.subr.bf16.mxu0 %v5273_v38  ;;  %4284 = vmatprep.subr.bf16.mxu1 %v5275_v39  ;;  %v5323_v38 = vcombine.high %v1253_v33, %v1257_v34  ;;  %v1260_v39 = vld [vmem:[%s6125_s13 + $0xac0] sm:$0xff]  ;;  %v5354_v32 = vcombine.low %v1285_v8, %v1289_v9  ;;  %v1329_v7 = vld [vmem:[%s6125_s13 + $0xce8] sm:$0xff] }
 0x1f5   : > { %v5328_v51 = vcombine.low %v1260_v39, %v1264_v40  ;;  %v1296_v23 = vld [vmem:[%s6125_s13 + $0xbe0] sm:$0xff] }
 0x1f7   : > { %4121 = vmatpush1.bf16.msra.mxu0 %v5272_v44  ;;  %4285 = vmatpush1.bf16.msra.mxu1 %v5274_v45  ;;  %v5322_v44 = vcombine.low %v1253_v33, %v1257_v34  ;;  %v5329_v45 = vcombine.high %v1260_v39, %v1264_v40  ;;  %v5361_v33 = vcombine.high %v1292_v22, %v1296_v23 }
 0x1f8   : > { %4122 = vmatprep.subr.bf16.mxu0 %v5281_v46  ;;  %4286 = vmatprep.subr.bf16.mxu1 %v5283_v47  ;;  %v5331_v46 = vcombine.high %v1261_v41, %v1265_v42  ;;  %v1268_v47 = vld [vmem:[%s6125_s13 + $0xb00] sm:$0xff] }
 0x1fb   : > { %4123 = vmatpush1.bf16.msra.mxu0 %v5280_v18  ;;  %4287 = vmatpush1.bf16.msra.mxu1 %v5282_v52  ;;  %v5330_v18 = vcombine.low %v1261_v41, %v1265_v42  ;;  %v5337_v52 = vcombine.high %v1268_v47, %v1272_v48 }
 0x1fc   : > { %4124 = vmatprep.subr.bf16.mxu0 %v5289_v53  ;;  %4288 = vmatprep.subr.bf16.mxu1 %v5291_v54  ;;  %v5339_v53 = vcombine.high %v1269_v49, %v1273_v50  ;;  %v1276_v54 = vld [vmem:[%s6125_s13 + $0xb40] sm:$0xff] }
 0x1ff   : > { %4125 = vmatpush1.bf16.msra.mxu0 %v5288_v59  ;;  %4289 = vmatpush1.bf16.msra.mxu1 %v5290_v15  ;;  %v5336_v59 = vcombine.low %v1268_v47, %v1272_v48  ;;  %v5338_v15 = vcombine.low %v1269_v49, %v1273_v50 }
 0x200   : > { %4126 = vmatprep.subr.bf16.mxu0 %v5297_v3  ;;  %4290 = vmatprep.subr.bf16.mxu1 %v5299_v5  ;;  %v5345_v3 = vcombine.high %v1276_v54, %v1280_v55  ;;  %v5347_v5 = vcombine.high %v1277_v56, %v1281_v57 }
 0x203   : > { %4127 = vmatpush1.bf16.msra.mxu0 %v5296_v10  ;;  %4291 = vmatpush1.bf16.msra.mxu1 %v5298_v12  ;;  %v437_v10 = vsub.s32 7, %v6221_v60  ;;  %v426_v12 = vrot.slane %v6224_v63, %v425_v58 }
 0x204   : > { %4128 = vmatprep.subr.bf16.mxu0 %v5305_v13  ;;  %4292 = vmatprep.subr.bf16.mxu1 %v5307_v16  ;;  %v5344_v13 = vcombine.low %v1276_v54, %v1280_v55  ;;  %v5346_v16 = vcombine.low %v1277_v56, %v1281_v57  ;;  %v1321_v54 = vld [vmem:[%s6125_s13 + $0xca8] sm:$0xff] }
 0x207   : > { %4129 = vmatpush1.bf16.msra.mxu0 %v5304_v24  ;;  %4293 = vmatpush1.bf16.msra.mxu1 %v5306_v25  ;;  %v1293_v24 = vld [vmem:[%s6125_s13 + $0xbc8] sm:$0xff] }
 0x208   : > { %4130 = vmatprep.subr.bf16.mxu0 %v5313_v26  ;;  %4294 = vmatprep.subr.bf16.mxu1 %v5315_v27  ;;  %v1297_v25 = vld [vmem:[%s6125_s13 + $0xbe8] sm:$0xff]  ;;  %v438_v26 = vrot.slane %v6224_v63, %v437_v10  ;;  %v853_v27 = vadd.f32 %v6279_v14, %v426_v12  ;;  %v5360_v14 = vcombine.low %v1292_v22, %v1296_v23 }
 0x209   : > { %v5363_v34 = vcombine.high %v1293_v24, %v1297_v25  ;;  %v5362_v40 = vcombine.low %v1293_v24, %v1297_v25  ;;  %v1337_v22 = vld [vmem:[%s6125_s13 + $0xd28] sm:$0xff]  ;;  %v5394_v24 = vcombine.low %v1325_v6, %v1329_v7 }
 0x20a   : > { %v896_v63 = vadd.f32 %v6289_v31, %v438_v26  ;;  %v904_v39 = vmax.f32 %v853_v27, 0.0  ;;  %v1340_v27 = vld [vmem:[%s6125_s13 + $0xd40] sm:$0xff] }
 0x20b   : > { %4131 = vmatpush1.bf16.msra.mxu0 %v5312_v35  ;;  %4295 = vmatpush1.bf16.msra.mxu1 %v5314_v36  ;;  %v1300_v35 = vld [vmem:[%s6125_s13 + $0xc00] sm:$0xff] }
 0x20c   : > { %4132 = vmatprep.subr.bf16.mxu0 %v5321_v37  ;;  %4296 = vmatprep.subr.bf16.mxu1 %v5323_v38  ;;  %v1304_v36 = vld [vmem:[%s6125_s13 + $0xc20] sm:$0xff]  ;;  %v1301_v37 = vld [vmem:[%s6125_s13 + $0xc08] sm:$0xff]  ;;  %v907_v47 = vmax.f32 %v896_v63, 0.0  ;;  %v6419_v48 = vpack.c.bf16 %v904_v39, %v904_v39 }
 0x20d   : > { %v1305_v38 = vld [vmem:[%s6125_s13 + $0xc28] sm:$0xff]  ;;  %v5369_v41 = vcombine.high %v1300_v35, %v1304_v36  ;;  %v5368_v31 = vcombine.low %v1300_v35, %v1304_v36  ;;  %v1352_v63 = vld [vmem:[%s6125_s13 + $0xda0] sm:$0xff] }
 0x20e   : > { %v5371_v42 = vcombine.high %v1301_v37, %v1305_v38  ;;  %v5370_v49 = vcombine.low %v1301_v37, %v1305_v38  ;;  %v6425_v55 = vpack.c.bf16 %v907_v47, %v907_v47  ;;  %v1348_v38 = vld [vmem:[%s6125_s13 + $0xd80] sm:$0xff]  ;;  %v1349_v39 = vld [vmem:[%s6125_s13 + $0xd88] sm:$0xff] }
 0x20f   : > { %4133 = vmatpush1.bf16.msra.mxu0 %v5320_v43  ;;  %4297 = vmatpush1.bf16.msra.mxu1 %v5322_v44  ;;  %v1308_v43 = vld [vmem:[%s6125_s13 + $0xc40] sm:$0xff]  ;;  %v1361_v47 = vld [vmem:[%s6125_s13 + $0xde8] sm:$0xff] }
 0x210   : > { %4134 = vmatprep.subr.bf16.mxu0 %v5329_v45  ;;  %4298 = vmatprep.subr.bf16.mxu1 %v5331_v46  ;;  %v1312_v44 = vld [vmem:[%s6125_s13 + $0xc60] sm:$0xff]  ;;  %v1309_v45 = vld [vmem:[%s6125_s13 + $0xc48] sm:$0xff] }
 0x211   : > { %v1313_v46 = vld [vmem:[%s6125_s13 + $0xc68] sm:$0xff]  ;;  %v5377_v50 = vcombine.high %v1308_v43, %v1312_v44  ;;  %v5376_v56 = vcombine.low %v1308_v43, %v1312_v44  ;;  %v1356_v44 = vld [vmem:[%s6125_s13 + $0xdc0] sm:$0xff] }
 0x212   : > { %v5378_v57 = vcombine.low %v1309_v45, %v1313_v46 }
 0x213   : > { %4135 = vmatpush1.bf16.msra.mxu0 %v5328_v51  ;;  %4299 = vmatpush1.bf16.msra.mxu1 %v5330_v18  ;;  %v5379_v51 = vcombine.high %v1309_v45, %v1313_v46  ;;  %v1316_v18 = vld [vmem:[%s6125_s13 + $0xc80] sm:$0xff]  ;;  %v1357_v46 = vld [vmem:[%s6125_s13 + $0xdc8] sm:$0xff] }
 0x214   : > { %4136 = vmatprep.subr.bf16.mxu0 %v5337_v52  ;;  %4300 = vmatprep.subr.bf16.mxu1 %v5339_v53  ;;  %v1320_v52 = vld [vmem:[%s6125_s13 + $0xca0] sm:$0xff]  ;;  %v1317_v53 = vld [vmem:[%s6125_s13 + $0xc88] sm:$0xff] }
 0x215   : > { %v5384_v8 = vcombine.low %v1316_v18, %v1320_v52  ;;  %v5386_v9 = vcombine.low %v1317_v53, %v1321_v54  ;;  %v1360_v45 = vld [vmem:[%s6125_s13 + $0xde0] sm:$0xff] }
 0x217   : > { %4137 = vmatpush1.bf16.msra.mxu0 %v5336_v59  ;;  %4301 = vmatpush1.bf16.msra.mxu1 %v5338_v15  ;;  %v5385_v59 = vcombine.high %v1316_v18, %v1320_v52  ;;  %v5387_v15 = vcombine.high %v1317_v53, %v1321_v54  ;;  %v1364_v18 = vld [vmem:[%s6125_s13 + $0xe00] sm:$0xff]  ;;  %v1365_v53 = vld [vmem:[%s6125_s13 + $0xe08] sm:$0xff] }
 0x218   : > { %4138 = vmatprep.subr.bf16.mxu0 %v5345_v3  ;;  %4302 = vmatprep.subr.bf16.mxu1 %v5347_v5  ;;  %v1324_v3 = vld [vmem:[%s6125_s13 + $0xcc0] sm:$0xff]  ;;  %v1369_v54 = vld [vmem:[%s6125_s13 + $0xe28] sm:$0xff] }
 0x219   : > { %v1328_v5 = vld [vmem:[%s6125_s13 + $0xce0] sm:$0xff] }
 0x21a   : > { %v5393_v12 = vcombine.high %v1324_v3, %v1328_v5  ;;  %v5392_v23 = vcombine.low %v1324_v3, %v1328_v5  ;;  %v1368_v52 = vld [vmem:[%s6125_s13 + $0xe20] sm:$0xff] }
 0x21b   : > { %4139 = vmatpush1.bf16.msra.mxu0 %v5344_v13  ;;  %4303 = vmatpush1.bf16.msra.mxu1 %v5346_v16  ;;  %v5395_v13 = vcombine.high %v1325_v6, %v1329_v7  ;;  %v1332_v16 = vld [vmem:[%s6125_s13 + $0xd00] sm:$0xff]  ;;  %v1373_v6 = vld [vmem:[%s6125_s13 + $0xe48] sm:$0xff] }
 0x21c   : > { %4140 = vmatprep.subr.bf16.mxu0 %v5353_v62  ;;  %4304 = vmatprep.subr.bf16.mxu1 %v5355_v21  ;;  %v1336_v62 = vld [vmem:[%s6125_s13 + $0xd20] sm:$0xff]  ;;  %v1333_v21 = vld [vmem:[%s6125_s13 + $0xd08] sm:$0xff] }
 0x21d   : > { %v5401_v25 = vcombine.high %v1332_v16, %v1336_v62  ;;  %v5403_v26 = vcombine.high %v1333_v21, %v1337_v22  ;;  %v5402_v35 = vcombine.low %v1333_v21, %v1337_v22  ;;  %v1372_v3 = vld [vmem:[%s6125_s13 + $0xe40] sm:$0xff]  ;;  %v1377_v7 = vld [vmem:[%s6125_s13 + $0xe68] sm:$0xff] }
 0x21e   : > { %v1376_v5 = vld [vmem:[%s6125_s13 + $0xe60] sm:$0xff]  ;;  %v1381_v21 = vld [vmem:[%s6125_s13 + $0xe88] sm:$0xff] }
 0x21f   : > { %4141 = vmatpush1.bf16.msra.mxu0 %v5352_v30  ;;  %4305 = vmatpush1.bf16.msra.mxu1 %v5354_v32  ;;  %v1344_v30 = vld [vmem:[%s6125_s13 + $0xd60] sm:$0xff]  ;;  %v1341_v32 = vld [vmem:[%s6125_s13 + $0xd48] sm:$0xff] }
 0x220   : > { %4142 = vmatprep.subr.bf16.mxu0 %v5361_v33  ;;  %4306 = vmatprep.subr.bf16.mxu1 %v5363_v34  ;;  %v1345_v33 = vld [vmem:[%s6125_s13 + $0xd68] sm:$0xff]  ;;  %v5400_v34 = vcombine.low %v1332_v16, %v1336_v62  ;;  %v5409_v36 = vcombine.high %v1340_v27, %v1344_v30  ;;  %v1380_v16 = vld [vmem:[%s6125_s13 + $0xe80] sm:$0xff] }
 0x221   : > { %v5411_v37 = vcombine.high %v1341_v32, %v1345_v33  ;;  %v1384_v62 = vld [vmem:[%s6125_s13 + $0xea0] sm:$0xff]  ;;  %v1385_v22 = vld [vmem:[%s6125_s13 + $0xea8] sm:$0xff] }
 0x223   : > { %4143 = vmatpush1.bf16.msra.mxu0 %v5360_v14  ;;  %4307 = vmatpush1.bf16.msra.mxu1 %v5362_v40  ;;  %v1353_v14 = vld [vmem:[%s6125_s13 + $0xda8] sm:$0xff]  ;;  %v5408_v40 = vcombine.low %v1340_v27, %v1344_v30  ;;  %v1388_v27 = vld [vmem:[%s6125_s13 + $0xec0] sm:$0xff] }
 0x224   : > { %4153 = vmatprep.subr.bf16.mxu0 %v5369_v41  ;;  %4317 = vmatprep.subr.bf16.mxu1 %v5371_v42  ;;  %v5410_v41 = vcombine.low %v1341_v32, %v1345_v33  ;;  %v5417_v42 = vcombine.high %v1348_v38, %v1352_v63  ;;  %v5419_v43 = vcombine.high %v1349_v39, %v1353_v14  ;;  %v1392_v30 = vld [vmem:[%s6125_s13 + $0xee0] sm:$0xff]  ;;  %v1389_v32 = vld [vmem:[%s6125_s13 + $0xec8] sm:$0xff] }
 0x225   : > { %v1393_v33 = vld [vmem:[%s6125_s13 + $0xee8] sm:$0xff] }
 0x226   : > { %4145 = vmatmul.mubr.bf16.vlgmr.msra.gmra.mrb[8].mxu0 %v6419_v48  ;;  %4309 = vmatmul.mubr.bf16.vlgmr.msra.gmra.mrb[8].mxu1 %v6419_v48 }
 0x227   : > { %4154 = vmatpush1.bf16.msra.mxu0 %v5368_v31  ;;  %4318 = vmatpush1.bf16.msra.mxu1 %v5370_v49  ;;  %v5416_v31 = vcombine.low %v1348_v38, %v1352_v63  ;;  %v5418_v49 = vcombine.low %v1349_v39, %v1353_v14  ;;  %v1396_v38 = vld [vmem:[%s6125_s13 + $0xf00] sm:$0xff]  ;;  %v1397_v39 = vld [vmem:[%s6125_s13 + $0xf08] sm:$0xff] }
 0x228   : > { %4155 = vmatprep.subr.bf16.mxu0 %v5377_v50  ;;  %4319 = vmatprep.subr.bf16.mxu1 %v5379_v51  ;;  %v5425_v50 = vcombine.high %v1356_v44, %v1360_v45  ;;  %v5427_v51 = vcombine.high %v1357_v46, %v1361_v47  ;;  %v1400_v63 = vld [vmem:[%s6125_s13 + $0xf20] sm:$0xff]  ;;  %v1401_v14 = vld [vmem:[%s6125_s13 + $0xf28] sm:$0xff] }
 0x229   : > { %4185 = vmatprep.mubr.bf16.mxu0 %v6425_v55  ;;  %4349 = vmatprep.mubr.bf16.mxu1 %v6425_v55 }
 0x22b   : > { %4156 = vmatpush1.bf16.msra.mxu0 %v5376_v56  ;;  %4320 = vmatpush1.bf16.msra.mxu1 %v5378_v57  ;;  %v5424_v56 = vcombine.low %v1356_v44, %v1360_v45  ;;  %v5426_v57 = vcombine.low %v1357_v46, %v1361_v47  ;;  %v1404_v44 = vld [vmem:[%s6125_s13 + $0xf40] sm:$0xff]  ;;  %v1405_v46 = vld [vmem:[%s6125_s13 + $0xf48] sm:$0xff] }
 0x22c   : > { %4157 = vmatprep.subr.bf16.mxu0 %v5385_v59  ;;  %4321 = vmatprep.subr.bf16.mxu1 %v5387_v15  ;;  %v5433_v59 = vcombine.high %v1364_v18, %v1368_v52  ;;  %v5435_v15 = vcombine.high %v1365_v53, %v1369_v54  ;;  %v1408_v45 = vld [vmem:[%s6125_s13 + $0xf60] sm:$0xff]  ;;  %v1409_v47 = vld [vmem:[%s6125_s13 + $0xf68] sm:$0xff] }
 0x22f   : > { %4158 = vmatpush1.bf16.msra.mxu0 %v5384_v8  ;;  %4322 = vmatpush1.bf16.msra.mxu1 %v5386_v9  ;;  %v5432_v8 = vcombine.low %v1364_v18, %v1368_v52  ;;  %v5434_v9 = vcombine.low %v1365_v53, %v1369_v54  ;;  %v5475_v18 = vcombine.high %v1405_v46, %v1409_v47  ;;  %v1412_v52 = vld [vmem:[%s6125_s13 + $0xf80] sm:$0xff]  ;;  %v1413_v54 = vld [vmem:[%s6125_s13 + $0xf88] sm:$0xff] }
 0x230   : > { %4159 = vmatprep.subr.bf16.mxu0 %v5393_v12  ;;  %4323 = vmatprep.subr.bf16.mxu1 %v5395_v13  ;;  %v5441_v12 = vcombine.high %v1372_v3, %v1376_v5  ;;  %v5443_v13 = vcombine.high %v1373_v6, %v1377_v7  ;;  %v1416_v53 = vld [vmem:[%s6125_s13 + $0xfa0] sm:$0xff] }
 0x233   : > { %4160 = vmatpush1.bf16.msra.mxu0 %v5392_v23  ;;  %4324 = vmatpush1.bf16.msra.mxu1 %v5394_v24  ;;  %v5440_v23 = vcombine.low %v1372_v3, %v1376_v5  ;;  %v5442_v24 = vcombine.low %v1373_v6, %v1377_v7  ;;  %v5481_v5 = vcombine.high %v1412_v52, %v1416_v53  ;;  %v1420_v7 = vld [vmem:[%s6125_s13 + $0xfc0] sm:$0xff] }
 0x234   : > { %4161 = vmatprep.subr.bf16.mxu0 %v5401_v25  ;;  %4325 = vmatprep.subr.bf16.mxu1 %v5403_v26  ;;  %v5449_v25 = vcombine.high %v1380_v16, %v1384_v62  ;;  %v5451_v26 = vcombine.high %v1381_v21, %v1385_v22 }
 0x237   : > { %4162 = vmatpush1.bf16.msra.mxu0 %v5400_v34  ;;  %4326 = vmatpush1.bf16.msra.mxu1 %v5402_v35  ;;  %v5448_v34 = vcombine.low %v1380_v16, %v1384_v62  ;;  %v5450_v35 = vcombine.low %v1381_v21, %v1385_v22 }
 0x238   : > { %4163 = vmatprep.subr.bf16.mxu0 %v5409_v36  ;;  %4327 = vmatprep.subr.bf16.mxu1 %v5411_v37  ;;  %v5457_v36 = vcombine.high %v1388_v27, %v1392_v30  ;;  %v5459_v37 = vcombine.high %v1389_v32, %v1393_v33 }
 0x23b   : > { %4164 = vmatpush1.bf16.msra.mxu0 %v5408_v40  ;;  %4328 = vmatpush1.bf16.msra.mxu1 %v5410_v41  ;;  %v5456_v40 = vcombine.low %v1388_v27, %v1392_v30  ;;  %v5458_v41 = vcombine.low %v1389_v32, %v1393_v33 }
 0x23c   : > { %4165 = vmatprep.subr.bf16.mxu0 %v5417_v42  ;;  %4329 = vmatprep.subr.bf16.mxu1 %v5419_v43  ;;  %v5465_v42 = vcombine.high %v1396_v38, %v1400_v63  ;;  %v5467_v43 = vcombine.high %v1397_v39, %v1401_v14 }
 0x23f   : > { %4166 = vmatpush1.bf16.msra.mxu0 %v5416_v31  ;;  %4330 = vmatpush1.bf16.msra.mxu1 %v5418_v49  ;;  %v5464_v31 = vcombine.low %v1396_v38, %v1400_v63  ;;  %v5466_v49 = vcombine.low %v1397_v39, %v1401_v14 }
 0x240   : > { %4167 = vmatprep.subr.bf16.mxu0 %v5425_v50  ;;  %4331 = vmatprep.subr.bf16.mxu1 %v5427_v51  ;;  %v433_v50 = vsub.s32 6, %v6221_v60  ;;  %v5473_v51 = vcombine.high %v1404_v44, %v1408_v45 }
 0x243   : > { %4168 = vmatpush1.bf16.msra.mxu0 %v5424_v56  ;;  %4332 = vmatpush1.bf16.msra.mxu1 %v5426_v57  ;;  %v1417_v56 = vld [vmem:[%s6125_s13 + $0xfa8] sm:$0xff]  ;;  %v5472_v57 = vcombine.low %v1404_v44, %v1408_v45  ;;  %v939_v44 = vld [vmem:[%s6125_s13 + $0xb8] sm:$0xff] }
 0x244   : > { %4169 = vmatprep.subr.bf16.mxu0 %v5433_v59  ;;  %4333 = vmatprep.subr.bf16.mxu1 %v5435_v15  ;;  %v5474_v59 = vcombine.low %v1405_v46, %v1409_v47  ;;  %v5664_v15 = vld [vmem:[#allocation6] sm:$0xff]  ;;  %v5483_v6 = vcombine.high %v1413_v54, %v1417_v56  ;;  %v5482_v16 = vcombine.low %v1413_v54, %v1417_v56 }
 0x245   : > { %v434_v3 = vrot.slane %v5664_v15, %v433_v50  ;;  %v951_v15 = vld [vmem:[%s6125_s13 + $0x118] sm:$0xff] }
 0x247   : > { %4170 = vmatpush1.bf16.msra.mxu0 %v5432_v8  ;;  %4334 = vmatpush1.bf16.msra.mxu1 %v5434_v9  ;;  %v1424_v8 = vld [vmem:[%s6125_s13 + $0xfe0] sm:$0xff]  ;;  %v1421_v9 = vld [vmem:[%s6125_s13 + $0xfc8] sm:$0xff]  ;;  %v894_v62 = vadd.f32 %v6287_v28, %v434_v3  ;;  %v955_v3 = vld [vmem:[%s6125_s13 + $0x138] sm:$0xff] }
 0x248   : > { %4171 = vmatprep.subr.bf16.mxu0 %v5441_v12  ;;  %4335 = vmatprep.subr.bf16.mxu1 %v5443_v13  ;;  %v1425_v12 = vld [vmem:[%s6125_s13 + $0xfe8] sm:$0xff]  ;;  %v5480_v13 = vcombine.low %v1412_v52, %v1416_v53  ;;  %v5489_v21 = vcombine.high %v1420_v7, %v1424_v8  ;;  %v5488_v27 = vcombine.low %v1420_v7, %v1424_v8  ;;  %v947_v52 = vld [vmem:[%s6125_s13 + $0xf8] sm:$0xff] }
 0x249   : > { %v5491_v22 = vcombine.high %v1421_v9, %v1425_v12  ;;  %v5490_v30 = vcombine.low %v1421_v9, %v1425_v12  ;;  %v906_v32 = vmax.f32 %v894_v62, 0.0  ;;  %v5023_v8 = vcombine.high %v951_v15, %v955_v3  ;;  %v958_v9 = vld [vmem:[%s6125_s13 + $0x150] sm:$0xff] }
 0x24a   : > { %v962_v12 = vld [vmem:[%s6125_s13 + $0x170] sm:$0xff] }
 0x24b   : > { %4172 = vmatpush1.bf16.msra.mxu0 %v5440_v23  ;;  %4336 = vmatpush1.bf16.msra.mxu1 %v5442_v24  ;;  %v918_v23 = vld [vmem:[%s6125_s13 + $0x10] sm:$0xff]  ;;  %v6495_v63 = vpack.c.bf16 %v906_v32, %v906_v32 }
 0x24c   : > { %4173 = vmatprep.subr.bf16.mxu0 %v5449_v25  ;;  %4337 = vmatprep.subr.bf16.mxu1 %v5451_v26  ;;  %v922_v24 = vld [vmem:[%s6125_s13 + $0x30] sm:$0xff]  ;;  %v919_v25 = vld [vmem:[%s6125_s13 + $0x18] sm:$0xff] }
 0x24d   : > { %v923_v26 = vld [vmem:[%s6125_s13 + $0x38] sm:$0xff]  ;;  %v4989_v28 = vcombine.high %v918_v23, %v922_v24  ;;  %v4988_v38 = vcombine.low %v918_v23, %v922_v24  ;;  %v966_v24 = vld [vmem:[%s6125_s13 + $0x190] sm:$0xff] }
 0x24e   : > { %v4991_v33 = vcombine.high %v919_v25, %v923_v26  ;;  %v4990_v39 = vcombine.low %v919_v25, %v923_v26  ;;  %v970_v25 = vld [vmem:[%s6125_s13 + $0x1b0] sm:$0xff]  ;;  %v967_v26 = vld [vmem:[%s6125_s13 + $0x198] sm:$0xff] }
 0x24f   : > { %4174 = vmatpush1.bf16.msra.mxu0 %v5448_v34  ;;  %4338 = vmatpush1.bf16.msra.mxu1 %v5450_v35  ;;  %v926_v34 = vld [vmem:[%s6125_s13 + $0x50] sm:$0xff] }
 0x250   : > { %4175 = vmatprep.subr.bf16.mxu0 %v5457_v36  ;;  %4339 = vmatprep.subr.bf16.mxu1 %v5459_v37  ;;  %v930_v35 = vld [vmem:[%s6125_s13 + $0x70] sm:$0xff]  ;;  %v927_v36 = vld [vmem:[%s6125_s13 + $0x58] sm:$0xff] }
 0x251   : > { %v931_v37 = vld [vmem:[%s6125_s13 + $0x78] sm:$0xff]  ;;  %v4997_v14 = vcombine.high %v926_v34, %v930_v35  ;;  %v4996_v45 = vcombine.low %v926_v34, %v930_v35  ;;  %v974_v34 = vld [vmem:[%s6125_s13 + $0x1d0] sm:$0xff] }
 0x252   : > { %v4998_v46 = vcombine.low %v927_v36, %v931_v37  ;;  %v978_v35 = vld [vmem:[%s6125_s13 + $0x1f0] sm:$0xff] }
 0x253   : > { %4176 = vmatpush1.bf16.msra.mxu0 %v5456_v40  ;;  %4340 = vmatpush1.bf16.msra.mxu1 %v5458_v41  ;;  %v4999_v40 = vcombine.high %v927_v36, %v931_v37  ;;  %v934_v41 = vld [vmem:[%s6125_s13 + $0x90] sm:$0xff]  ;;  %v975_v36 = vld [vmem:[%s6125_s13 + $0x1d8] sm:$0xff] }
 0x254   : > { %4177 = vmatprep.subr.bf16.mxu0 %v5465_v42  ;;  %4341 = vmatprep.subr.bf16.mxu1 %v5467_v43  ;;  %v938_v42 = vld [vmem:[%s6125_s13 + $0xb0] sm:$0xff]  ;;  %v935_v43 = vld [vmem:[%s6125_s13 + $0x98] sm:$0xff] }
 0x255   : > { %v5005_v47 = vcombine.high %v934_v41, %v938_v42  ;;  %v5004_v53 = vcombine.low %v934_v41, %v938_v42  ;;  %v5006_v54 = vcombine.low %v935_v43, %v939_v44  ;;  %v979_v37 = vld [vmem:[%s6125_s13 + $0x1f8] sm:$0xff]  ;;  %v982_v41 = vld [vmem:[%s6125_s13 + $0x210] sm:$0xff] }
 0x256   : > { %v986_v42 = vld [vmem:[%s6125_s13 + $0x230] sm:$0xff] }
 0x257   : > { %4178 = vmatpush1.bf16.msra.mxu0 %v5464_v31  ;;  %4342 = vmatpush1.bf16.msra.mxu1 %v5466_v49  ;;  %v5007_v31 = vcombine.high %v935_v43, %v939_v44  ;;  %v942_v49 = vld [vmem:[%s6125_s13 + $0xd0] sm:$0xff]  ;;  %v983_v43 = vld [vmem:[%s6125_s13 + $0x218] sm:$0xff] }
 0x258   : > { %4179 = vmatprep.subr.bf16.mxu0 %v5473_v51  ;;  %4343 = vmatprep.subr.bf16.mxu1 %v5475_v18  ;;  %v946_v51 = vld [vmem:[%s6125_s13 + $0xf0] sm:$0xff]  ;;  %v943_v18 = vld [vmem:[%s6125_s13 + $0xd8] sm:$0xff] }
 0x259   : > { %v5015_v56 = vcombine.high %v943_v18, %v947_v52  ;;  %v987_v44 = vld [vmem:[%s6125_s13 + $0x238] sm:$0xff] }
 0x25b   : > { %4180 = vmatpush1.bf16.msra.mxu0 %v5472_v57  ;;  %4344 = vmatpush1.bf16.msra.mxu1 %v5474_v59  ;;  %v950_v57 = vld [vmem:[%s6125_s13 + $0x110] sm:$0xff] }
 0x25c   : > { %4181 = vmatprep.subr.bf16.mxu0 %v5481_v5  ;;  %4345 = vmatprep.subr.bf16.mxu1 %v5483_v6  ;;  %v954_v59 = vld [vmem:[%s6125_s13 + $0x130] sm:$0xff]  ;;  %v5012_v5 = vcombine.low %v942_v49, %v946_v51  ;;  %v5014_v6 = vcombine.low %v943_v18, %v947_v52  ;;  %v991_v18 = vld [vmem:[%s6125_s13 + $0x258] sm:$0xff] }
 0x25d   : > { %v5021_v7 = vcombine.high %v950_v57, %v954_v59  ;;  %v5020_v62 = vcombine.low %v950_v57, %v954_v59  ;;  %v995_v52 = vld [vmem:[%s6125_s13 + $0x278] sm:$0xff]  ;;  %v998_v57 = vld [vmem:[%s6125_s13 + $0x290] sm:$0xff] }
 0x25e   : > { %v1002_v59 = vld [vmem:[%s6125_s13 + $0x2b0] sm:$0xff] }
 0x25f   : > { %4182 = vmatpush1.bf16.msra.mxu0 %v5480_v13  ;;  %4346 = vmatpush1.bf16.msra.mxu1 %v5482_v16  ;;  %v959_v13 = vld [vmem:[%s6125_s13 + $0x158] sm:$0xff] }
 0x260   : > { %4183 = vmatprep.subr.bf16.mxu0 %v5489_v21  ;;  %4347 = vmatprep.subr.bf16.mxu1 %v5491_v22  ;;  %v963_v16 = vld [vmem:[%s6125_s13 + $0x178] sm:$0xff]  ;;  %v5022_v21 = vcombine.low %v951_v15, %v955_v3  ;;  %v5029_v22 = vcombine.high %v958_v9, %v962_v12 }
 0x261   : > { %v5031_v23 = vcombine.high %v959_v13, %v963_v16  ;;  %v5030_v32 = vcombine.low %v959_v13, %v963_v16  ;;  %v999_v15 = vld [vmem:[%s6125_s13 + $0x298] sm:$0xff] }
 0x262   : > { %v1003_v3 = vld [vmem:[%s6125_s13 + $0x2b8] sm:$0xff] }
 0x263   : > { %4184 = vmatpush1.bf16.msra.mxu0 %v5488_v27  ;;  %4348 = vmatpush1.bf16.msra.mxu1 %v5490_v30  ;;  %v971_v27 = vld [vmem:[%s6125_s13 + $0x1b8] sm:$0xff]  ;;  %v5028_v30 = vcombine.low %v958_v9, %v962_v12  ;;  %v1006_v9 = vld [vmem:[%s6125_s13 + $0x2d0] sm:$0xff] }
 0x264   : > { %4358 = vmatprep.subr.bf16.mxu0 %v4989_v28  ;;  %4522 = vmatprep.subr.bf16.mxu1 %v4991_v33  ;;  %v5037_v28 = vcombine.high %v966_v24, %v970_v25  ;;  %v5039_v33 = vcombine.high %v967_v26, %v971_v27  ;;  %v1010_v12 = vld [vmem:[%s6125_s13 + $0x2f0] sm:$0xff]  ;;  %v1007_v13 = vld [vmem:[%s6125_s13 + $0x2d8] sm:$0xff] }
 0x265   : > { %v1011_v16 = vld [vmem:[%s6125_s13 + $0x2f8] sm:$0xff] }
 0x266   : > { %4186 = vmatmul.mubr.bf16.vlgmr.msra.gmra.mrb[8].mxu0 %v6495_v63  ;;  %4350 = vmatmul.mubr.bf16.vlgmr.msra.gmra.mrb[8].mxu1 %v6495_v63 }
 0x267   : > { %4359 = vmatpush1.bf16.msra.mxu0 %v4988_v38  ;;  %4390 = vmatprep.mubr.bf16.mxu0 %v6243_v19  ;;  %v5036_v38 = vcombine.low %v966_v24, %v970_v25  ;;  %v1014_v24 = vld [vmem:[%s6125_s13 + $0x310] sm:$0xff] }
 0x268   : > { %4523 = vmatpush1.bf16.msra.mxu1 %v4990_v39  ;;  %4554 = vmatprep.mubr.bf16.mxu1 %v6243_v19  ;;  %v5013_v19 = vcombine.high %v942_v49, %v946_v51  ;;  %v5038_v39 = vcombine.low %v967_v26, %v971_v27  ;;  %v990_v49 = vld [vmem:[%s6125_s13 + $0x250] sm:$0xff]  ;;  %v1015_v26 = vld [vmem:[%s6125_s13 + $0x318] sm:$0xff] }
 0x269   : > { %4360 = vmatprep.subr.bf16.mxu0 %v4997_v14  ;;  %4524 = vmatprep.subr.bf16.mxu1 %v4999_v40  ;;  %v5045_v14 = vcombine.high %v974_v34, %v978_v35  ;;  %v5047_v40 = vcombine.high %v975_v36, %v979_v37  ;;  %v994_v51 = vld [vmem:[%s6125_s13 + $0x270] sm:$0xff]  ;;  %v1019_v27 = vld [vmem:[%s6125_s13 + $0x338] sm:$0xff] }
 0x26a   : > { %v1018_v25 = vld [vmem:[%s6125_s13 + $0x330] sm:$0xff] }
 0x26b   : > { %4361 = vmatpush1.bf16.msra.mxu0 %v4996_v45  ;;  %v5044_v45 = vcombine.low %v974_v34, %v978_v35  ;;  %v1022_v34 = vld [vmem:[%s6125_s13 + $0x350] sm:$0xff] }
 0x26c   : > { %4525 = vmatpush1.bf16.msra.mxu1 %v4998_v46  ;;  %4362 = vmatprep.subr.bf16.mxu0 %v5005_v47  ;;  %v5046_v46 = vcombine.low %v975_v36, %v979_v37  ;;  %v5053_v47 = vcombine.high %v982_v41, %v986_v42  ;;  %v1026_v35 = vld [vmem:[%s6125_s13 + $0x370] sm:$0xff]  ;;  %v1023_v36 = vld [vmem:[%s6125_s13 + $0x358] sm:$0xff] }
 0x26d   : > { %4526 = vmatprep.subr.bf16.mxu1 %v5007_v31  ;;  %v5055_v31 = vcombine.high %v983_v43, %v987_v44  ;;  %v1027_v37 = vld [vmem:[%s6125_s13 + $0x378] sm:$0xff] }
 0x26f   : > { %4363 = vmatpush1.bf16.msra.mxu0 %v5004_v53  ;;  %v5052_v53 = vcombine.low %v982_v41, %v986_v42  ;;  %v1030_v41 = vld [vmem:[%s6125_s13 + $0x390] sm:$0xff] }
 0x270   : > { %4527 = vmatpush1.bf16.msra.mxu1 %v5006_v54  ;;  %4364 = vmatprep.subr.bf16.mxu0 %v5013_v19  ;;  %v5054_v54 = vcombine.low %v983_v43, %v987_v44  ;;  %v5061_v19 = vcombine.high %v990_v49, %v994_v51  ;;  %v1034_v42 = vld [vmem:[%s6125_s13 + $0x3b0] sm:$0xff]  ;;  %v1031_v43 = vld [vmem:[%s6125_s13 + $0x398] sm:$0xff] }
 0x271   : > { %4528 = vmatprep.subr.bf16.mxu1 %v5015_v56  ;;  %v5063_v56 = vcombine.high %v991_v18, %v995_v52  ;;  %v1035_v44 = vld [vmem:[%s6125_s13 + $0x3b8] sm:$0xff] }
 0x273   : > { %4365 = vmatpush1.bf16.msra.mxu0 %v5012_v5  ;;  %v5060_v5 = vcombine.low %v990_v49, %v994_v51  ;;  %v1038_v49 = vld [vmem:[%s6125_s13 + $0x3d0] sm:$0xff] }
 0x274   : > { %4529 = vmatpush1.bf16.msra.mxu1 %v5014_v6  ;;  %4366 = vmatprep.subr.bf16.mxu0 %v5021_v7  ;;  %v5062_v6 = vcombine.low %v991_v18, %v995_v52  ;;  %v5069_v7 = vcombine.high %v998_v57, %v1002_v59  ;;  %v1042_v51 = vld [vmem:[%s6125_s13 + $0x3f0] sm:$0xff]  ;;  %v1039_v18 = vld [vmem:[%s6125_s13 + $0x3d8] sm:$0xff] }
 0x275   : > { %4530 = vmatprep.subr.bf16.mxu1 %v5023_v8  ;;  %v5071_v8 = vcombine.high %v999_v15, %v1003_v3  ;;  %v1043_v52 = vld [vmem:[%s6125_s13 + $0x3f8] sm:$0xff] }
 0x277   : > { %4367 = vmatpush1.bf16.msra.mxu0 %v5020_v62  ;;  %v5068_v62 = vcombine.low %v998_v57, %v1002_v59  ;;  %v1046_v57 = vld [vmem:[%s6125_s13 + $0x410] sm:$0xff] }
 0x278   : > { %4531 = vmatpush1.bf16.msra.mxu1 %v5022_v21  ;;  %4368 = vmatprep.subr.bf16.mxu0 %v5029_v22  ;;  %v5070_v21 = vcombine.low %v999_v15, %v1003_v3  ;;  %v5077_v22 = vcombine.high %v1006_v9, %v1010_v12  ;;  %v1050_v59 = vld [vmem:[%s6125_s13 + $0x430] sm:$0xff]  ;;  %v1047_v15 = vld [vmem:[%s6125_s13 + $0x418] sm:$0xff] }
 0x279   : > { %4532 = vmatprep.subr.bf16.mxu1 %v5031_v23  ;;  %v5079_v23 = vcombine.high %v1007_v13, %v1011_v16  ;;  %v1051_v3 = vld [vmem:[%s6125_s13 + $0x438] sm:$0xff] }
 0x27b   : > { %4369 = vmatpush1.bf16.msra.mxu0 %v5028_v30  ;;  %v5076_v30 = vcombine.low %v1006_v9, %v1010_v12  ;;  %v1054_v9 = vld [vmem:[%s6125_s13 + $0x450] sm:$0xff] }
 0x27c   : > { %4533 = vmatpush1.bf16.msra.mxu1 %v5030_v32  ;;  %4370 = vmatprep.subr.bf16.mxu0 %v5037_v28  ;;  %v5078_v32 = vcombine.low %v1007_v13, %v1011_v16  ;;  %v5085_v28 = vcombine.high %v1014_v24, %v1018_v25  ;;  %v1058_v12 = vld [vmem:[%s6125_s13 + $0x470] sm:$0xff]  ;;  %v5116_v13 = vcombine.low %v1046_v57, %v1050_v59  ;;  %v1055_v16 = vld [vmem:[%s6125_s13 + $0x458] sm:$0xff] }
 0x27d   : > { %4534 = vmatprep.subr.bf16.mxu1 %v5039_v33  ;;  %v5087_v33 = vcombine.high %v1015_v26, %v1019_v27 }
 0x27f   : > { %4371 = vmatpush1.bf16.msra.mxu0 %v5036_v38  ;;  %v5084_v38 = vcombine.low %v1014_v24, %v1018_v25  ;;  %v1066_v24 = vld [vmem:[%s6125_s13 + $0x4b0] sm:$0xff] }
 0x280   : > { %4535 = vmatpush1.bf16.msra.mxu1 %v5038_v39  ;;  %4372 = vmatprep.subr.bf16.mxu0 %v5045_v14  ;;  %v5086_v39 = vcombine.low %v1015_v26, %v1019_v27  ;;  %v5093_v14 = vcombine.high %v1022_v34, %v1026_v35  ;;  %v1063_v26 = vld [vmem:[%s6125_s13 + $0x498] sm:$0xff] }
 0x281   : > { %4536 = vmatprep.subr.bf16.mxu1 %v5047_v40  ;;  %v5095_v40 = vcombine.high %v1023_v36, %v1027_v37  ;;  %v1067_v27 = vld [vmem:[%s6125_s13 + $0x4b8] sm:$0xff] }
 0x283   : > { %4373 = vmatpush1.bf16.msra.mxu0 %v5044_v45  ;;  %v5092_v45 = vcombine.low %v1022_v34, %v1026_v35  ;;  %v1070_v34 = vld [vmem:[%s6125_s13 + $0x4d0] sm:$0xff] }
 0x284   : > { %4537 = vmatpush1.bf16.msra.mxu1 %v5046_v46  ;;  %4374 = vmatprep.subr.bf16.mxu0 %v5053_v47  ;;  %v5094_v46 = vcombine.low %v1023_v36, %v1027_v37  ;;  %v5101_v47 = vcombine.high %v1030_v41, %v1034_v42  ;;  %v1074_v35 = vld [vmem:[%s6125_s13 + $0x4f0] sm:$0xff]  ;;  %v1071_v36 = vld [vmem:[%s6125_s13 + $0x4d8] sm:$0xff] }
 0x285   : > { %4538 = vmatprep.subr.bf16.mxu1 %v5055_v31  ;;  %v5103_v31 = vcombine.high %v1031_v43, %v1035_v44 }
 0x287   : > { %4375 = vmatpush1.bf16.msra.mxu0 %v5052_v53  ;;  %v5100_v53 = vcombine.low %v1030_v41, %v1034_v42  ;;  %v1079_v41 = vld [vmem:[%s6125_s13 + $0x518] sm:$0xff] }
 0x288   : > { %4539 = vmatpush1.bf16.msra.mxu1 %v5054_v54  ;;  %4376 = vmatprep.subr.bf16.mxu0 %v5061_v19  ;;  %v5102_v54 = vcombine.low %v1031_v43, %v1035_v44  ;;  %v5109_v19 = vcombine.high %v1038_v49, %v1042_v51  ;;  %v1083_v42 = vld [vmem:[%s6125_s13 + $0x538] sm:$0xff]  ;;  %v5140_v43 = vcombine.low %v1070_v34, %v1074_v35 }
 0x289   : > { %4540 = vmatprep.subr.bf16.mxu1 %v5063_v56  ;;  %v5111_v56 = vcombine.high %v1039_v18, %v1043_v52 }
 0x28b   : > { %4377 = vmatpush1.bf16.msra.mxu0 %v5060_v5  ;;  %v5108_v5 = vcombine.low %v1038_v49, %v1042_v51  ;;  %v1087_v49 = vld [vmem:[%s6125_s13 + $0x558] sm:$0xff] }
 0x28c   : > { %4541 = vmatpush1.bf16.msra.mxu1 %v5062_v6  ;;  %4378 = vmatprep.subr.bf16.mxu0 %v5069_v7  ;;  %v5110_v6 = vcombine.low %v1039_v18, %v1043_v52  ;;  %v5117_v7 = vcombine.high %v1046_v57, %v1050_v59  ;;  %v1091_v51 = vld [vmem:[%s6125_s13 + $0x578] sm:$0xff]  ;;  %v5150_v52 = vcombine.low %v1079_v41, %v1083_v42 }
 0x28d   : > { %4542 = vmatprep.subr.bf16.mxu1 %v5071_v8  ;;  %v5119_v8 = vcombine.high %v1047_v15, %v1051_v3  ;;  %v1095_v57 = vld [vmem:[%s6125_s13 + $0x598] sm:$0xff] }
 0x28e   : > { %v1099_v59 = vld [vmem:[%s6125_s13 + $0x5b8] sm:$0xff] }
 0x28f   : > { %4379 = vmatpush1.bf16.msra.mxu0 %v5068_v62  ;;  %v1059_v62 = vld [vmem:[%s6125_s13 + $0x478] sm:$0xff] }
 0x290   : > { %4543 = vmatpush1.bf16.msra.mxu1 %v5070_v21  ;;  %4380 = vmatprep.subr.bf16.mxu0 %v5077_v22  ;;  %v5118_v21 = vcombine.low %v1047_v15, %v1051_v3  ;;  %v5125_v22 = vcombine.high %v1054_v9, %v1058_v12  ;;  %v5127_v25 = vcombine.high %v1055_v16, %v1059_v62 }
 0x291   : > { %4544 = vmatprep.subr.bf16.mxu1 %v5079_v23  ;;  %v1062_v23 = vld [vmem:[%s6125_s13 + $0x490] sm:$0xff]  ;;  %v5158_v3 = vcombine.low %v1087_v49, %v1091_v51 }
 0x292   : > { %v5132_v37 = vcombine.low %v1062_v23, %v1066_v24 }
 0x293   : > { %4381 = vmatpush1.bf16.msra.mxu0 %v5076_v30  ;;  %v5124_v30 = vcombine.low %v1054_v9, %v1058_v12  ;;  %v1103_v9 = vld [vmem:[%s6125_s13 + $0x5d8] sm:$0xff] }
 0x294   : > { %4545 = vmatpush1.bf16.msra.mxu1 %v5078_v32  ;;  %4382 = vmatprep.subr.bf16.mxu0 %v5085_v28  ;;  %v5126_v32 = vcombine.low %v1055_v16, %v1059_v62  ;;  %v5133_v28 = vcombine.high %v1062_v23, %v1066_v24  ;;  %v1107_v12 = vld [vmem:[%s6125_s13 + $0x5f8] sm:$0xff]  ;;  %v5166_v16 = vcombine.low %v1095_v57, %v1099_v59  ;;  %v1114_v23 = vld [vmem:[%s6125_s13 + $0x630] sm:$0xff] }
 0x295   : > { %4546 = vmatprep.subr.bf16.mxu1 %v5087_v33  ;;  %v5135_v33 = vcombine.high %v1063_v26, %v1067_v27  ;;  %v1111_v24 = vld [vmem:[%s6125_s13 + $0x618] sm:$0xff] }
 0x297   : > { %4383 = vmatpush1.bf16.msra.mxu0 %v5084_v38  ;;  %v5134_v38 = vcombine.low %v1063_v26, %v1067_v27  ;;  %v5174_v27 = vcombine.low %v1103_v9, %v1107_v12 }
 0x298   : > { %4547 = vmatpush1.bf16.msra.mxu1 %v5086_v39  ;;  %4384 = vmatprep.subr.bf16.mxu0 %v5093_v14  ;;  %v5141_v39 = vcombine.high %v1070_v34, %v1074_v35  ;;  %v1078_v14 = vld [vmem:[%s6125_s13 + $0x510] sm:$0xff]  ;;  %v1119_v34 = vld [vmem:[%s6125_s13 + $0x658] sm:$0xff] }
 0x299   : > { %4548 = vmatprep.subr.bf16.mxu1 %v5095_v40  ;;  %v1082_v40 = vld [vmem:[%s6125_s13 + $0x530] sm:$0xff]  ;;  %v1123_v35 = vld [vmem:[%s6125_s13 + $0x678] sm:$0xff] }
 0x29a   : > { %v5148_v18 = vcombine.low %v1078_v14, %v1082_v40 }
 0x29b   : > { %4385 = vmatpush1.bf16.msra.mxu0 %v5092_v45  ;;  %v5149_v45 = vcombine.high %v1078_v14, %v1082_v40  ;;  %v1127_v14 = vld [vmem:[%s6125_s13 + $0x698] sm:$0xff] }
 0x29c   : > { %4549 = vmatpush1.bf16.msra.mxu1 %v5094_v46  ;;  %4386 = vmatprep.subr.bf16.mxu0 %v5101_v47  ;;  %v5151_v46 = vcombine.high %v1079_v41, %v1083_v42  ;;  %v1086_v47 = vld [vmem:[%s6125_s13 + $0x550] sm:$0xff]  ;;  %v1131_v40 = vld [vmem:[%s6125_s13 + $0x6b8] sm:$0xff]  ;;  %v5190_v42 = vcombine.low %v1119_v34, %v1123_v35 }
 0x29d   : > { %4550 = vmatprep.subr.bf16.mxu1 %v5103_v31  ;;  %v1090_v31 = vld [vmem:[%s6125_s13 + $0x570] sm:$0xff] }
 0x29e   : > { %v5156_v15 = vcombine.low %v1086_v47, %v1090_v31 }
 0x29f   : > { %4387 = vmatpush1.bf16.msra.mxu0 %v5100_v53  ;;  %v5157_v53 = vcombine.high %v1086_v47, %v1090_v31  ;;  %v1135_v47 = vld [vmem:[%s6125_s13 + $0x6d8] sm:$0xff] }
 0x2a0   : > { %4551 = vmatpush1.bf16.msra.mxu1 %v5102_v54  ;;  %4388 = vmatprep.subr.bf16.mxu0 %v5109_v19  ;;  %v5159_v54 = vcombine.high %v1087_v49, %v1091_v51  ;;  %v1094_v19 = vld [vmem:[%s6125_s13 + $0x590] sm:$0xff]  ;;  %v1139_v31 = vld [vmem:[%s6125_s13 + $0x6f8] sm:$0xff]  ;;  %v5198_v51 = vcombine.low %v1127_v14, %v1131_v40 }
 0x2a1   : > { %4552 = vmatprep.subr.bf16.mxu1 %v5111_v56  ;;  %v1098_v56 = vld [vmem:[%s6125_s13 + $0x5b0] sm:$0xff] }
 0x2a3   : > { %4389 = vmatpush1.bf16.msra.mxu0 %v5108_v5  ;;  %v5165_v5 = vcombine.high %v1094_v19, %v1098_v56 }
 0x2a4   : > { %4553 = vmatpush1.bf16.msra.mxu1 %v5110_v6  ;;  %4399 = vmatprep.subr.bf16.mxu0 %v5117_v7  ;;  %v5167_v6 = vcombine.high %v1095_v57, %v1099_v59  ;;  %v1102_v7 = vld [vmem:[%s6125_s13 + $0x5d0] sm:$0xff]  ;;  %v5206_v59 = vcombine.low %v1135_v47, %v1139_v31 }
 0x2a5   : > { %4563 = vmatprep.subr.bf16.mxu1 %v5119_v8  ;;  %v1106_v8 = vld [vmem:[%s6125_s13 + $0x5f0] sm:$0xff] }
 0x2a6   : > { %4391 = vmatmul.mubr.bf16.vlgmr.msra.gmra.mrb[12].mxu0 %v6245_v20  ;;  %v5173_v62 = vcombine.high %v1102_v7, %v1106_v8  ;;  %v5172_v26 = vcombine.low %v1102_v7, %v1106_v8  ;;  %v1151_v7 = vld [vmem:[%s6125_s13 + $0x758] sm:$0xff] }
 0x2a7   : > { %4555 = vmatmul.mubr.bf16.vlgmr.msra.gmra.mrb[12].mxu1 %v6245_v20  ;;  %4400 = vmatpush1.bf16.msra.mxu0 %v5116_v13  ;;  %v1075_v20 = vld [vmem:[%s6125_s13 + $0x4f8] sm:$0xff]  ;;  %v5164_v13 = vcombine.low %v1094_v19, %v1098_v56 }
 0x2a8   : > { %4431 = vmatprep.mubr.bf16.mxu0 %v6256_v0  ;;  %4564 = vmatpush1.bf16.msra.mxu1 %v5118_v21  ;;  %v5142_v44 = vcombine.low %v1071_v36, %v1075_v20  ;;  %v5175_v21 = vcombine.high %v1103_v9, %v1107_v12  ;;  %v1143_v19 = vld [vmem:[%s6125_s13 + $0x718] sm:$0xff] }
 0x2a9   : > { %4595 = vmatprep.mubr.bf16.mxu1 %v6256_v0  ;;  %4401 = vmatprep.subr.bf16.mxu0 %v5125_v22  ;;  %v5143_v0 = vcombine.high %v1071_v36, %v1075_v20  ;;  %v1110_v22 = vld [vmem:[%s6125_s13 + $0x610] sm:$0xff]  ;;  %v1147_v56 = vld [vmem:[%s6125_s13 + $0x738] sm:$0xff] }
 0x2aa   : > { %4565 = vmatprep.subr.bf16.mxu1 %v5127_v25  ;;  %v1115_v25 = vld [vmem:[%s6125_s13 + $0x638] sm:$0xff]  ;;  %v5180_v36 = vcombine.low %v1110_v22, %v1114_v23  ;;  %v5214_v12 = vcombine.low %v1143_v19, %v1147_v56 }
 0x2ab   : > { %4402 = vmatpush1.bf16.msra.mxu0 %v5124_v30  ;;  %v5181_v30 = vcombine.high %v1110_v22, %v1114_v23  ;;  %v5182_v20 = vcombine.low %v1111_v24, %v1115_v25  ;;  %v1155_v8 = vld [vmem:[%s6125_s13 + $0x778] sm:$0xff] }
 0x2ac   : > { %4566 = vmatpush1.bf16.msra.mxu1 %v5126_v32  ;;  %4403 = vmatprep.subr.bf16.mxu0 %v5133_v28  ;;  %v5183_v32 = vcombine.high %v1111_v24, %v1115_v25  ;;  %v1118_v28 = vld [vmem:[%s6125_s13 + $0x650] sm:$0xff]  ;;  %v1159_v22 = vld [vmem:[%s6125_s13 + $0x798] sm:$0xff]  ;;  %v5222_v25 = vcombine.low %v1151_v7, %v1155_v8 }
 0x2ad   : > { %4567 = vmatprep.subr.bf16.mxu1 %v5135_v33  ;;  %v1122_v33 = vld [vmem:[%s6125_s13 + $0x670] sm:$0xff]  ;;  %v1163_v23 = vld [vmem:[%s6125_s13 + $0x7b8] sm:$0xff] }
 0x2ae   : > { %v5188_v41 = vcombine.low %v1118_v28, %v1122_v33 }
 0x2af   : > { %4404 = vmatpush1.bf16.msra.mxu0 %v5132_v37  ;;  %v5189_v37 = vcombine.high %v1118_v28, %v1122_v33  ;;  %v1167_v28 = vld [vmem:[%s6125_s13 + $0x7d8] sm:$0xff] }
 0x2b0   : > { %4568 = vmatpush1.bf16.msra.mxu1 %v5134_v38  ;;  %4405 = vmatprep.subr.bf16.mxu0 %v5141_v39  ;;  %v5191_v38 = vcombine.high %v1119_v34, %v1123_v35  ;;  %v1126_v39 = vld [vmem:[%s6125_s13 + $0x690] sm:$0xff]  ;;  %v1171_v33 = vld [vmem:[%s6125_s13 + $0x7f8] sm:$0xff]  ;;  %v5230_v35 = vcombine.low %v1159_v22, %v1163_v23 }
 0x2b1   : > { %4569 = vmatprep.subr.bf16.mxu1 %v5143_v0  ;;  %v1130_v0 = vld [vmem:[%s6125_s13 + $0x6b0] sm:$0xff] }
 0x2b2   : > { %v5196_v49 = vcombine.low %v1126_v39, %v1130_v0 }
 0x2b3   : > { %4406 = vmatpush1.bf16.msra.mxu0 %v5140_v43  ;;  %v5197_v43 = vcombine.high %v1126_v39, %v1130_v0  ;;  %v1175_v39 = vld [vmem:[%s6125_s13 + $0x818] sm:$0xff] }
 0x2b4   : > { %4570 = vmatpush1.bf16.msra.mxu1 %v5142_v44  ;;  %4407 = vmatprep.subr.bf16.mxu0 %v5149_v45  ;;  %v5199_v44 = vcombine.high %v1127_v14, %v1131_v40  ;;  %v1134_v45 = vld [vmem:[%s6125_s13 + $0x6d0] sm:$0xff]  ;;  %v1179_v0 = vld [vmem:[%s6125_s13 + $0x838] sm:$0xff]  ;;  %v5238_v40 = vcombine.low %v1167_v28, %v1171_v33 }
 0x2b5   : > { %4571 = vmatprep.subr.bf16.mxu1 %v5151_v46  ;;  %v1138_v46 = vld [vmem:[%s6125_s13 + $0x6f0] sm:$0xff] }
 0x2b6   : > { %v5204_v57 = vcombine.low %v1134_v45, %v1138_v46 }
 0x2b7   : > { %4408 = vmatpush1.bf16.msra.mxu0 %v5148_v18  ;;  %v5205_v18 = vcombine.high %v1134_v45, %v1138_v46  ;;  %v1183_v46 = vld [vmem:[%s6125_s13 + $0x858] sm:$0xff] }
 0x2b8   : > { %4572 = vmatpush1.bf16.msra.mxu1 %v5150_v52  ;;  %4409 = vmatprep.subr.bf16.mxu0 %v5157_v53  ;;  %v5207_v52 = vcombine.high %v1135_v47, %v1139_v31  ;;  %v1142_v53 = vld [vmem:[%s6125_s13 + $0x710] sm:$0xff]  ;;  %v1187_v47 = vld [vmem:[%s6125_s13 + $0x878] sm:$0xff]  ;;  %v5246_v31 = vcombine.low %v1175_v39, %v1179_v0 }
 0x2b9   : > { %4573 = vmatprep.subr.bf16.mxu1 %v5159_v54  ;;  %v1146_v54 = vld [vmem:[%s6125_s13 + $0x730] sm:$0xff] }
 0x2ba   : > { %v5212_v9 = vcombine.low %v1142_v53, %v1146_v54 }
 0x2bb   : > { %4410 = vmatpush1.bf16.msra.mxu0 %v5156_v15  ;;  %v5213_v15 = vcombine.high %v1142_v53, %v1146_v54  ;;  %v1191_v53 = vld [vmem:[%s6125_s13 + $0x898] sm:$0xff] }
 0x2bc   : > { %4574 = vmatpush1.bf16.msra.mxu1 %v5158_v3  ;;  %4411 = vmatprep.subr.bf16.mxu0 %v5165_v5  ;;  %v5215_v3 = vcombine.high %v1143_v19, %v1147_v56  ;;  %v1150_v5 = vld [vmem:[%s6125_s13 + $0x750] sm:$0xff]  ;;  %v1195_v54 = vld [vmem:[%s6125_s13 + $0x8b8] sm:$0xff]  ;;  %v5254_v56 = vcombine.low %v1183_v46, %v1187_v47 }
 0x2bd   : > { %4575 = vmatprep.subr.bf16.mxu1 %v5167_v6  ;;  %v1154_v6 = vld [vmem:[%s6125_s13 + $0x770] sm:$0xff] }
 0x2be   : > { %v5220_v24 = vcombine.low %v1150_v5, %v1154_v6 }
 0x2bf   : > { %4412 = vmatpush1.bf16.msra.mxu0 %v5164_v13  ;;  %v5221_v13 = vcombine.high %v1150_v5, %v1154_v6  ;;  %v1199_v5 = vld [vmem:[%s6125_s13 + $0x8d8] sm:$0xff] }
 0x2c0   : > { %4576 = vmatpush1.bf16.msra.mxu1 %v5166_v16  ;;  %4413 = vmatprep.subr.bf16.mxu0 %v5173_v62  ;;  %v5223_v16 = vcombine.high %v1151_v7, %v1155_v8  ;;  %v1158_v62 = vld [vmem:[%s6125_s13 + $0x790] sm:$0xff]  ;;  %v5262_v7 = vcombine.low %v1191_v53, %v1195_v54 }
 0x2c1   : > { %4577 = vmatprep.subr.bf16.mxu1 %v5175_v21  ;;  %v1162_v21 = vld [vmem:[%s6125_s13 + $0x7b0] sm:$0xff] }
 0x2c2   : > { %v5228_v34 = vcombine.low %v1158_v62, %v1162_v21 }
 0x2c3   : > { %4414 = vmatpush1.bf16.msra.mxu0 %v5172_v26  ;;  %v5229_v26 = vcombine.high %v1158_v62, %v1162_v21 }
 0x2c4   : > { %4578 = vmatpush1.bf16.msra.mxu1 %v5174_v27  ;;  %4415 = vmatprep.subr.bf16.mxu0 %v5181_v30  ;;  %v5231_v27 = vcombine.high %v1159_v22, %v1163_v23  ;;  %v1166_v30 = vld [vmem:[%s6125_s13 + $0x7d0] sm:$0xff] }
 0x2c5   : > { %4579 = vmatprep.subr.bf16.mxu1 %v5183_v32  ;;  %v1170_v32 = vld [vmem:[%s6125_s13 + $0x7f0] sm:$0xff] }
 0x2c6   : > { %v5236_v14 = vcombine.low %v1166_v30, %v1170_v32 }
 0x2c7   : > { %4416 = vmatpush1.bf16.msra.mxu0 %v5180_v36  ;;  %v5237_v36 = vcombine.high %v1166_v30, %v1170_v32 }
 0x2c8   : > { %4580 = vmatpush1.bf16.msra.mxu1 %v5182_v20  ;;  %4417 = vmatprep.subr.bf16.mxu0 %v5189_v37  ;;  %v5239_v20 = vcombine.high %v1167_v28, %v1171_v33  ;;  %v1174_v37 = vld [vmem:[%s6125_s13 + $0x810] sm:$0xff] }
 0x2c9   : > { %4581 = vmatprep.subr.bf16.mxu1 %v5191_v38  ;;  %v1178_v38 = vld [vmem:[%s6125_s13 + $0x830] sm:$0xff] }
 0x2ca   : > { %v5244_v45 = vcombine.low %v1174_v37, %v1178_v38 }
 0x2cb   : > { %4418 = vmatpush1.bf16.msra.mxu0 %v5188_v41  ;;  %v5245_v41 = vcombine.high %v1174_v37, %v1178_v38 }
 0x2cc   : > { %4582 = vmatpush1.bf16.msra.mxu1 %v5190_v42  ;;  %4419 = vmatprep.subr.bf16.mxu0 %v5197_v43  ;;  %v5247_v42 = vcombine.high %v1175_v39, %v1179_v0  ;;  %v1182_v43 = vld [vmem:[%s6125_s13 + $0x850] sm:$0xff] }
 0x2cd   : > { %4583 = vmatprep.subr.bf16.mxu1 %v5199_v44  ;;  %v1186_v44 = vld [vmem:[%s6125_s13 + $0x870] sm:$0xff] }
 0x2ce   : > { %v5252_v19 = vcombine.low %v1182_v43, %v1186_v44 }
 0x2cf   : > { %4420 = vmatpush1.bf16.msra.mxu0 %v5196_v49  ;;  %v5253_v49 = vcombine.high %v1182_v43, %v1186_v44 }
 0x2d0   : > { %4584 = vmatpush1.bf16.msra.mxu1 %v5198_v51  ;;  %4421 = vmatprep.subr.bf16.mxu0 %v5205_v18  ;;  %v1190_v51 = vld [vmem:[%s6125_s13 + $0x890] sm:$0xff] }
 0x2d1   : > { %4585 = vmatprep.subr.bf16.mxu1 %v5207_v52  ;;  %v1194_v18 = vld [vmem:[%s6125_s13 + $0x8b0] sm:$0xff]  ;;  %v5255_v52 = vcombine.high %v1183_v46, %v1187_v47 }
 0x2d2   : > { %v5260_v6 = vcombine.low %v1190_v51, %v1194_v18  ;;  %v1238_v47 = vld [vmem:[%s6125_s13 + $0xa10] sm:$0xff] }
 0x2d3   : > { %4422 = vmatpush1.bf16.msra.mxu0 %v5204_v57  ;;  %v5261_v57 = vcombine.high %v1190_v51, %v1194_v18  ;;  %v1243_v51 = vld [vmem:[%s6125_s13 + $0xa38] sm:$0xff] }
 0x2d4   : > { %4586 = vmatpush1.bf16.msra.mxu1 %v5206_v59  ;;  %4423 = vmatprep.subr.bf16.mxu0 %v5213_v15  ;;  %v5263_v59 = vcombine.high %v1191_v53, %v1195_v54  ;;  %v1198_v15 = vld [vmem:[%s6125_s13 + $0x8d0] sm:$0xff] }
 0x2d5   : > { %4587 = vmatprep.subr.bf16.mxu1 %v5215_v3  ;;  %v1202_v3 = vld [vmem:[%s6125_s13 + $0x8f0] sm:$0xff] }
 0x2d6   : > { %v5269_v8 = vcombine.high %v1198_v15, %v1202_v3  ;;  %v5268_v62 = vcombine.low %v1198_v15, %v1202_v3 }
 0x2d7   : > { %4424 = vmatpush1.bf16.msra.mxu0 %v5212_v9  ;;  %v1206_v9 = vld [vmem:[%s6125_s13 + $0x910] sm:$0xff] }
 0x2d8   : > { %4588 = vmatpush1.bf16.msra.mxu1 %v5214_v12  ;;  %4425 = vmatprep.subr.bf16.mxu0 %v5221_v13  ;;  %v1210_v12 = vld [vmem:[%s6125_s13 + $0x930] sm:$0xff]  ;;  %v1207_v13 = vld [vmem:[%s6125_s13 + $0x918] sm:$0xff] }
 0x2d9   : > { %4589 = vmatprep.subr.bf16.mxu1 %v5223_v16  ;;  %v1211_v16 = vld [vmem:[%s6125_s13 + $0x938] sm:$0xff]  ;;  %v5277_v22 = vcombine.high %v1206_v9, %v1210_v12  ;;  %v5276_v30 = vcombine.low %v1206_v9, %v1210_v12 }
 0x2da   : > { %v5279_v23 = vcombine.high %v1207_v13, %v1211_v16  ;;  %v5278_v32 = vcombine.low %v1207_v13, %v1211_v16 }
 0x2db   : > { %4426 = vmatpush1.bf16.msra.mxu0 %v5220_v24  ;;  %v1214_v24 = vld [vmem:[%s6125_s13 + $0x950] sm:$0xff] }
 0x2dc   : > { %4590 = vmatpush1.bf16.msra.mxu1 %v5222_v25  ;;  %4427 = vmatprep.subr.bf16.mxu0 %v5229_v26  ;;  %v1218_v25 = vld [vmem:[%s6125_s13 + $0x970] sm:$0xff]  ;;  %v1215_v26 = vld [vmem:[%s6125_s13 + $0x958] sm:$0xff] }
 0x2dd   : > { %4591 = vmatprep.subr.bf16.mxu1 %v5231_v27  ;;  %v1219_v27 = vld [vmem:[%s6125_s13 + $0x978] sm:$0xff]  ;;  %v5285_v28 = vcombine.high %v1214_v24, %v1218_v25  ;;  %v5284_v37 = vcombine.low %v1214_v24, %v1218_v25 }
 0x2de   : > { %v5287_v33 = vcombine.high %v1215_v26, %v1219_v27  ;;  %v5286_v38 = vcombine.low %v1215_v26, %v1219_v27 }
 0x2df   : > { %4428 = vmatpush1.bf16.msra.mxu0 %v5228_v34  ;;  %v1222_v34 = vld [vmem:[%s6125_s13 + $0x990] sm:$0xff] }
 0x2e0   : > { %4592 = vmatpush1.bf16.msra.mxu1 %v5230_v35  ;;  %4429 = vmatprep.subr.bf16.mxu0 %v5237_v36  ;;  %v1226_v35 = vld [vmem:[%s6125_s13 + $0x9b0] sm:$0xff]  ;;  %v1223_v36 = vld [vmem:[%s6125_s13 + $0x998] sm:$0xff] }
 0x2e1   : > { %4593 = vmatprep.subr.bf16.mxu1 %v5239_v20  ;;  %v1227_v20 = vld [vmem:[%s6125_s13 + $0x9b8] sm:$0xff]  ;;  %v5293_v39 = vcombine.high %v1222_v34, %v1226_v35  ;;  %v5292_v43 = vcombine.low %v1222_v34, %v1226_v35 }
 0x2e2   : > { %v5295_v0 = vcombine.high %v1223_v36, %v1227_v20  ;;  %v5294_v44 = vcombine.low %v1223_v36, %v1227_v20 }
 0x2e3   : > { %4430 = vmatpush1.bf16.msra.mxu0 %v5236_v14  ;;  %v1230_v14 = vld [vmem:[%s6125_s13 + $0x9d0] sm:$0xff] }
 0x2e4   : > { %4594 = vmatpush1.bf16.msra.mxu1 %v5238_v40  ;;  %4440 = vmatprep.subr.bf16.mxu0 %v5245_v41  ;;  %v1234_v40 = vld [vmem:[%s6125_s13 + $0x9f0] sm:$0xff]  ;;  %v1231_v41 = vld [vmem:[%s6125_s13 + $0x9d8] sm:$0xff] }
 0x2e5   : > { %4604 = vmatprep.subr.bf16.mxu1 %v5247_v42  ;;  %v1235_v42 = vld [vmem:[%s6125_s13 + $0x9f8] sm:$0xff]  ;;  %v5300_v18 = vcombine.low %v1230_v14, %v1234_v40 }
 0x2e6   : > { %4432 = vmatmul.mubr.bf16.vlgmr.msra.gmra.mrb[12].mxu0 %v6337_v2  ;;  %v5303_v46 = vcombine.high %v1231_v41, %v1235_v42 }
 0x2e7   : > { %4596 = vmatmul.mubr.bf16.vlgmr.msra.gmra.mrb[12].mxu1 %v6337_v2  ;;  %4441 = vmatpush1.bf16.msra.mxu0 %v5244_v45  ;;  %v1203_v2 = vld [vmem:[%s6125_s13 + $0x8f8] sm:$0xff]  ;;  %v5301_v45 = vcombine.high %v1230_v14, %v1234_v40 }
 0x2e8   : > { %4472 = vmatprep.mubr.bf16.mxu0 %v6343_v11  ;;  %4605 = vmatpush1.bf16.msra.mxu1 %v5246_v31  ;;  %v5270_v21 = vcombine.low %v1199_v5, %v1203_v2  ;;  %v1242_v31 = vld [vmem:[%s6125_s13 + $0xa30] sm:$0xff] }
 0x2e9   : > { %4636 = vmatprep.mubr.bf16.mxu1 %v6343_v11  ;;  %4442 = vmatprep.subr.bf16.mxu0 %v5253_v49  ;;  %v5271_v11 = vcombine.high %v1199_v5, %v1203_v2  ;;  %v1239_v49 = vld [vmem:[%s6125_s13 + $0xa18] sm:$0xff]  ;;  %v5309_v53 = vcombine.high %v1238_v47, %v1242_v31  ;;  %v5308_v15 = vcombine.low %v1238_v47, %v1242_v31 }
 0x2ea   : > { %4606 = vmatprep.subr.bf16.mxu1 %v5255_v52  ;;  %v5302_v52 = vcombine.low %v1231_v41, %v1235_v42  ;;  %v5311_v54 = vcombine.high %v1239_v49, %v1243_v51  ;;  %v5310_v3 = vcombine.low %v1239_v49, %v1243_v51 }
 0x2eb   : > { %4443 = vmatpush1.bf16.msra.mxu0 %v5252_v19  ;;  %v1246_v19 = vld [vmem:[%s6125_s13 + $0xa50] sm:$0xff] }
 0x2ec   : > { %4607 = vmatpush1.bf16.msra.mxu1 %v5254_v56  ;;  %4444 = vmatprep.subr.bf16.mxu0 %v5261_v57  ;;  %v1250_v56 = vld [vmem:[%s6125_s13 + $0xa70] sm:$0xff]  ;;  %v1247_v57 = vld [vmem:[%s6125_s13 + $0xa58] sm:$0xff] }
 0x2ed   : > { %4608 = vmatprep.subr.bf16.mxu1 %v5263_v59  ;;  %v1251_v59 = vld [vmem:[%s6125_s13 + $0xa78] sm:$0xff]  ;;  %v5317_v5 = vcombine.high %v1246_v19, %v1250_v56  ;;  %v5316_v9 = vcombine.low %v1246_v19, %v1250_v56 }
 0x2ee   : > { %v5319_v2 = vcombine.high %v1247_v57, %v1251_v59  ;;  %v5318_v12 = vcombine.low %v1247_v57, %v1251_v59 }
 0x2ef   : > { %4445 = vmatpush1.bf16.msra.mxu0 %v5260_v6  ;;  %v1254_v6 = vld [vmem:[%s6125_s13 + $0xa90] sm:$0xff] }
 0x2f0   : > { %4609 = vmatpush1.bf16.msra.mxu1 %v5262_v7  ;;  %4446 = vmatprep.subr.bf16.mxu0 %v5269_v8  ;;  %v1258_v7 = vld [vmem:[%s6125_s13 + $0xab0] sm:$0xff]  ;;  %v1255_v8 = vld [vmem:[%s6125_s13 + $0xa98] sm:$0xff] }
 0x2f1   : > { %4610 = vmatprep.subr.bf16.mxu1 %v5271_v11  ;;  %v1259_v11 = vld [vmem:[%s6125_s13 + $0xab8] sm:$0xff]  ;;  %v5325_v13 = vcombine.high %v1254_v6, %v1258_v7  ;;  %v5324_v24 = vcombine.low %v1254_v6, %v1258_v7 }
 0x2f2   : > { %v5327_v16 = vcombine.high %v1255_v8, %v1259_v11  ;;  %v5326_v25 = vcombine.low %v1255_v8, %v1259_v11 }
 0x2f3   : > { %4447 = vmatpush1.bf16.msra.mxu0 %v5268_v62  ;;  %v1262_v62 = vld [vmem:[%s6125_s13 + $0xad0] sm:$0xff] }
 0x2f4   : > { %4611 = vmatpush1.bf16.msra.mxu1 %v5270_v21  ;;  %4448 = vmatprep.subr.bf16.mxu0 %v5277_v22  ;;  %v1266_v21 = vld [vmem:[%s6125_s13 + $0xaf0] sm:$0xff]  ;;  %v1263_v22 = vld [vmem:[%s6125_s13 + $0xad8] sm:$0xff] }
 0x2f5   : > { %4612 = vmatprep.subr.bf16.mxu1 %v5279_v23  ;;  %v1267_v23 = vld [vmem:[%s6125_s13 + $0xaf8] sm:$0xff]  ;;  %v5333_v26 = vcombine.high %v1262_v62, %v1266_v21  ;;  %v5332_v34 = vcombine.low %v1262_v62, %v1266_v21 }
 0x2f6   : > { %v5335_v27 = vcombine.high %v1263_v22, %v1267_v23  ;;  %v5334_v35 = vcombine.low %v1263_v22, %v1267_v23  ;;  %v1315_v62 = vld [vmem:[%s6125_s13 + $0xc78] sm:$0xff]  ;;  %v1318_v23 = vld [vmem:[%s6125_s13 + $0xc90] sm:$0xff] }
 0x2f7   : > { %4449 = vmatpush1.bf16.msra.mxu0 %v5276_v30  ;;  %v1270_v30 = vld [vmem:[%s6125_s13 + $0xb10] sm:$0xff] }
 0x2f8   : > { %4613 = vmatpush1.bf16.msra.mxu1 %v5278_v32  ;;  %4450 = vmatprep.subr.bf16.mxu0 %v5285_v28  ;;  %v1274_v32 = vld [vmem:[%s6125_s13 + $0xb30] sm:$0xff]  ;;  %v1271_v28 = vld [vmem:[%s6125_s13 + $0xb18] sm:$0xff] }
 0x2f9   : > { %4614 = vmatprep.subr.bf16.mxu1 %v5287_v33  ;;  %v1275_v33 = vld [vmem:[%s6125_s13 + $0xb38] sm:$0xff]  ;;  %v5341_v36 = vcombine.high %v1270_v30, %v1274_v32  ;;  %v5340_v14 = vcombine.low %v1270_v30, %v1274_v32 }
 0x2fa   : > { %v5343_v20 = vcombine.high %v1271_v28, %v1275_v33  ;;  %v5342_v40 = vcombine.low %v1271_v28, %v1275_v33 }
 0x2fb   : > { %4451 = vmatpush1.bf16.msra.mxu0 %v5284_v37  ;;  %v1278_v37 = vld [vmem:[%s6125_s13 + $0xb50] sm:$0xff] }
 0x2fc   : > { %4615 = vmatpush1.bf16.msra.mxu1 %v5286_v38  ;;  %4452 = vmatprep.subr.bf16.mxu0 %v5293_v39  ;;  %v1282_v38 = vld [vmem:[%s6125_s13 + $0xb70] sm:$0xff]  ;;  %v1279_v39 = vld [vmem:[%s6125_s13 + $0xb58] sm:$0xff] }
 0x2fd   : > { %4616 = vmatprep.subr.bf16.mxu1 %v5295_v0  ;;  %v1283_v0 = vld [vmem:[%s6125_s13 + $0xb78] sm:$0xff]  ;;  %v5349_v41 = vcombine.high %v1278_v37, %v1282_v38  ;;  %v5348_v47 = vcombine.low %v1278_v37, %v1282_v38 }
 0x2fe   : > { %v5351_v42 = vcombine.high %v1279_v39, %v1283_v0  ;;  %v5350_v31 = vcombine.low %v1279_v39, %v1283_v0  ;;  %v1334_v39 = vld [vmem:[%s6125_s13 + $0xd10] sm:$0xff] }
 0x2ff   : > { %4453 = vmatpush1.bf16.msra.mxu0 %v5292_v43  ;;  %v1286_v43 = vld [vmem:[%s6125_s13 + $0xb90] sm:$0xff] }
 0x300   : > { %4617 = vmatpush1.bf16.msra.mxu1 %v5294_v44  ;;  %4454 = vmatprep.subr.bf16.mxu0 %v5301_v45  ;;  %v1290_v44 = vld [vmem:[%s6125_s13 + $0xbb0] sm:$0xff]  ;;  %v1287_v45 = vld [vmem:[%s6125_s13 + $0xb98] sm:$0xff] }
 0x301   : > { %4618 = vmatprep.subr.bf16.mxu1 %v5303_v46  ;;  %v1291_v46 = vld [vmem:[%s6125_s13 + $0xbb8] sm:$0xff]  ;;  %v5357_v49 = vcombine.high %v1286_v43, %v1290_v44  ;;  %v5356_v19 = vcombine.low %v1286_v43, %v1290_v44  ;;  %v1338_v0 = vld [vmem:[%s6125_s13 + $0xd30] sm:$0xff] }
 0x302   : > { %v5359_v51 = vcombine.high %v1287_v45, %v1291_v46  ;;  %v5358_v56 = vcombine.low %v1287_v45, %v1291_v46  ;;  %v5405_v43 = vcombine.high %v1334_v39, %v1338_v0  ;;  %v1342_v45 = vld [vmem:[%s6125_s13 + $0xd50] sm:$0xff] }
 0x303   : > { %4455 = vmatpush1.bf16.msra.mxu0 %v5300_v18  ;;  %v1294_v18 = vld [vmem:[%s6125_s13 + $0xbd0] sm:$0xff] }
 0x304   : > { %4619 = vmatpush1.bf16.msra.mxu1 %v5302_v52  ;;  %4456 = vmatprep.subr.bf16.mxu0 %v5309_v53  ;;  %v1298_v52 = vld [vmem:[%s6125_s13 + $0xbf0] sm:$0xff]  ;;  %v1295_v53 = vld [vmem:[%s6125_s13 + $0xbd8] sm:$0xff] }
 0x305   : > { %4620 = vmatprep.subr.bf16.mxu1 %v5311_v54  ;;  %v1299_v54 = vld [vmem:[%s6125_s13 + $0xbf8] sm:$0xff]  ;;  %v5365_v57 = vcombine.high %v1294_v18, %v1298_v52  ;;  %v5364_v6 = vcombine.low %v1294_v18, %v1298_v52  ;;  %v1346_v46 = vld [vmem:[%s6125_s13 + $0xd70] sm:$0xff] }
 0x306   : > { %v5367_v59 = vcombine.high %v1295_v53, %v1299_v54  ;;  %v5366_v7 = vcombine.low %v1295_v53, %v1299_v54  ;;  %v5413_v52 = vcombine.high %v1342_v45, %v1346_v46  ;;  %v5878_v53 = vmov 1966171168  }
 0x307   : > { %4457 = vmatpush1.bf16.msra.mxu0 %v5308_v15  ;;  %v1302_v15 = vld [vmem:[%s6125_s13 + $0xc10] sm:$0xff]  ;;  %v4715_v54 = vunpack.c.l.s4 %v5878_v53 }
 0x308   : > { %4621 = vmatpush1.bf16.msra.mxu1 %v5310_v3  ;;  %4458 = vmatprep.subr.bf16.mxu0 %v5317_v5  ;;  %v1306_v3 = vld [vmem:[%s6125_s13 + $0xc30] sm:$0xff]  ;;  %v1303_v5 = vld [vmem:[%s6125_s13 + $0xc18] sm:$0xff] }
 0x309   : > { %4622 = vmatprep.subr.bf16.mxu1 %v5319_v2  ;;  %v1307_v2 = vld [vmem:[%s6125_s13 + $0xc38] sm:$0xff]  ;;  %v5373_v8 = vcombine.high %v1302_v15, %v1306_v3 }
 0x30a   : > { %v5375_v11 = vcombine.high %v1303_v5, %v1307_v2  ;;  %v5374_v21 = vcombine.low %v1303_v5, %v1307_v2  ;;  %v1355_v5 = vld [vmem:[%s6125_s13 + $0xdb8] sm:$0xff] }
 0x30b   : > { %4459 = vmatpush1.bf16.msra.mxu0 %v5316_v9  ;;  %v1310_v9 = vld [vmem:[%s6125_s13 + $0xc50] sm:$0xff] }
 0x30c   : > { %4623 = vmatpush1.bf16.msra.mxu1 %v5318_v12  ;;  %4460 = vmatprep.subr.bf16.mxu0 %v5325_v13  ;;  %v1314_v12 = vld [vmem:[%s6125_s13 + $0xc70] sm:$0xff]  ;;  %v5372_v13 = vcombine.low %v1302_v15, %v1306_v3  ;;  %v1351_v3 = vld [vmem:[%s6125_s13 + $0xd98] sm:$0xff] }
 0x30d   : > { %4624 = vmatprep.subr.bf16.mxu1 %v5327_v16  ;;  %v1311_v16 = vld [vmem:[%s6125_s13 + $0xc58] sm:$0xff]  ;;  %v5381_v22 = vcombine.high %v1310_v9, %v1314_v12  ;;  %v5380_v30 = vcombine.low %v1310_v9, %v1314_v12  ;;  %v4716_v9 = vunpack.c.0.s8 %v4715_v54  ;;  %v5423_v12 = vcombine.high %v1351_v3, %v1355_v5 }
 0x30e   : > { %v5382_v32 = vcombine.low %v1311_v16, %v1315_v62 }
 0x30f   : > { %4461 = vmatpush1.bf16.msra.mxu0 %v5324_v24  ;;  %v1322_v24 = vld [vmem:[%s6125_s13 + $0xcb0] sm:$0xff] }
 0x310   : > { %4625 = vmatpush1.bf16.msra.mxu1 %v5326_v25  ;;  %4462 = vmatprep.subr.bf16.mxu0 %v5333_v26  ;;  %v5383_v25 = vcombine.high %v1311_v16, %v1315_v62  ;;  %v1319_v26 = vld [vmem:[%s6125_s13 + $0xc98] sm:$0xff]  ;;  %v5389_v28 = vcombine.high %v1318_v23, %v1322_v24  ;;  %v1362_v16 = vld [vmem:[%s6125_s13 + $0xdf0] sm:$0xff] }
 0x311   : > { %4626 = vmatprep.subr.bf16.mxu1 %v5335_v27  ;;  %v1323_v27 = vld [vmem:[%s6125_s13 + $0xcb8] sm:$0xff] }
 0x312   : > { %v5391_v33 = vcombine.high %v1319_v26, %v1323_v27  ;;  %v5390_v37 = vcombine.low %v1319_v26, %v1323_v27 }
 0x313   : > { %4463 = vmatpush1.bf16.msra.mxu0 %v5332_v34  ;;  %v1326_v34 = vld [vmem:[%s6125_s13 + $0xcd0] sm:$0xff] }
 0x314   : > { %4627 = vmatpush1.bf16.msra.mxu1 %v5334_v35  ;;  %4464 = vmatprep.subr.bf16.mxu0 %v5341_v36  ;;  %v1330_v35 = vld [vmem:[%s6125_s13 + $0xcf0] sm:$0xff]  ;;  %v1331_v36 = vld [vmem:[%s6125_s13 + $0xcf8] sm:$0xff] }
 0x315   : > { %4628 = vmatprep.subr.bf16.mxu1 %v5343_v20  ;;  %v5388_v20 = vcombine.low %v1318_v23, %v1322_v24  ;;  %v5397_v38 = vcombine.high %v1326_v34, %v1330_v35  ;;  %v1359_v23 = vld [vmem:[%s6125_s13 + $0xdd8] sm:$0xff] }
 0x317   : > { %4465 = vmatpush1.bf16.msra.mxu0 %v5340_v14  ;;  %v1335_v14 = vld [vmem:[%s6125_s13 + $0xd18] sm:$0xff] }
 0x318   : > { %4629 = vmatpush1.bf16.msra.mxu1 %v5342_v40  ;;  %4466 = vmatprep.subr.bf16.mxu0 %v5349_v41  ;;  %v1339_v40 = vld [vmem:[%s6125_s13 + $0xd38] sm:$0xff]  ;;  %v5396_v41 = vcombine.low %v1326_v34, %v1330_v35  ;;  %v5422_v35 = vcombine.low %v1351_v3, %v1355_v5 }
 0x319   : > { %4630 = vmatprep.subr.bf16.mxu1 %v5351_v42  ;;  %v5407_v44 = vcombine.high %v1335_v14, %v1339_v40  ;;  %v5406_v18 = vcombine.low %v1335_v14, %v1339_v40  ;;  %v1371_v14 = vld [vmem:[%s6125_s13 + $0xe38] sm:$0xff] }
 0x31a   : > { %v1383_v3 = vld [vmem:[%s6125_s13 + $0xe98] sm:$0xff] }
 0x31b   : > { %4467 = vmatpush1.bf16.msra.mxu0 %v5348_v47  ;;  %v1343_v47 = vld [vmem:[%s6125_s13 + $0xd58] sm:$0xff] }
 0x31c   : > { %4631 = vmatpush1.bf16.msra.mxu1 %v5350_v31  ;;  %4468 = vmatprep.subr.bf16.mxu0 %v5357_v49  ;;  %v1347_v31 = vld [vmem:[%s6125_s13 + $0xd78] sm:$0xff]  ;;  %v5404_v49 = vcombine.low %v1334_v39, %v1338_v0  ;;  %v1370_v39 = vld [vmem:[%s6125_s13 + $0xe30] sm:$0xff] }
 0x31d   : > { %4632 = vmatprep.subr.bf16.mxu1 %v5359_v51  ;;  %v6723_v51 = vld [vmem:[%s304_s27] sm:$0xff]  ;;  %v1367_v0 = vld [vmem:[%s6125_s13 + $0xe18] sm:$0xff] }
 0x31e   : > { %v1441_v15 = vrot.slane %v6723_v51, %v417_v17  ;;  %v1437_v2 = vrot.slane %v6723_v51, %v413_v1  ;;  %v1387_v5 = vld [vmem:[%s6125_s13 + $0xeb8] sm:$0xff] }
 0x31f   : > { %4469 = vmatpush1.bf16.msra.mxu0 %v5356_v19  ;;  %v5415_v19 = vcombine.high %v1343_v47, %v1347_v31 }
 0x320   : > { %4633 = vmatpush1.bf16.msra.mxu1 %v5358_v56  ;;  %4470 = vmatprep.subr.bf16.mxu0 %v5365_v57  ;;  %v1350_v56 = vld [vmem:[%s6125_s13 + $0xd90] sm:$0xff] }
 0x321   : > { %4634 = vmatprep.subr.bf16.mxu1 %v5367_v59  ;;  %v1354_v57 = vld [vmem:[%s6125_s13 + $0xdb0] sm:$0xff]  ;;  %v1433_v59 = vrot.slane %v6723_v51, %v409_v61  ;;  %v5414_v61 = vcombine.low %v1343_v47, %v1347_v31  ;;  %v5439_v47 = vcombine.high %v1367_v0, %v1371_v14 }
 0x322   : > { %v5421_v17 = vcombine.high %v1350_v56, %v1354_v57  ;;  %v1374_v31 = vld [vmem:[%s6125_s13 + $0xe50] sm:$0xff] }
 0x323   : > { %4471 = vmatpush1.bf16.msra.mxu0 %v5364_v6  ;;  %v1445_v6 = vrot.slane %v6723_v51, %v421_v4  ;;  %v1363_v4 = vld [vmem:[%s6125_s13 + $0xdf8] sm:$0xff] }
 0x324   : > { %4635 = vmatpush1.bf16.msra.mxu1 %v5366_v7  ;;  %4481 = vmatprep.subr.bf16.mxu0 %v5373_v8  ;;  %v5412_v7 = vcombine.low %v1342_v45, %v1346_v46 }
 0x325   : > { %4645 = vmatprep.subr.bf16.mxu1 %v5375_v11 }
 0x326   : > { %4473 = vmatmul.mubr.bf16.vlgmr.msra.gmra.mrb[12].mxu0 %v6419_v48 }
 0x327   : > { %4637 = vmatmul.mubr.bf16.vlgmr.msra.gmra.mrb[12].mxu1 %v6419_v48  ;;  %4482 = vmatpush1.bf16.msra.mxu0 %v5372_v13  ;;  %v1327_v48 = vld [vmem:[%s6125_s13 + $0xcd8] sm:$0xff]  ;;  %v1358_v13 = vld [vmem:[%s6125_s13 + $0xdd0] sm:$0xff] }
 0x328   : > { %4513 = vmatprep.mubr.bf16.mxu0 %v6425_v55  ;;  %4646 = vmatpush1.bf16.msra.mxu1 %v5374_v21  ;;  %v5398_v42 = vcombine.low %v1327_v48, %v1331_v36 }
 0x329   : > { %4677 = vmatprep.mubr.bf16.mxu1 %v6425_v55  ;;  %4483 = vmatprep.subr.bf16.mxu0 %v5381_v22  ;;  %v5399_v55 = vcombine.high %v1327_v48, %v1331_v36  ;;  %v5429_v48 = vcombine.high %v1358_v13, %v1362_v16 }
 0x32a   : > { %4647 = vmatprep.subr.bf16.mxu1 %v5383_v25 }
 0x32b   : > { %4484 = vmatpush1.bf16.msra.mxu0 %v5380_v30  ;;  %v5420_v30 = vcombine.low %v1350_v56, %v1354_v57 }
 0x32c   : > { %4648 = vmatpush1.bf16.msra.mxu1 %v5382_v32  ;;  %4485 = vmatprep.subr.bf16.mxu0 %v5389_v28 }
 0x32d   : > { %4649 = vmatprep.subr.bf16.mxu1 %v5391_v33 }
 0x32f   : > { %4486 = vmatpush1.bf16.msra.mxu0 %v5388_v20  ;;  %v6746_v20 = vsub.s32 %v4716_v9, %v6221_v60  ;;  %v1395_v9 = vld [vmem:[%s6125_s13 + $0xef8] sm:$0xff] }
 0x330   : > { %4650 = vmatpush1.bf16.msra.mxu1 %v5390_v37  ;;  %4487 = vmatprep.subr.bf16.mxu0 %v5397_v38  ;;  %v5431_v38 = vcombine.high %v1359_v23, %v1363_v4 }
 0x331   : > { %4651 = vmatprep.subr.bf16.mxu1 %v5399_v55  ;;  %v1366_v55 = vld [vmem:[%s6125_s13 + $0xe10] sm:$0xff] }
 0x332   : > { %v5436_v54 = vcombine.low %v1366_v55, %v1370_v39 }
 0x333   : > { %4488 = vmatpush1.bf16.msra.mxu0 %v5396_v41 }
 0x334   : > { %4652 = vmatpush1.bf16.msra.mxu1 %v5398_v42  ;;  %4489 = vmatprep.subr.bf16.mxu0 %v5405_v43  ;;  %v5428_v42 = vcombine.low %v1358_v13, %v1362_v16  ;;  %v5430_v43 = vcombine.low %v1359_v23, %v1363_v4  ;;  %v5454_v13 = vcombine.low %v1383_v3, %v1387_v5  ;;  %v1403_v23 = vld [vmem:[%s6125_s13 + $0xf38] sm:$0xff] }
 0x335   : > { %4653 = vmatprep.subr.bf16.mxu1 %v5407_v44  ;;  %v5437_v44 = vcombine.high %v1366_v55, %v1370_v39  ;;  %v1419_v55 = vld [vmem:[%s6125_s13 + $0xfb8] sm:$0xff] }
 0x337   : > { %4490 = vmatpush1.bf16.msra.mxu0 %v5404_v49  ;;  %v1378_v49 = vld [vmem:[%s6125_s13 + $0xe70] sm:$0xff] }
 0x338   : > { %4654 = vmatpush1.bf16.msra.mxu1 %v5406_v18  ;;  %4491 = vmatprep.subr.bf16.mxu0 %v5413_v52  ;;  %v1375_v18 = vld [vmem:[%s6125_s13 + $0xe58] sm:$0xff]  ;;  %v5445_v56 = vcombine.high %v1374_v31, %v1378_v49 }
 0x339   : > { %v4187_v8 = vpop.f32.mrb[8].mxu0  ;;  %v4351_v11 = vpop.f32.mrb[8].mxu1  ;;  %4655 = vmatprep.subr.bf16.mxu1 %v5415_v19  ;;  %v1379_v52 = vld [vmem:[%s6125_s13 + $0xe78] sm:$0xff]  ;;  %v5438_v19 = vcombine.low %v1367_v0, %v1371_v14 }
 0x33a   : > { %v5504_v62 = vadd.f32 %v4187_v8, %v1433_v59  ;;  %v5506_v1 = vadd.f32 %v4351_v11, %v1441_v15  ;;  %v4189_v21 = vpop.f32.mrb[9].mxu0  ;;  %v4353_v22 = vpop.f32.mrb[9].mxu1  ;;  %v5447_v57 = vcombine.high %v1375_v18, %v1379_v52  ;;  %v1382_v59 = vld [vmem:[%s6125_s13 + $0xe90] sm:$0xff]  ;;  %v1391_v11 = vld [vmem:[%s6125_s13 + $0xed8] sm:$0xff] }
 0x33b   : > { %v5505_v24 = vadd.f32 %v4189_v21, %v1437_v2  ;;  %v5507_v25 = vadd.f32 %v4353_v22, %v1445_v6  ;;  %v4191_v26 = vpop.f32.mrb[10].mxu0  ;;  %v4355_v27 = vpop.f32.mrb[10].mxu1  ;;  %4492 = vmatpush1.bf16.msra.mxu0 %v5412_v7  ;;  %v1386_v15 = vld [vmem:[%s6125_s13 + $0xeb0] sm:$0xff]  ;;  %v5444_v2 = vcombine.low %v1374_v31, %v1378_v49  ;;  %v5446_v6 = vcombine.low %v1375_v18, %v1379_v52  ;;  %v1399_v22 = vld [vmem:[%s6125_s13 + $0xf18] sm:$0xff] }
 0x33c   : > { %v4686_v32 = vmax.f32 %v5504_v62, 0.0  ;;  %v4688_v28 = vmax.f32 %v5506_v1, 0.0  ;;  %4656 = vmatpush1.bf16.msra.mxu1 %v5414_v61  ;;  %v4192_v33 = vpop.f32.mrb[11].mxu0  ;;  %v4356_v34 = vpop.f32.mrb[11].mxu1  ;;  %4493 = vmatprep.subr.bf16.mxu0 %v5421_v17  ;;  %v5453_v7 = vcombine.high %v1382_v59, %v1386_v15  ;;  %v5455_v61 = vcombine.high %v1383_v3, %v1387_v5  ;;  %v1390_v17 = vld [vmem:[%s6125_s13 + $0xed0] sm:$0xff] }
 0x33d   : > { %v4687_v36 = vmax.f32 %v5505_v24, 0.0  ;;  %v4689_v37 = vmax.f32 %v5507_v25, 0.0  ;;  %4657 = vmatprep.subr.bf16.mxu1 %v5423_v12  ;;  %v1394_v8 = vld [vmem:[%s6125_s13 + $0xef0] sm:$0xff]  ;;  %v5452_v12 = vcombine.low %v1382_v59, %v1386_v15  ;;  %v5463_v62 = vcombine.high %v1391_v11, %v1395_v9 }
 0x33e   : > { %v5461_v16 = vcombine.high %v1390_v17, %v1394_v8  ;;  %v1398_v1 = vld [vmem:[%s6125_s13 + $0xf10] sm:$0xff]  ;;  %v5460_v4 = vcombine.low %v1390_v17, %v1394_v8  ;;  %v5462_v24 = vcombine.low %v1391_v11, %v1395_v9  ;;  %v5471_v26 = vcombine.high %v1399_v22, %v1403_v23 }
 0x33f   : > { %v5496_v40 = vpack.c.bf16 %v4687_v36, %v4686_v32  ;;  %v5497_v41 = vpack.c.bf16 %v4689_v37, %v4688_v28  ;;  %4494 = vmatpush1.bf16.msra.mxu0 %v5420_v30  ;;  %v1402_v21 = vld [vmem:[%s6125_s13 + $0xf30] sm:$0xff]  ;;  %v1407_v32 = vld [vmem:[%s6125_s13 + $0xf58] sm:$0xff]  ;;  %v5470_v34 = vcombine.low %v1399_v22, %v1403_v23  ;;  %v1449_v52 = vrot.slane %v6723_v51, %v425_v58 }
 0x340   : > { %4658 = vmatpush1.bf16.msra.mxu1 %v5422_v35  ;;  %4495 = vmatprep.subr.bf16.mxu0 %v5429_v48  ;;  %v5469_v25 = vcombine.high %v1398_v1, %v1402_v21  ;;  %v1406_v27 = vld [vmem:[%s6125_s13 + $0xf50] sm:$0xff]  ;;  %v1411_v28 = vld [vmem:[%s6125_s13 + $0xf78] sm:$0xff]  ;;  %v5468_v33 = vcombine.low %v1398_v1, %v1402_v21 }
 0x341   : > { %v4720_v45 = vrot.slane %v5496_v40, %v6746_v20  ;;  %v4727_v46 = vrot.slane %v5497_v41, %v6746_v20  ;;  %4659 = vmatprep.subr.bf16.mxu1 %v5431_v38  ;;  %v1410_v30 = vld [vmem:[%s6125_s13 + $0xf70] sm:$0xff]  ;;  %v5479_v48 = vcombine.high %v1407_v32, %v1411_v28  ;;  %v1415_v38 = vld [vmem:[%s6125_s13 + $0xf98] sm:$0xff]  ;;  %v5478_v0 = vcombine.low %v1407_v32, %v1411_v28 }
 0x342   : > { %v5477_v35 = vcombine.high %v1406_v27, %v1410_v30  ;;  %v1414_v36 = vld [vmem:[%s6125_s13 + $0xf90] sm:$0xff]  ;;  %v5476_v39 = vcombine.low %v1406_v27, %v1410_v30  ;;  %v5487_v40 = vcombine.high %v1415_v38, %v1419_v55 }
 0x343   : > { %v6758_v53 = vcombine.low %v4720_v45, %v4727_v46  ;;  %4496 = vmatpush1.bf16.msra.mxu0 %v5428_v42  ;;  %v1418_v37 = vld [vmem:[%s6125_s13 + $0xfb0] sm:$0xff]  ;;  %v5486_v46 = vcombine.low %v1415_v38, %v1419_v55 }
 0x344   : > { %4660 = vmatpush1.bf16.msra.mxu1 %v5430_v43  ;;  %4497 = vmatprep.subr.bf16.mxu0 %v5437_v44  ;;  %v5485_v14 = vcombine.high %v1414_v36, %v1418_v37  ;;  %v1422_v41 = vld [vmem:[%s6125_s13 + $0xfd0] sm:$0xff]  ;;  %v1423_v43 = vld [vmem:[%s6125_s13 + $0xfd8] sm:$0xff]  ;;  %v5484_v45 = vcombine.low %v1414_v36, %v1418_v37 }
 0x345   : > { %4661 = vmatprep.subr.bf16.mxu1 %v5439_v47  ;;  %v1426_v42 = vld [vmem:[%s6125_s13 + $0xff0] sm:$0xff]  ;;  %v1427_v44 = vld [vmem:[%s6125_s13 + $0xff8] sm:$0xff] }
 0x346   : > { %v5493_v47 = vcombine.high %v1422_v41, %v1426_v42  ;;  %v5495_v31 = vcombine.high %v1423_v43, %v1427_v44  ;;  %v5492_v49 = vcombine.low %v1422_v41, %v1426_v42  ;;  %v5494_v18 = vcombine.low %v1423_v43, %v1427_v44 }
 0x347   : > { %4498 = vmatpush1.bf16.msra.mxu0 %v5436_v54  ;;  %v1457_v54 = vrot.slane %v6723_v51, %v433_v50 }
 0x348   : > { %4662 = vmatpush1.bf16.msra.mxu1 %v5438_v19  ;;  %4499 = vmatprep.subr.bf16.mxu0 %v5445_v56  ;;  %v1453_v19 = vrot.slane %v6723_v51, %v429_v29  ;;  %v1461_v56 = vrot.slane %v6723_v51, %v437_v10 }
 0x349   : > { %4663 = vmatprep.subr.bf16.mxu1 %v5447_v57 }
 0x34b   : > { %4500 = vmatpush1.bf16.msra.mxu0 %v5444_v2 }
 0x34c   : > { %4664 = vmatpush1.bf16.msra.mxu1 %v5446_v6  ;;  %4501 = vmatprep.subr.bf16.mxu0 %v5453_v7 }
 0x34d   : > { %4665 = vmatprep.subr.bf16.mxu1 %v5455_v61 }
 0x34f   : > { %4502 = vmatpush1.bf16.msra.mxu0 %v5452_v12 }
 0x350   : > { %4666 = vmatpush1.bf16.msra.mxu1 %v5454_v13  ;;  %4503 = vmatprep.subr.bf16.mxu0 %v5461_v16  ;;  %v4750_v13 = vrot.slane %v6758_v53, %v6746_v20 }
 0x351   : > { %4667 = vmatprep.subr.bf16.mxu1 %v5463_v62 }
 0x353   : > { %4504 = vmatpush1.bf16.msra.mxu0 %v5460_v4 }
 0x354   : > { %4668 = vmatpush1.bf16.msra.mxu1 %v5462_v24  ;;  %4505 = vmatprep.subr.bf16.mxu0 %v5469_v25 }
 0x355   : > { %4669 = vmatprep.subr.bf16.mxu1 %v5471_v26 }
 0x357   : > { %4506 = vmatpush1.bf16.msra.mxu0 %v5468_v33 }
 0x358   : > { %4670 = vmatpush1.bf16.msra.mxu1 %v5470_v34  ;;  %4507 = vmatprep.subr.bf16.mxu0 %v5477_v35 }
 0x359   : > { %4671 = vmatprep.subr.bf16.mxu1 %v5479_v48 }
 0x35b   : > { %4508 = vmatpush1.bf16.msra.mxu0 %v5476_v39 }
 0x35c   : > { %4672 = vmatpush1.bf16.msra.mxu1 %v5478_v0  ;;  %4509 = vmatprep.subr.bf16.mxu0 %v5485_v14 }
 0x35d   : > { %4673 = vmatprep.subr.bf16.mxu1 %v5487_v40 }
 0x35f   : > { %4510 = vmatpush1.bf16.msra.mxu0 %v5484_v45 }
 0x360   : > { %4674 = vmatpush1.bf16.msra.mxu1 %v5486_v46  ;;  %4511 = vmatprep.subr.bf16.mxu0 %v5493_v47 }
 0x361   : > { %4675 = vmatprep.subr.bf16.mxu1 %v5495_v31 }
 0x363   : > { %4512 = vmatpush1.bf16.msra.mxu0 %v5492_v49 }
 0x364   : > { %4676 = vmatpush1.bf16.msra.mxu1 %v5494_v18 }
 0x366   : > { %4514 = vmatmul.mubr.bf16.vlgmr.msra.gmra.mrb[12].mxu0 %v6495_v63 }
 0x367   : > { %4678 = vmatmul.mubr.bf16.vlgmr.msra.gmra.mrb[12].mxu1 %v6495_v63 }
 0x439   : > { %v4515_v57 = vpop.f32.mrb[12].mxu0 }
 0x43a   : > { %v5508_v59 = vadd.f32 %v4515_v57, %v1449_v52  ;;  %v4679_v15 = vpop.f32.mrb[12].mxu1  ;;  %v4517_v63 = vpop.f32.mrb[13].mxu0 }
 0x43b   : > { %v5510_v3 = vadd.f32 %v4679_v15, %v1457_v54  ;;  %v5509_v5 = vadd.f32 %v4517_v63, %v1453_v19  ;;  %v4681_v2 = vpop.f32.mrb[13].mxu1  ;;  %v4519_v58 = vpop.f32.mrb[14].mxu0 }
 0x43c   : > { %v4690_v6 = vmax.f32 %v5508_v59, 0.0  ;;  %v5511_v7 = vadd.f32 %v4681_v2, %v1461_v56  ;;  %v4683_v50 = vpop.f32.mrb[14].mxu1  ;;  %v4520_v61 = vpop.f32.mrb[15].mxu0 }
 0x43d   : > { %v4692_v17 = vmax.f32 %v5510_v3, 0.0  ;;  %v4691_v8 = vmax.f32 %v5509_v5, 0.0  ;;  %v4684_v29 = vpop.f32.mrb[15].mxu1 }
 0x43e   : > { %v4693_v11 = vmax.f32 %v5511_v7, 0.0 }
 0x43f   : > { %v5498_v60 = vpack.c.bf16 %v4691_v8, %v4690_v6 }
 0x440   : > { %v5499_v10 = vpack.c.bf16 %v4693_v11, %v4692_v17 }
 0x441   : > { %v4734_v51 = vrot.slane %v5498_v60, %v6746_v20 }
 0x442   : > { %v4741_v9 = vrot.slane %v5499_v10, %v6746_v20 }
 0x444   : > { %v4743_v12 = vcombine.low %v4734_v51, %v4741_v9 }
 0x446   : > { %v4757_v16 = vrot.slane %v4743_v12, %v6746_v20 }
 0x448   : > { %v4758_v62 = vcombine.low %v4750_v13, %v4757_v16 }
 0x44a   : > { %4760 = vst [vmem:[%s348_s10] sm:$0xff] %v4758_v62 }
 0x44b PF: > { %s20_s23 = sadd.s32 1, %s5867_s23   ;;  %s6867_s11 = smov %s6019_s18 }
 0x44c   : > { %p17_p8 = scmp.ge.s32.totalorder %s20_s23, 4   ;;  %s6868_s6 = sld [smem:[#allocation13_spill]] }
 0x44d   : > { %s6869_s18 = smov %s5851_s19  ;;  %s6870_s19 = smov %s5855_s20 }
 0x44e   : > { %s6871_s20 = smov %s6867_s11  ;;  %s6872_s21 = smov %s5863_s22 }
 0x44f   :  { %19 = sbr.rel (!%p17_p8) target bundleno = 9 (0x9), region = 105 }
 0x452   : > { %s6873_s22 = smov %s6868_s6 }
 0x456   :  { %4789 = vsyncpa [#allocation3], 1 }
 0x457   :  { %4791 = vsyncpa [#allocation3 + $0x1], 1 }
 0x458   :  { %4792 = vsyncpa [#allocation5], 1 }
 0x459   :  { %4793 = vsyncpa [#allocation8], 1 }
 0x45a   :  { %4795 = vsyncpa [#allocation8 + $0x1], 1 }

</bundles_post_ra>
